<compile_context>
chip_gen: v5e
topology: v5e:2x2
jax: 0.10.0
libtpu: 0.0.40
codegen_flags: <defaults>
</compile_context>

<pallas_src>
import functools

import jax
import jax.numpy as jnp
from jax import lax
from jax.experimental import pallas as pl
from jax.experimental.pallas import tpu as pltpu


# ----------------------------- fused Pallas kernel ---------------------------
def _atari_fused_kernel(t_ref, w1_ref, w2_ref, w3_ref, sh_ref, o_ref, *,
                        activate_last):
    """Processes one block of BB batch elements.

    t_ref  : [9, 9, BB, K1]  space-to-depth(4) input, batch on the sublane axis (bf16)
    w1_ref : [4, K1, 32]     layer-1 weights, one chunk per (dh, dw) s2d block (bf16)
    w2_ref : [512, 64]       layer-2 im2col weights, K order (kh, kw, cin) (bf16)
    w3_ref : [9*64, co3]     layer-3 im2col weights, K order (oh, ow, cin) (bf16)
    sh_ref : [3, >=64]       per-layer BN shifts (f32)
    o_ref  : [BB, co3]       output block (f32)
    """
    BB = t_ref.shape[2]
    K1 = t_ref.shape[3]
    co2 = w2_ref.shape[-1]
    co3 = w3_ref.shape[-1]

    shv = sh_ref[...]
    sh1 = shv[0:1, 0:32]
    sh2 = shv[1:2, 0:co2]
    sh3 = shv[2:3, 0:co3]

    # ---- layer 1: 8x8 / stride-4 conv == 2x2 / stride-1 conv on the s2d tensor ----
    # 4 accumulated dots, M = 64*BB, K = K1; f32 accumulation on the MXU.
    acc1 = None
    for dh in range(2):
        for dw in range(2):
            # outer-dim slice of the VMEM block, layout-preserving collapse to 2-D
            blk = t_ref[dh:dh + 8, dw:dw + 8, :, :].reshape(64 * BB, K1)
            d = jnp.dot(blk, w1_ref[dh * 2 + dw],
                        preferred_element_type=jnp.float32)
            acc1 = d if acc1 is None else acc1 + d
    # rows ordered (u, v, b), b fastest -> every later row slice is full-tile aligned
    y1 = jnp.maximum(acc1 + sh1, 0.0).astype(jnp.bfloat16)      # [64*BB, 32]

    # ---- layer 2: 4x4 / stride-2 conv as ONE K=512 im2col matmul (M = 9*BB) ----
    cols = []
    for kh in range(4):
        for kw in range(4):
            rows = []
            for oh in range(3):
                for ow in range(3):
                    r0 = ((2 * oh + kh) * 8 + 2 * ow + kw) * BB   # multiple of BB (>=8)
                    rows.append(y1[r0:r0 + BB, :])                # [BB, 32]
            cols.append(jnp.concatenate(rows, axis=0))            # [9*BB, 32]
    lhs2 = jnp.concatenate(cols, axis=-1)                         # [9*BB, 512]
    acc2 = jnp.dot(lhs2, w2_ref[...], preferred_element_type=jnp.float32)
    y2 = jnp.maximum(acc2 + sh2, 0.0).astype(jnp.bfloat16)        # [9*BB, co2], rows (oh, ow, b)

    # ---- layer 3: 3x3 conv over the whole 3x3 map as ONE K=9*co2 matmul (M = BB) ----
    lhs3 = jnp.concatenate([y2[s * BB:(s + 1) * BB, :] for s in range(9)],
                           axis=-1)                               # [BB, 9*co2]
    y3 = jnp.dot(lhs3, w3_ref[...], preferred_element_type=jnp.float32) + sh3
    if activate_last:
        y3 = jnp.maximum(y3, 0.0)
    o_ref[...] = y3.astype(o_ref.dtype)                           # dense [BB, co3] store


def atari_fused_call(t, w1c, w2p, w3p, shifts, *, block_batch, activate_last=True):
    Bp = t.shape[2]
    K1 = t.shape[3]
    co3 = w3p.shape[-1]
    BB = block_batch
    assert BB % 8 == 0 and Bp % BB == 0
    kernel = functools.partial(_atari_fused_kernel, activate_last=activate_last)
    return pl.pallas_call(
        kernel,
        out_shape=jax.ShapeDtypeStruct((Bp, co3), jnp.float32),
        grid=(Bp // BB,),
        in_specs=[
            pl.BlockSpec((9, 9, BB, K1), lambda b: (0, 0, b, 0)),
            pl.BlockSpec(w1c.shape, lambda b: (0, 0, 0)),
            pl.BlockSpec(w2p.shape, lambda b: (0, 0)),
            pl.BlockSpec(w3p.shape, lambda b: (0, 0)),
            pl.BlockSpec(shifts.shape, lambda b: (0, 0)),
        ],
        out_specs=pl.BlockSpec((BB, co3), lambda b: (b, 0)),
        compiler_params=pltpu.CompilerParams(dimension_semantics=("parallel",)),
    )(t, w1c, w2p, w3p, shifts)


# ------------------------------ JAX glue --------------------------------------
def prepare_params(params, eps=1e-5):
    """One-time prep: fold conv bias + eval-mode BN into (scaled W, shift); repack
    weights into the kernel's im2col orders and cast matmul operands to bf16."""
    def fold(p):
        w, b, gamma, beta, mean, var = p
        scale = gamma / jnp.sqrt(var + eps)
        shift = beta + (b - mean) * scale
        return w * scale[:, None, None, None], shift

    w1, sh1 = fold(params["l1"])     # [32, Cin, 8, 8]
    w2, sh2 = fold(params["l2"])     # [64, 32, 4, 4]
    w3, sh3 = fold(params["l3"])     # [co3, 64, 3, 3]
    cin = w1.shape[1]
    co2, co3 = w2.shape[0], w3.shape[0]

    # layer 1: 4 (dh, dw) chunks, each [16*cin, 32] with K order (rh, rw, cin)
    w1c = (w1.reshape(32, cin, 2, 4, 2, 4)           # (co, ci, dh, rh, dw, rw)
             .transpose(2, 4, 3, 5, 1, 0)            # (dh, dw, rh, rw, ci, co)
             .reshape(4, 16 * cin, 32))
    # layer 2: single im2col matrix, K order (kh, kw, cin)   -> [512, 64]
    w2p = w2.transpose(2, 3, 1, 0).reshape(16 * w2.shape[1], co2)
    # layer 3: single im2col matrix, K order (oh, ow, cin)   -> [576, co3]
    w3p = w3.transpose(2, 3, 1, 0).reshape(9 * w3.shape[1], co3)

    width = max(32, co2, co3)
    shifts = jnp.zeros((3, width), jnp.float32)
    shifts = shifts.at[0, :32].set(sh1).at[1, :co2].set(sh2).at[2, :co3].set(sh3)
    return {"w1c": w1c.astype(jnp.bfloat16),
            "w2p": w2p.astype(jnp.bfloat16),
            "w3p": w3p.astype(jnp.bfloat16),
            "shifts": shifts}


def atari_conv2d_forward(img_nchw, prep, *, block_batch=None, activate_last=True):
    """Equivalent of AtariConv2d.forward(img) with img in NCHW (36x36 spatial)."""
    B, Cin, H, W = img_nchw.shape
    assert H == 36 and W == 36, "structure is hard-wired for 36x36 inputs"
    if block_batch is None:
        # multiple of 8, capped so the double-buffered input block stays small on v5e/v7x
        block_batch = max(8, min(64, ((B + 7) // 8) * 8))
    BB = block_batch
    Bp = ((B + BB - 1) // BB) * BB

    x = img_nchw.astype(jnp.bfloat16)
    # space-to-depth by 4, batch placed on the sublane axis: [9, 9, B, 16*Cin]
    t = (x.reshape(B, Cin, 9, 4, 9, 4)
          .transpose(2, 4, 0, 3, 5, 1)               # (R, C, b, rh, rw, ci)
          .reshape(9, 9, B, 16 * Cin))
    if Bp != B:
        t = jnp.pad(t, ((0, 0), (0, 0), (0, Bp - B), (0, 0)))

    out = atari_fused_call(t, prep["w1c"], prep["w2p"], prep["w3p"], prep["shifts"],
                           block_batch=BB, activate_last=activate_last)
    return out[:B]


# --------------------------- deterministic params -----------------------------
def init_layer(key, cin, cout, k):
    kw, kb, kg, kbt, km, kv = jax.random.split(key, 6)
    fan_in = cin * k * k
    w = jax.random.normal(kw, (cout, cin, k, k), jnp.float32) / jnp.sqrt(fan_in)
    b = 0.01 * jax.random.normal(kb, (cout,), jnp.float32)
    gamma = 1.0 + 0.1 * jax.random.normal(kg, (cout,), jnp.float32)
    beta = 0.05 * jax.random.normal(kbt, (cout,), jnp.float32)
    mean = 0.05 * jax.random.normal(km, (cout,), jnp.float32)
    var = jax.random.uniform(kv, (cout,), jnp.float32, 0.5, 1.5)
    return (w, b, gamma, beta, mean, var)


def init_params(key, input_channel=4, output_channel=64):
    k1, k2, k3 = jax.random.split(key, 3)
    return {
        "l1": init_layer(k1, input_channel, 32, 8),
        "l2": init_layer(k2, 32, 64, 4),
        "l3": init_layer(k3, 64, output_channel, 3),
    }


# ----------------------------- pure-JAX reference -----------------------------
def ref_layer(x, params, stride, apply_relu=True, eps=1e-5):
    w, b, gamma, beta, mean, var = params
    y = lax.conv_general_dilated(
        x, w, window_strides=(stride, stride), padding="VALID",
        dimension_numbers=("NCHW", "OIHW", "NCHW"))
    y = y + b[None, :, None, None]
    y = (y - mean[None, :, None, None]) / jnp.sqrt(var + eps)[None, :, None, None]
    y = y * gamma[None, :, None, None] + beta[None, :, None, None]
    if apply_relu:
        y = jnp.maximum(y, 0.0)
    return y


def ref_forward(img, params, activate_last=True):
    x = ref_layer(img, params["l1"], 4)
    x = ref_layer(x, params["l2"], 2)
    x = ref_layer(x, params["l3"], 1, apply_relu=activate_last)
    return x.reshape(img.shape[0], -1)


# ---------------------------------- main ---------------------------------------
if __name__ == "__main__":
    key = jax.random.PRNGKey(0)
    kx, kp = jax.random.split(key)

    # Small Atari-like input: batch=2, 4 stacked frames, 36x36 spatial
    # (36 -> conv8/4 -> 8 -> conv4/2 -> 3 -> conv3/1 -> 1).
    x = jax.random.uniform(kx, (2, 4, 36, 36), jnp.float32)
    params = init_params(kp, input_channel=4, output_channel=64)

    prep = prepare_params(params)   # one-time: BN folded, weights repacked, bf16

    fwd = jax.jit(functools.partial(atari_conv2d_forward, activate_last=True))
    out = jax.block_until_ready(fwd(x, prep))

    ref = jax.block_until_ready(ref_forward(x, params, activate_last=True))
    assert out.shape == (2, 64), out.shape
    max_err = float(jnp.max(jnp.abs(out - ref)))
    # bf16 matmul operands -> loosened tolerance vs the f32 reference
    assert jnp.allclose(out, ref, rtol=5e-2, atol=5e-2), max_err

    print("KERNEL_OK")
</pallas_src>

<mosaic_0001>
module attributes {stable_mosaic.version = 11 : i64} {
  func.func @_atari_fused_kernel(%arg0: i32, %arg1: memref<9x9x8x64xbf16, #tpu.memory_space<vmem>>, %arg2: memref<4x64x32xbf16, #tpu.memory_space<vmem>>, %arg3: memref<512x64xbf16, #tpu.memory_space<vmem>>, %arg4: memref<576x64xbf16, #tpu.memory_space<vmem>>, %arg5: memref<3x64xf32, #tpu.memory_space<vmem>>, %arg6: memref<8x64xf32, #tpu.memory_space<vmem>>) attributes {dimension_semantics = [#tpu.dimension_semantics<parallel>], iteration_bounds = array<i64: 1>, scalar_prefetch = 0 : i64, scratch_operands = 0 : i64, tpu.core_type = #tpu.core_type<tc>, window_params = [{transform_indices = @transform_0, window_bounds = array<i64: 9, 9, 8, 64>}, {pipeline_mode = #tpu.pipeline_mode<synchronous>, transform_indices = @transform_1, window_bounds = array<i64: 4, 64, 32>}, {pipeline_mode = #tpu.pipeline_mode<synchronous>, transform_indices = @transform_2, window_bounds = array<i64: 512, 64>}, {pipeline_mode = #tpu.pipeline_mode<synchronous>, transform_indices = @transform_3, window_bounds = array<i64: 576, 64>}, {pipeline_mode = #tpu.pipeline_mode<synchronous>, transform_indices = @transform_4, window_bounds = array<i64: 3, 64>}, {transform_indices = @transform_5, window_bounds = array<i64: 8, 64>}]} {
    %c0 = arith.constant 0 : index
    %c0_0 = arith.constant 0 : index
    %0 = vector.load %arg5[%c0, %c0_0] : memref<3x64xf32, #tpu.memory_space<vmem>>, vector<3x64xf32>
    %1 = vector.extract_strided_slice %0 {offsets = [0, 0], sizes = [1, 32], strides = [1, 1]} : vector<3x64xf32> to vector<1x32xf32>
    %2 = vector.extract_strided_slice %0 {offsets = [1, 0], sizes = [1, 64], strides = [1, 1]} : vector<3x64xf32> to vector<1x64xf32>
    %3 = vector.extract_strided_slice %0 {offsets = [2, 0], sizes = [1, 64], strides = [1, 1]} : vector<3x64xf32> to vector<1x64xf32>
    %c0_1 = arith.constant 0 : index
    %c0_2 = arith.constant 0 : index
    %c0_3 = arith.constant 0 : index
    %c0_4 = arith.constant 0 : index
    %4 = vector.load %arg1[%c0_1, %c0_2, %c0_3, %c0_4] : memref<9x9x8x64xbf16, #tpu.memory_space<vmem>>, vector<8x8x8x64xbf16>
    %5 = vector.shape_cast %4 : vector<8x8x8x64xbf16> to vector<512x64xbf16>
    %c0_5 = arith.constant 0 : index
    %c0_6 = arith.constant 0 : index
    %c0_7 = arith.constant 0 : index
    %6 = vector.load %arg2[%c0_5, %c0_6, %c0_7] : memref<4x64x32xbf16, #tpu.memory_space<vmem>>, vector<1x64x32xbf16>
    %7 = vector.shape_cast %6 : vector<1x64x32xbf16> to vector<64x32xbf16>
    %cst = arith.constant dense<0.000000e+00> : vector<512x32xf32>
    %8 = tpu.matmul %5, %7, %cst {dimension_numbers = #tpu.dot_dimension_numbers<[1], [0], [0], [1], [0, 0, 1, 1], [], []>} : vector<512x64xbf16>, vector<64x32xbf16>, vector<512x32xf32> -> vector<512x32xf32>
    %c0_8 = arith.constant 0 : index
    %c1 = arith.constant 1 : index
    %c0_9 = arith.constant 0 : index
    %c0_10 = arith.constant 0 : index
    %9 = vector.load %arg1[%c0_8, %c1, %c0_9, %c0_10] : memref<9x9x8x64xbf16, #tpu.memory_space<vmem>>, vector<8x8x8x64xbf16>
    %10 = vector.shape_cast %9 : vector<8x8x8x64xbf16> to vector<512x64xbf16>
    %c1_11 = arith.constant 1 : index
    %c0_12 = arith.constant 0 : index
    %c0_13 = arith.constant 0 : index
    %11 = vector.load %arg2[%c1_11, %c0_12, %c0_13] : memref<4x64x32xbf16, #tpu.memory_space<vmem>>, vector<1x64x32xbf16>
    %12 = vector.shape_cast %11 : vector<1x64x32xbf16> to vector<64x32xbf16>
    %cst_14 = arith.constant dense<0.000000e+00> : vector<512x32xf32>
    %13 = tpu.matmul %10, %12, %cst_14 {dimension_numbers = #tpu.dot_dimension_numbers<[1], [0], [0], [1], [0, 0, 1, 1], [], []>} : vector<512x64xbf16>, vector<64x32xbf16>, vector<512x32xf32> -> vector<512x32xf32>
    %14 = arith.addf %8, %13 : vector<512x32xf32>
    %c1_15 = arith.constant 1 : index
    %c0_16 = arith.constant 0 : index
    %c0_17 = arith.constant 0 : index
    %c0_18 = arith.constant 0 : index
    %15 = vector.load %arg1[%c1_15, %c0_16, %c0_17, %c0_18] : memref<9x9x8x64xbf16, #tpu.memory_space<vmem>>, vector<8x8x8x64xbf16>
    %16 = vector.shape_cast %15 : vector<8x8x8x64xbf16> to vector<512x64xbf16>
    %c2 = arith.constant 2 : index
    %c0_19 = arith.constant 0 : index
    %c0_20 = arith.constant 0 : index
    %17 = vector.load %arg2[%c2, %c0_19, %c0_20] : memref<4x64x32xbf16, #tpu.memory_space<vmem>>, vector<1x64x32xbf16>
    %18 = vector.shape_cast %17 : vector<1x64x32xbf16> to vector<64x32xbf16>
    %cst_21 = arith.constant dense<0.000000e+00> : vector<512x32xf32>
    %19 = tpu.matmul %16, %18, %cst_21 {dimension_numbers = #tpu.dot_dimension_numbers<[1], [0], [0], [1], [0, 0, 1, 1], [], []>} : vector<512x64xbf16>, vector<64x32xbf16>, vector<512x32xf32> -> vector<512x32xf32>
    %20 = arith.addf %14, %19 : vector<512x32xf32>
    %c1_22 = arith.constant 1 : index
    %c1_23 = arith.constant 1 : index
    %c0_24 = arith.constant 0 : index
    %c0_25 = arith.constant 0 : index
    %21 = vector.load %arg1[%c1_22, %c1_23, %c0_24, %c0_25] : memref<9x9x8x64xbf16, #tpu.memory_space<vmem>>, vector<8x8x8x64xbf16>
    %22 = vector.shape_cast %21 : vector<8x8x8x64xbf16> to vector<512x64xbf16>
    %c3 = arith.constant 3 : index
    %c0_26 = arith.constant 0 : index
    %c0_27 = arith.constant 0 : index
    %23 = vector.load %arg2[%c3, %c0_26, %c0_27] : memref<4x64x32xbf16, #tpu.memory_space<vmem>>, vector<1x64x32xbf16>
    %24 = vector.shape_cast %23 : vector<1x64x32xbf16> to vector<64x32xbf16>
    %cst_28 = arith.constant dense<0.000000e+00> : vector<512x32xf32>
    %25 = tpu.matmul %22, %24, %cst_28 {dimension_numbers = #tpu.dot_dimension_numbers<[1], [0], [0], [1], [0, 0, 1, 1], [], []>} : vector<512x64xbf16>, vector<64x32xbf16>, vector<512x32xf32> -> vector<512x32xf32>
    %26 = arith.addf %20, %25 : vector<512x32xf32>
    %27 = vector.broadcast %1 : vector<1x32xf32> to vector<512x32xf32>
    %28 = arith.addf %26, %27 : vector<512x32xf32>
    %cst_29 = arith.constant 0.000000e+00 : f32
    %29 = vector.broadcast %cst_29 : f32 to vector<512x32xf32>
    %30 = arith.maximumf %28, %29 : vector<512x32xf32>
    %31 = arith.truncf %30 : vector<512x32xf32> to vector<512x32xbf16>
    %32 = vector.extract_strided_slice %31 {offsets = [0, 0], sizes = [8, 32], strides = [1, 1]} : vector<512x32xbf16> to vector<8x32xbf16>
    %33 = vector.extract_strided_slice %31 {offsets = [16, 0], sizes = [8, 32], strides = [1, 1]} : vector<512x32xbf16> to vector<8x32xbf16>
    %34 = vector.extract_strided_slice %31 {offsets = [32, 0], sizes = [8, 32], strides = [1, 1]} : vector<512x32xbf16> to vector<8x32xbf16>
    %35 = vector.extract_strided_slice %31 {offsets = [128, 0], sizes = [8, 32], strides = [1, 1]} : vector<512x32xbf16> to vector<8x32xbf16>
    %36 = vector.extract_strided_slice %31 {offsets = [144, 0], sizes = [8, 32], strides = [1, 1]} : vector<512x32xbf16> to vector<8x32xbf16>
    %37 = vector.extract_strided_slice %31 {offsets = [160, 0], sizes = [8, 32], strides = [1, 1]} : vector<512x32xbf16> to vector<8x32xbf16>
    %38 = vector.extract_strided_slice %31 {offsets = [256, 0], sizes = [8, 32], strides = [1, 1]} : vector<512x32xbf16> to vector<8x32xbf16>
    %39 = vector.extract_strided_slice %31 {offsets = [272, 0], sizes = [8, 32], strides = [1, 1]} : vector<512x32xbf16> to vector<8x32xbf16>
    %40 = vector.extract_strided_slice %31 {offsets = [288, 0], sizes = [8, 32], strides = [1, 1]} : vector<512x32xbf16> to vector<8x32xbf16>
    %41 = tpu.concatenate %32, %33, %34, %35, %36, %37, %38, %39, %40 in 0 : vector<8x32xbf16>, vector<8x32xbf16>, vector<8x32xbf16>, vector<8x32xbf16>, vector<8x32xbf16>, vector<8x32xbf16>, vector<8x32xbf16>, vector<8x32xbf16>, vector<8x32xbf16> -> vector<72x32xbf16>
    %42 = vector.extract_strided_slice %31 {offsets = [8, 0], sizes = [8, 32], strides = [1, 1]} : vector<512x32xbf16> to vector<8x32xbf16>
    %43 = vector.extract_strided_slice %31 {offsets = [24, 0], sizes = [8, 32], strides = [1, 1]} : vector<512x32xbf16> to vector<8x32xbf16>
    %44 = vector.extract_strided_slice %31 {offsets = [40, 0], sizes = [8, 32], strides = [1, 1]} : vector<512x32xbf16> to vector<8x32xbf16>
    %45 = vector.extract_strided_slice %31 {offsets = [136, 0], sizes = [8, 32], strides = [1, 1]} : vector<512x32xbf16> to vector<8x32xbf16>
    %46 = vector.extract_strided_slice %31 {offsets = [152, 0], sizes = [8, 32], strides = [1, 1]} : vector<512x32xbf16> to vector<8x32xbf16>
    %47 = vector.extract_strided_slice %31 {offsets = [168, 0], sizes = [8, 32], strides = [1, 1]} : vector<512x32xbf16> to vector<8x32xbf16>
    %48 = vector.extract_strided_slice %31 {offsets = [264, 0], sizes = [8, 32], strides = [1, 1]} : vector<512x32xbf16> to vector<8x32xbf16>
    %49 = vector.extract_strided_slice %31 {offsets = [280, 0], sizes = [8, 32], strides = [1, 1]} : vector<512x32xbf16> to vector<8x32xbf16>
    %50 = vector.extract_strided_slice %31 {offsets = [296, 0], sizes = [8, 32], strides = [1, 1]} : vector<512x32xbf16> to vector<8x32xbf16>
    %51 = tpu.concatenate %42, %43, %44, %45, %46, %47, %48, %49, %50 in 0 : vector<8x32xbf16>, vector<8x32xbf16>, vector<8x32xbf16>, vector<8x32xbf16>, vector<8x32xbf16>, vector<8x32xbf16>, vector<8x32xbf16>, vector<8x32xbf16>, vector<8x32xbf16> -> vector<72x32xbf16>
    %52 = vector.extract_strided_slice %31 {offsets = [16, 0], sizes = [8, 32], strides = [1, 1]} : vector<512x32xbf16> to vector<8x32xbf16>
    %53 = vector.extract_strided_slice %31 {offsets = [32, 0], sizes = [8, 32], strides = [1, 1]} : vector<512x32xbf16> to vector<8x32xbf16>
    %54 = vector.extract_strided_slice %31 {offsets = [48, 0], sizes = [8, 32], strides = [1, 1]} : vector<512x32xbf16> to vector<8x32xbf16>
    %55 = vector.extract_strided_slice %31 {offsets = [144, 0], sizes = [8, 32], strides = [1, 1]} : vector<512x32xbf16> to vector<8x32xbf16>
    %56 = vector.extract_strided_slice %31 {offsets = [160, 0], sizes = [8, 32], strides = [1, 1]} : vector<512x32xbf16> to vector<8x32xbf16>
    %57 = vector.extract_strided_slice %31 {offsets = [176, 0], sizes = [8, 32], strides = [1, 1]} : vector<512x32xbf16> to vector<8x32xbf16>
    %58 = vector.extract_strided_slice %31 {offsets = [272, 0], sizes = [8, 32], strides = [1, 1]} : vector<512x32xbf16> to vector<8x32xbf16>
    %59 = vector.extract_strided_slice %31 {offsets = [288, 0], sizes = [8, 32], strides = [1, 1]} : vector<512x32xbf16> to vector<8x32xbf16>
    %60 = vector.extract_strided_slice %31 {offsets = [304, 0], sizes = [8, 32], strides = [1, 1]} : vector<512x32xbf16> to vector<8x32xbf16>
    %61 = tpu.concatenate %52, %53, %54, %55, %56, %57, %58, %59, %60 in 0 : vector<8x32xbf16>, vector<8x32xbf16>, vector<8x32xbf16>, vector<8x32xbf16>, vector<8x32xbf16>, vector<8x32xbf16>, vector<8x32xbf16>, vector<8x32xbf16>, vector<8x32xbf16> -> vector<72x32xbf16>
    %62 = vector.extract_strided_slice %31 {offsets = [24, 0], sizes = [8, 32], strides = [1, 1]} : vector<512x32xbf16> to vector<8x32xbf16>
    %63 = vector.extract_strided_slice %31 {offsets = [40, 0], sizes = [8, 32], strides = [1, 1]} : vector<512x32xbf16> to vector<8x32xbf16>
    %64 = vector.extract_strided_slice %31 {offsets = [56, 0], sizes = [8, 32], strides = [1, 1]} : vector<512x32xbf16> to vector<8x32xbf16>
    %65 = vector.extract_strided_slice %31 {offsets = [152, 0], sizes = [8, 32], strides = [1, 1]} : vector<512x32xbf16> to vector<8x32xbf16>
    %66 = vector.extract_strided_slice %31 {offsets = [168, 0], sizes = [8, 32], strides = [1, 1]} : vector<512x32xbf16> to vector<8x32xbf16>
    %67 = vector.extract_strided_slice %31 {offsets = [184, 0], sizes = [8, 32], strides = [1, 1]} : vector<512x32xbf16> to vector<8x32xbf16>
    %68 = vector.extract_strided_slice %31 {offsets = [280, 0], sizes = [8, 32], strides = [1, 1]} : vector<512x32xbf16> to vector<8x32xbf16>
    %69 = vector.extract_strided_slice %31 {offsets = [296, 0], sizes = [8, 32], strides = [1, 1]} : vector<512x32xbf16> to vector<8x32xbf16>
    %70 = vector.extract_strided_slice %31 {offsets = [312, 0], sizes = [8, 32], strides = [1, 1]} : vector<512x32xbf16> to vector<8x32xbf16>
    %71 = tpu.concatenate %62, %63, %64, %65, %66, %67, %68, %69, %70 in 0 : vector<8x32xbf16>, vector<8x32xbf16>, vector<8x32xbf16>, vector<8x32xbf16>, vector<8x32xbf16>, vector<8x32xbf16>, vector<8x32xbf16>, vector<8x32xbf16>, vector<8x32xbf16> -> vector<72x32xbf16>
    %72 = vector.extract_strided_slice %31 {offsets = [64, 0], sizes = [8, 32], strides = [1, 1]} : vector<512x32xbf16> to vector<8x32xbf16>
    %73 = vector.extract_strided_slice %31 {offsets = [80, 0], sizes = [8, 32], strides = [1, 1]} : vector<512x32xbf16> to vector<8x32xbf16>
    %74 = vector.extract_strided_slice %31 {offsets = [96, 0], sizes = [8, 32], strides = [1, 1]} : vector<512x32xbf16> to vector<8x32xbf16>
    %75 = vector.extract_strided_slice %31 {offsets = [192, 0], sizes = [8, 32], strides = [1, 1]} : vector<512x32xbf16> to vector<8x32xbf16>
    %76 = vector.extract_strided_slice %31 {offsets = [208, 0], sizes = [8, 32], strides = [1, 1]} : vector<512x32xbf16> to vector<8x32xbf16>
    %77 = vector.extract_strided_slice %31 {offsets = [224, 0], sizes = [8, 32], strides = [1, 1]} : vector<512x32xbf16> to vector<8x32xbf16>
    %78 = vector.extract_strided_slice %31 {offsets = [320, 0], sizes = [8, 32], strides = [1, 1]} : vector<512x32xbf16> to vector<8x32xbf16>
    %79 = vector.extract_strided_slice %31 {offsets = [336, 0], sizes = [8, 32], strides = [1, 1]} : vector<512x32xbf16> to vector<8x32xbf16>
    %80 = vector.extract_strided_slice %31 {offsets = [352, 0], sizes = [8, 32], strides = [1, 1]} : vector<512x32xbf16> to vector<8x32xbf16>
    %81 = tpu.concatenate %72, %73, %74, %75, %76, %77, %78, %79, %80 in 0 : vector<8x32xbf16>, vector<8x32xbf16>, vector<8x32xbf16>, vector<8x32xbf16>, vector<8x32xbf16>, vector<8x32xbf16>, vector<8x32xbf16>, vector<8x32xbf16>, vector<8x32xbf16> -> vector<72x32xbf16>
    %82 = vector.extract_strided_slice %31 {offsets = [72, 0], sizes = [8, 32], strides = [1, 1]} : vector<512x32xbf16> to vector<8x32xbf16>
    %83 = vector.extract_strided_slice %31 {offsets = [88, 0], sizes = [8, 32], strides = [1, 1]} : vector<512x32xbf16> to vector<8x32xbf16>
    %84 = vector.extract_strided_slice %31 {offsets = [104, 0], sizes = [8, 32], strides = [1, 1]} : vector<512x32xbf16> to vector<8x32xbf16>
    %85 = vector.extract_strided_slice %31 {offsets = [200, 0], sizes = [8, 32], strides = [1, 1]} : vector<512x32xbf16> to vector<8x32xbf16>
    %86 = vector.extract_strided_slice %31 {offsets = [216, 0], sizes = [8, 32], strides = [1, 1]} : vector<512x32xbf16> to vector<8x32xbf16>
    %87 = vector.extract_strided_slice %31 {offsets = [232, 0], sizes = [8, 32], strides = [1, 1]} : vector<512x32xbf16> to vector<8x32xbf16>
    %88 = vector.extract_strided_slice %31 {offsets = [328, 0], sizes = [8, 32], strides = [1, 1]} : vector<512x32xbf16> to vector<8x32xbf16>
    %89 = vector.extract_strided_slice %31 {offsets = [344, 0], sizes = [8, 32], strides = [1, 1]} : vector<512x32xbf16> to vector<8x32xbf16>
    %90 = vector.extract_strided_slice %31 {offsets = [360, 0], sizes = [8, 32], strides = [1, 1]} : vector<512x32xbf16> to vector<8x32xbf16>
    %91 = tpu.concatenate %82, %83, %84, %85, %86, %87, %88, %89, %90 in 0 : vector<8x32xbf16>, vector<8x32xbf16>, vector<8x32xbf16>, vector<8x32xbf16>, vector<8x32xbf16>, vector<8x32xbf16>, vector<8x32xbf16>, vector<8x32xbf16>, vector<8x32xbf16> -> vector<72x32xbf16>
    %92 = vector.extract_strided_slice %31 {offsets = [80, 0], sizes = [8, 32], strides = [1, 1]} : vector<512x32xbf16> to vector<8x32xbf16>
    %93 = vector.extract_strided_slice %31 {offsets = [96, 0], sizes = [8, 32], strides = [1, 1]} : vector<512x32xbf16> to vector<8x32xbf16>
    %94 = vector.extract_strided_slice %31 {offsets = [112, 0], sizes = [8, 32], strides = [1, 1]} : vector<512x32xbf16> to vector<8x32xbf16>
    %95 = vector.extract_strided_slice %31 {offsets = [208, 0], sizes = [8, 32], strides = [1, 1]} : vector<512x32xbf16> to vector<8x32xbf16>
    %96 = vector.extract_strided_slice %31 {offsets = [224, 0], sizes = [8, 32], strides = [1, 1]} : vector<512x32xbf16> to vector<8x32xbf16>
    %97 = vector.extract_strided_slice %31 {offsets = [240, 0], sizes = [8, 32], strides = [1, 1]} : vector<512x32xbf16> to vector<8x32xbf16>
    %98 = vector.extract_strided_slice %31 {offsets = [336, 0], sizes = [8, 32], strides = [1, 1]} : vector<512x32xbf16> to vector<8x32xbf16>
    %99 = vector.extract_strided_slice %31 {offsets = [352, 0], sizes = [8, 32], strides = [1, 1]} : vector<512x32xbf16> to vector<8x32xbf16>
    %100 = vector.extract_strided_slice %31 {offsets = [368, 0], sizes = [8, 32], strides = [1, 1]} : vector<512x32xbf16> to vector<8x32xbf16>
    %101 = tpu.concatenate %92, %93, %94, %95, %96, %97, %98, %99, %100 in 0 : vector<8x32xbf16>, vector<8x32xbf16>, vector<8x32xbf16>, vector<8x32xbf16>, vector<8x32xbf16>, vector<8x32xbf16>, vector<8x32xbf16>, vector<8x32xbf16>, vector<8x32xbf16> -> vector<72x32xbf16>
    %102 = vector.extract_strided_slice %31 {offsets = [88, 0], sizes = [8, 32], strides = [1, 1]} : vector<512x32xbf16> to vector<8x32xbf16>
    %103 = vector.extract_strided_slice %31 {offsets = [104, 0], sizes = [8, 32], strides = [1, 1]} : vector<512x32xbf16> to vector<8x32xbf16>
    %104 = vector.extract_strided_slice %31 {offsets = [120, 0], sizes = [8, 32], strides = [1, 1]} : vector<512x32xbf16> to vector<8x32xbf16>
    %105 = vector.extract_strided_slice %31 {offsets = [216, 0], sizes = [8, 32], strides = [1, 1]} : vector<512x32xbf16> to vector<8x32xbf16>
    %106 = vector.extract_strided_slice %31 {offsets = [232, 0], sizes = [8, 32], strides = [1, 1]} : vector<512x32xbf16> to vector<8x32xbf16>
    %107 = vector.extract_strided_slice %31 {offsets = [248, 0], sizes = [8, 32], strides = [1, 1]} : vector<512x32xbf16> to vector<8x32xbf16>
    %108 = vector.extract_strided_slice %31 {offsets = [344, 0], sizes = [8, 32], strides = [1, 1]} : vector<512x32xbf16> to vector<8x32xbf16>
    %109 = vector.extract_strided_slice %31 {offsets = [360, 0], sizes = [8, 32], strides = [1, 1]} : vector<512x32xbf16> to vector<8x32xbf16>
    %110 = vector.extract_strided_slice %31 {offsets = [376, 0], sizes = [8, 32], strides = [1, 1]} : vector<512x32xbf16> to vector<8x32xbf16>
    %111 = tpu.concatenate %102, %103, %104, %105, %106, %107, %108, %109, %110 in 0 : vector<8x32xbf16>, vector<8x32xbf16>, vector<8x32xbf16>, vector<8x32xbf16>, vector<8x32xbf16>, vector<8x32xbf16>, vector<8x32xbf16>, vector<8x32xbf16>, vector<8x32xbf16> -> vector<72x32xbf16>
    %112 = vector.extract_strided_slice %31 {offsets = [128, 0], sizes = [8, 32], strides = [1, 1]} : vector<512x32xbf16> to vector<8x32xbf16>
    %113 = vector.extract_strided_slice %31 {offsets = [144, 0], sizes = [8, 32], strides = [1, 1]} : vector<512x32xbf16> to vector<8x32xbf16>
    %114 = vector.extract_strided_slice %31 {offsets = [160, 0], sizes = [8, 32], strides = [1, 1]} : vector<512x32xbf16> to vector<8x32xbf16>
    %115 = vector.extract_strided_slice %31 {offsets = [256, 0], sizes = [8, 32], strides = [1, 1]} : vector<512x32xbf16> to vector<8x32xbf16>
    %116 = vector.extract_strided_slice %31 {offsets = [272, 0], sizes = [8, 32], strides = [1, 1]} : vector<512x32xbf16> to vector<8x32xbf16>
    %117 = vector.extract_strided_slice %31 {offsets = [288, 0], sizes = [8, 32], strides = [1, 1]} : vector<512x32xbf16> to vector<8x32xbf16>
    %118 = vector.extract_strided_slice %31 {offsets = [384, 0], sizes = [8, 32], strides = [1, 1]} : vector<512x32xbf16> to vector<8x32xbf16>
    %119 = vector.extract_strided_slice %31 {offsets = [400, 0], sizes = [8, 32], strides = [1, 1]} : vector<512x32xbf16> to vector<8x32xbf16>
    %120 = vector.extract_strided_slice %31 {offsets = [416, 0], sizes = [8, 32], strides = [1, 1]} : vector<512x32xbf16> to vector<8x32xbf16>
    %121 = tpu.concatenate %112, %113, %114, %115, %116, %117, %118, %119, %120 in 0 : vector<8x32xbf16>, vector<8x32xbf16>, vector<8x32xbf16>, vector<8x32xbf16>, vector<8x32xbf16>, vector<8x32xbf16>, vector<8x32xbf16>, vector<8x32xbf16>, vector<8x32xbf16> -> vector<72x32xbf16>
    %122 = vector.extract_strided_slice %31 {offsets = [136, 0], sizes = [8, 32], strides = [1, 1]} : vector<512x32xbf16> to vector<8x32xbf16>
    %123 = vector.extract_strided_slice %31 {offsets = [152, 0], sizes = [8, 32], strides = [1, 1]} : vector<512x32xbf16> to vector<8x32xbf16>
    %124 = vector.extract_strided_slice %31 {offsets = [168, 0], sizes = [8, 32], strides = [1, 1]} : vector<512x32xbf16> to vector<8x32xbf16>
    %125 = vector.extract_strided_slice %31 {offsets = [264, 0], sizes = [8, 32], strides = [1, 1]} : vector<512x32xbf16> to vector<8x32xbf16>
    %126 = vector.extract_strided_slice %31 {offsets = [280, 0], sizes = [8, 32], strides = [1, 1]} : vector<512x32xbf16> to vector<8x32xbf16>
    %127 = vector.extract_strided_slice %31 {offsets = [296, 0], sizes = [8, 32], strides = [1, 1]} : vector<512x32xbf16> to vector<8x32xbf16>
    %128 = vector.extract_strided_slice %31 {offsets = [392, 0], sizes = [8, 32], strides = [1, 1]} : vector<512x32xbf16> to vector<8x32xbf16>
    %129 = vector.extract_strided_slice %31 {offsets = [408, 0], sizes = [8, 32], strides = [1, 1]} : vector<512x32xbf16> to vector<8x32xbf16>
    %130 = vector.extract_strided_slice %31 {offsets = [424, 0], sizes = [8, 32], strides = [1, 1]} : vector<512x32xbf16> to vector<8x32xbf16>
    %131 = tpu.concatenate %122, %123, %124, %125, %126, %127, %128, %129, %130 in 0 : vector<8x32xbf16>, vector<8x32xbf16>, vector<8x32xbf16>, vector<8x32xbf16>, vector<8x32xbf16>, vector<8x32xbf16>, vector<8x32xbf16>, vector<8x32xbf16>, vector<8x32xbf16> -> vector<72x32xbf16>
    %132 = vector.extract_strided_slice %31 {offsets = [144, 0], sizes = [8, 32], strides = [1, 1]} : vector<512x32xbf16> to vector<8x32xbf16>
    %133 = vector.extract_strided_slice %31 {offsets = [160, 0], sizes = [8, 32], strides = [1, 1]} : vector<512x32xbf16> to vector<8x32xbf16>
    %134 = vector.extract_strided_slice %31 {offsets = [176, 0], sizes = [8, 32], strides = [1, 1]} : vector<512x32xbf16> to vector<8x32xbf16>
    %135 = vector.extract_strided_slice %31 {offsets = [272, 0], sizes = [8, 32], strides = [1, 1]} : vector<512x32xbf16> to vector<8x32xbf16>
    %136 = vector.extract_strided_slice %31 {offsets = [288, 0], sizes = [8, 32], strides = [1, 1]} : vector<512x32xbf16> to vector<8x32xbf16>
    %137 = vector.extract_strided_slice %31 {offsets = [304, 0], sizes = [8, 32], strides = [1, 1]} : vector<512x32xbf16> to vector<8x32xbf16>
    %138 = vector.extract_strided_slice %31 {offsets = [400, 0], sizes = [8, 32], strides = [1, 1]} : vector<512x32xbf16> to vector<8x32xbf16>
    %139 = vector.extract_strided_slice %31 {offsets = [416, 0], sizes = [8, 32], strides = [1, 1]} : vector<512x32xbf16> to vector<8x32xbf16>
    %140 = vector.extract_strided_slice %31 {offsets = [432, 0], sizes = [8, 32], strides = [1, 1]} : vector<512x32xbf16> to vector<8x32xbf16>
    %141 = tpu.concatenate %132, %133, %134, %135, %136, %137, %138, %139, %140 in 0 : vector<8x32xbf16>, vector<8x32xbf16>, vector<8x32xbf16>, vector<8x32xbf16>, vector<8x32xbf16>, vector<8x32xbf16>, vector<8x32xbf16>, vector<8x32xbf16>, vector<8x32xbf16> -> vector<72x32xbf16>
    %142 = vector.extract_strided_slice %31 {offsets = [152, 0], sizes = [8, 32], strides = [1, 1]} : vector<512x32xbf16> to vector<8x32xbf16>
    %143 = vector.extract_strided_slice %31 {offsets = [168, 0], sizes = [8, 32], strides = [1, 1]} : vector<512x32xbf16> to vector<8x32xbf16>
    %144 = vector.extract_strided_slice %31 {offsets = [184, 0], sizes = [8, 32], strides = [1, 1]} : vector<512x32xbf16> to vector<8x32xbf16>
    %145 = vector.extract_strided_slice %31 {offsets = [280, 0], sizes = [8, 32], strides = [1, 1]} : vector<512x32xbf16> to vector<8x32xbf16>
    %146 = vector.extract_strided_slice %31 {offsets = [296, 0], sizes = [8, 32], strides = [1, 1]} : vector<512x32xbf16> to vector<8x32xbf16>
    %147 = vector.extract_strided_slice %31 {offsets = [312, 0], sizes = [8, 32], strides = [1, 1]} : vector<512x32xbf16> to vector<8x32xbf16>
    %148 = vector.extract_strided_slice %31 {offsets = [408, 0], sizes = [8, 32], strides = [1, 1]} : vector<512x32xbf16> to vector<8x32xbf16>
    %149 = vector.extract_strided_slice %31 {offsets = [424, 0], sizes = [8, 32], strides = [1, 1]} : vector<512x32xbf16> to vector<8x32xbf16>
    %150 = vector.extract_strided_slice %31 {offsets = [440, 0], sizes = [8, 32], strides = [1, 1]} : vector<512x32xbf16> to vector<8x32xbf16>
    %151 = tpu.concatenate %142, %143, %144, %145, %146, %147, %148, %149, %150 in 0 : vector<8x32xbf16>, vector<8x32xbf16>, vector<8x32xbf16>, vector<8x32xbf16>, vector<8x32xbf16>, vector<8x32xbf16>, vector<8x32xbf16>, vector<8x32xbf16>, vector<8x32xbf16> -> vector<72x32xbf16>
    %152 = vector.extract_strided_slice %31 {offsets = [192, 0], sizes = [8, 32], strides = [1, 1]} : vector<512x32xbf16> to vector<8x32xbf16>
    %153 = vector.extract_strided_slice %31 {offsets = [208, 0], sizes = [8, 32], strides = [1, 1]} : vector<512x32xbf16> to vector<8x32xbf16>
    %154 = vector.extract_strided_slice %31 {offsets = [224, 0], sizes = [8, 32], strides = [1, 1]} : vector<512x32xbf16> to vector<8x32xbf16>
    %155 = vector.extract_strided_slice %31 {offsets = [320, 0], sizes = [8, 32], strides = [1, 1]} : vector<512x32xbf16> to vector<8x32xbf16>
    %156 = vector.extract_strided_slice %31 {offsets = [336, 0], sizes = [8, 32], strides = [1, 1]} : vector<512x32xbf16> to vector<8x32xbf16>
    %157 = vector.extract_strided_slice %31 {offsets = [352, 0], sizes = [8, 32], strides = [1, 1]} : vector<512x32xbf16> to vector<8x32xbf16>
    %158 = vector.extract_strided_slice %31 {offsets = [448, 0], sizes = [8, 32], strides = [1, 1]} : vector<512x32xbf16> to vector<8x32xbf16>
    %159 = vector.extract_strided_slice %31 {offsets = [464, 0], sizes = [8, 32], strides = [1, 1]} : vector<512x32xbf16> to vector<8x32xbf16>
    %160 = vector.extract_strided_slice %31 {offsets = [480, 0], sizes = [8, 32], strides = [1, 1]} : vector<512x32xbf16> to vector<8x32xbf16>
    %161 = tpu.concatenate %152, %153, %154, %155, %156, %157, %158, %159, %160 in 0 : vector<8x32xbf16>, vector<8x32xbf16>, vector<8x32xbf16>, vector<8x32xbf16>, vector<8x32xbf16>, vector<8x32xbf16>, vector<8x32xbf16>, vector<8x32xbf16>, vector<8x32xbf16> -> vector<72x32xbf16>
    %162 = vector.extract_strided_slice %31 {offsets = [200, 0], sizes = [8, 32], strides = [1, 1]} : vector<512x32xbf16> to vector<8x32xbf16>
    %163 = vector.extract_strided_slice %31 {offsets = [216, 0], sizes = [8, 32], strides = [1, 1]} : vector<512x32xbf16> to vector<8x32xbf16>
    %164 = vector.extract_strided_slice %31 {offsets = [232, 0], sizes = [8, 32], strides = [1, 1]} : vector<512x32xbf16> to vector<8x32xbf16>
    %165 = vector.extract_strided_slice %31 {offsets = [328, 0], sizes = [8, 32], strides = [1, 1]} : vector<512x32xbf16> to vector<8x32xbf16>
    %166 = vector.extract_strided_slice %31 {offsets = [344, 0], sizes = [8, 32], strides = [1, 1]} : vector<512x32xbf16> to vector<8x32xbf16>
    %167 = vector.extract_strided_slice %31 {offsets = [360, 0], sizes = [8, 32], strides = [1, 1]} : vector<512x32xbf16> to vector<8x32xbf16>
    %168 = vector.extract_strided_slice %31 {offsets = [456, 0], sizes = [8, 32], strides = [1, 1]} : vector<512x32xbf16> to vector<8x32xbf16>
    %169 = vector.extract_strided_slice %31 {offsets = [472, 0], sizes = [8, 32], strides = [1, 1]} : vector<512x32xbf16> to vector<8x32xbf16>
    %170 = vector.extract_strided_slice %31 {offsets = [488, 0], sizes = [8, 32], strides = [1, 1]} : vector<512x32xbf16> to vector<8x32xbf16>
    %171 = tpu.concatenate %162, %163, %164, %165, %166, %167, %168, %169, %170 in 0 : vector<8x32xbf16>, vector<8x32xbf16>, vector<8x32xbf16>, vector<8x32xbf16>, vector<8x32xbf16>, vector<8x32xbf16>, vector<8x32xbf16>, vector<8x32xbf16>, vector<8x32xbf16> -> vector<72x32xbf16>
    %172 = vector.extract_strided_slice %31 {offsets = [208, 0], sizes = [8, 32], strides = [1, 1]} : vector<512x32xbf16> to vector<8x32xbf16>
    %173 = vector.extract_strided_slice %31 {offsets = [224, 0], sizes = [8, 32], strides = [1, 1]} : vector<512x32xbf16> to vector<8x32xbf16>
    %174 = vector.extract_strided_slice %31 {offsets = [240, 0], sizes = [8, 32], strides = [1, 1]} : vector<512x32xbf16> to vector<8x32xbf16>
    %175 = vector.extract_strided_slice %31 {offsets = [336, 0], sizes = [8, 32], strides = [1, 1]} : vector<512x32xbf16> to vector<8x32xbf16>
    %176 = vector.extract_strided_slice %31 {offsets = [352, 0], sizes = [8, 32], strides = [1, 1]} : vector<512x32xbf16> to vector<8x32xbf16>
    %177 = vector.extract_strided_slice %31 {offsets = [368, 0], sizes = [8, 32], strides = [1, 1]} : vector<512x32xbf16> to vector<8x32xbf16>
    %178 = vector.extract_strided_slice %31 {offsets = [464, 0], sizes = [8, 32], strides = [1, 1]} : vector<512x32xbf16> to vector<8x32xbf16>
    %179 = vector.extract_strided_slice %31 {offsets = [480, 0], sizes = [8, 32], strides = [1, 1]} : vector<512x32xbf16> to vector<8x32xbf16>
    %180 = vector.extract_strided_slice %31 {offsets = [496, 0], sizes = [8, 32], strides = [1, 1]} : vector<512x32xbf16> to vector<8x32xbf16>
    %181 = tpu.concatenate %172, %173, %174, %175, %176, %177, %178, %179, %180 in 0 : vector<8x32xbf16>, vector<8x32xbf16>, vector<8x32xbf16>, vector<8x32xbf16>, vector<8x32xbf16>, vector<8x32xbf16>, vector<8x32xbf16>, vector<8x32xbf16>, vector<8x32xbf16> -> vector<72x32xbf16>
    %182 = vector.extract_strided_slice %31 {offsets = [216, 0], sizes = [8, 32], strides = [1, 1]} : vector<512x32xbf16> to vector<8x32xbf16>
    %183 = vector.extract_strided_slice %31 {offsets = [232, 0], sizes = [8, 32], strides = [1, 1]} : vector<512x32xbf16> to vector<8x32xbf16>
    %184 = vector.extract_strided_slice %31 {offsets = [248, 0], sizes = [8, 32], strides = [1, 1]} : vector<512x32xbf16> to vector<8x32xbf16>
    %185 = vector.extract_strided_slice %31 {offsets = [344, 0], sizes = [8, 32], strides = [1, 1]} : vector<512x32xbf16> to vector<8x32xbf16>
    %186 = vector.extract_strided_slice %31 {offsets = [360, 0], sizes = [8, 32], strides = [1, 1]} : vector<512x32xbf16> to vector<8x32xbf16>
    %187 = vector.extract_strided_slice %31 {offsets = [376, 0], sizes = [8, 32], strides = [1, 1]} : vector<512x32xbf16> to vector<8x32xbf16>
    %188 = vector.extract_strided_slice %31 {offsets = [472, 0], sizes = [8, 32], strides = [1, 1]} : vector<512x32xbf16> to vector<8x32xbf16>
    %189 = vector.extract_strided_slice %31 {offsets = [488, 0], sizes = [8, 32], strides = [1, 1]} : vector<512x32xbf16> to vector<8x32xbf16>
    %190 = vector.extract_strided_slice %31 {offsets = [504, 0], sizes = [8, 32], strides = [1, 1]} : vector<512x32xbf16> to vector<8x32xbf16>
    %191 = tpu.concatenate %182, %183, %184, %185, %186, %187, %188, %189, %190 in 0 : vector<8x32xbf16>, vector<8x32xbf16>, vector<8x32xbf16>, vector<8x32xbf16>, vector<8x32xbf16>, vector<8x32xbf16>, vector<8x32xbf16>, vector<8x32xbf16>, vector<8x32xbf16> -> vector<72x32xbf16>
    %192 = tpu.concatenate %41, %51, %61, %71, %81, %91, %101, %111, %121, %131, %141, %151, %161, %171, %181, %191 in 1 : vector<72x32xbf16>, vector<72x32xbf16>, vector<72x32xbf16>, vector<72x32xbf16>, vector<72x32xbf16>, vector<72x32xbf16>, vector<72x32xbf16>, vector<72x32xbf16>, vector<72x32xbf16>, vector<72x32xbf16>, vector<72x32xbf16>, vector<72x32xbf16>, vector<72x32xbf16>, vector<72x32xbf16>, vector<72x32xbf16>, vector<72x32xbf16> -> vector<72x512xbf16>
    %c0_30 = arith.constant 0 : index
    %c0_31 = arith.constant 0 : index
    %193 = vector.load %arg3[%c0_30, %c0_31] : memref<512x64xbf16, #tpu.memory_space<vmem>>, vector<512x64xbf16>
    %cst_32 = arith.constant dense<0.000000e+00> : vector<72x64xf32>
    %194 = tpu.matmul %192, %193, %cst_32 {dimension_numbers = #tpu.dot_dimension_numbers<[1], [0], [0], [1], [0, 0, 1, 1], [], []>} : vector<72x512xbf16>, vector<512x64xbf16>, vector<72x64xf32> -> vector<72x64xf32>
    %195 = vector.broadcast %2 : vector<1x64xf32> to vector<72x64xf32>
    %196 = arith.addf %194, %195 : vector<72x64xf32>
    %cst_33 = arith.constant 0.000000e+00 : f32
    %197 = vector.broadcast %cst_33 : f32 to vector<72x64xf32>
    %198 = arith.maximumf %196, %197 : vector<72x64xf32>
    %199 = arith.truncf %198 : vector<72x64xf32> to vector<72x64xbf16>
    %200 = vector.extract_strided_slice %199 {offsets = [0, 0], sizes = [8, 64], strides = [1, 1]} : vector<72x64xbf16> to vector<8x64xbf16>
    %201 = vector.extract_strided_slice %199 {offsets = [8, 0], sizes = [8, 64], strides = [1, 1]} : vector<72x64xbf16> to vector<8x64xbf16>
    %202 = vector.extract_strided_slice %199 {offsets = [16, 0], sizes = [8, 64], strides = [1, 1]} : vector<72x64xbf16> to vector<8x64xbf16>
    %203 = vector.extract_strided_slice %199 {offsets = [24, 0], sizes = [8, 64], strides = [1, 1]} : vector<72x64xbf16> to vector<8x64xbf16>
    %204 = vector.extract_strided_slice %199 {offsets = [32, 0], sizes = [8, 64], strides = [1, 1]} : vector<72x64xbf16> to vector<8x64xbf16>
    %205 = vector.extract_strided_slice %199 {offsets = [40, 0], sizes = [8, 64], strides = [1, 1]} : vector<72x64xbf16> to vector<8x64xbf16>
    %206 = vector.extract_strided_slice %199 {offsets = [48, 0], sizes = [8, 64], strides = [1, 1]} : vector<72x64xbf16> to vector<8x64xbf16>
    %207 = vector.extract_strided_slice %199 {offsets = [56, 0], sizes = [8, 64], strides = [1, 1]} : vector<72x64xbf16> to vector<8x64xbf16>
    %208 = vector.extract_strided_slice %199 {offsets = [64, 0], sizes = [8, 64], strides = [1, 1]} : vector<72x64xbf16> to vector<8x64xbf16>
    %209 = tpu.concatenate %200, %201, %202, %203, %204, %205, %206, %207, %208 in 1 : vector<8x64xbf16>, vector<8x64xbf16>, vector<8x64xbf16>, vector<8x64xbf16>, vector<8x64xbf16>, vector<8x64xbf16>, vector<8x64xbf16>, vector<8x64xbf16>, vector<8x64xbf16> -> vector<8x576xbf16>
    %c0_34 = arith.constant 0 : index
    %c0_35 = arith.constant 0 : index
    %210 = vector.load %arg4[%c0_34, %c0_35] : memref<576x64xbf16, #tpu.memory_space<vmem>>, vector<576x64xbf16>
    %cst_36 = arith.constant dense<0.000000e+00> : vector<8x64xf32>
    %211 = tpu.matmul %209, %210, %cst_36 {dimension_numbers = #tpu.dot_dimension_numbers<[1], [0], [0], [1], [0, 0, 1, 1], [], []>} : vector<8x576xbf16>, vector<576x64xbf16>, vector<8x64xf32> -> vector<8x64xf32>
    %212 = vector.broadcast %3 : vector<1x64xf32> to vector<8x64xf32>
    %213 = arith.addf %211, %212 : vector<8x64xf32>
    %cst_37 = arith.constant 0.000000e+00 : f32
    %214 = vector.broadcast %cst_37 : f32 to vector<8x64xf32>
    %215 = arith.maximumf %213, %214 : vector<8x64xf32>
    %c0_38 = arith.constant 0 : index
    %c0_39 = arith.constant 0 : index
    %216 = vector.load %arg6[%c0_38, %c0_39] : memref<8x64xf32, #tpu.memory_space<vmem>>, vector<8x64xf32>
    tpu.vector_store %arg6[%c0_38, %c0_39], %215 {strides = array<i32>} : memref<8x64xf32, #tpu.memory_space<vmem>>, vector<8x64xf32>,
    return
  }
  func.func @transform_0(%arg0: i32) -> (i32, i32, i32, i32) {
    %c0_i32 = arith.constant 0 : i32
    %c0_i32_0 = arith.constant 0 : i32
    %c0_i32_1 = arith.constant 0 : i32
    %c0_i32_2 = arith.constant 0 : i32
    return %c0_i32, %c0_i32_0, %arg0, %c0_i32_1 : i32, i32, i32, i32
  }
  func.func @transform_1(%arg0: i32) -> (i32, i32, i32) {
    %c0_i32 = arith.constant 0 : i32
    %c0_i32_0 = arith.constant 0 : i32
    %c0_i32_1 = arith.constant 0 : i32
    %c0_i32_2 = arith.constant 0 : i32
    return %c0_i32, %c0_i32_0, %c0_i32_1 : i32, i32, i32
  }
  func.func @transform_2(%arg0: i32) -> (i32, i32) {
    %c0_i32 = arith.constant 0 : i32
    %c0_i32_0 = arith.constant 0 : i32
    %c0_i32_1 = arith.constant 0 : i32
    return %c0_i32, %c0_i32_0 : i32, i32
  }
  func.func @transform_3(%arg0: i32) -> (i32, i32) {
    %c0_i32 = arith.constant 0 : i32
    %c0_i32_0 = arith.constant 0 : i32
    %c0_i32_1 = arith.constant 0 : i32
    return %c0_i32, %c0_i32_0 : i32, i32
  }
  func.func @transform_4(%arg0: i32) -> (i32, i32) {
    %c0_i32 = arith.constant 0 : i32
    %c0_i32_0 = arith.constant 0 : i32
    %c0_i32_1 = arith.constant 0 : i32
    return %c0_i32, %c0_i32_0 : i32, i32
  }
  func.func @transform_5(%arg0: i32) -> (i32, i32) {
    %c0_i32 = arith.constant 0 : i32
    %c0_i32_0 = arith.constant 0 : i32
    return %arg0, %c0_i32 : i32, i32
  }
}

</mosaic_0001>

<bundles_post_ra>
// kernel: atari_conv2d_forward.1
= control target key start
LH: loop header
LB: loop body
LE: loop exit
PB: predicated region body
PF: predicated region fallthrough
CT: control target
= control target key end

     0   :  { %vm352_vm0 = vcmask 523264   ;;  %vm2446_vm1 = vcmask 1043456   ;;  %s5262_s19 = smov 32   ;;  %s5263_s28 = smov 64   ;;  %vm2903_vm2 = vcmask 261120   ;;  %vm2924_vm3 = vcmask 785408   ;;  %s6601_s1 = inlined_call_operand.vmem [shape: bf16[4,64,32], index: 1, kind: input, shape index: {}]   ;;  %s6602_s0 = inlined_call_operand.vmem [shape: bf16[9,9,8,64], index: 0, kind: input, shape index: {}]   ;;  %s6603_s4 = inlined_call_operand.vmem [shape: f32[3,64], index: 4, kind: input, shape index: {}]   ;;  %s6604_s2 = inlined_call_operand.vmem [shape: bf16[512,64], index: 2, kind: input, shape index: {}]   ;;  %s6605_s3 = inlined_call_operand.vmem [shape: bf16[576,64], index: 3, kind: input, shape index: {}]   ;;  %s6606_s5 = inlined_call_operand.vmem [shape: f32[8,64], index: 5, kind: output, shape index: {}]  }
   0x1   :  { %v5117_v0 = vld [vmem:[%s6601_s1 + $0x38] sm:$0xff]  ;;  %v5116_v4 = vld [vmem:[%s6601_s1 + $0x30] sm:$0xff]  ;;  %v5115_v8 = vld [vmem:[%s6601_s1 + $0x28] sm:$0xff]  ;;  %s5264_s29 = smov 96  }
   0x2   :  { %v5081_v1 = vld [vmem:[%s6601_s1 + $0x18] sm:$0xff]  ;;  %453 = vmatpush.bf16.msra.mxu0 %v5117_v0  ;;  %v5080_v5 = vld [vmem:[%s6601_s1 + $0x10] sm:$0xff]  ;;  %v5079_v9 = vld [vmem:[%s6601_s1 + $0x8] sm:$0xff] }
   0x3   :  { %v5153_v2 = vld [vmem:[%s6601_s1 + $0x58] sm:$0xff]  ;;  %902 = vmatpush.bf16.msra.mxu1 %v5081_v1  ;;  %v5152_v6 = vld [vmem:[%s6601_s1 + $0x50] sm:$0xff]  ;;  %v5151_v10 = vld [vmem:[%s6601_s1 + $0x48] sm:$0xff] }
   0x4   :  { %v5189_v3 = vld [vmem:[%s6601_s1 + $0x78] sm:$0xff]  ;;  %1425 = vmatpush.bf16.msra.mxu2 %v5153_v2  ;;  %v5188_v7 = vld [vmem:[%s6601_s1 + $0x70] sm:$0xff]  ;;  %v5187_v11 = vld [vmem:[%s6601_s1 + $0x68] sm:$0xff] }
   0x5   :  { %2012 = vmatpush.bf16.msra.mxu3 %v5189_v3  ;;  %v5114_v12 = vld [vmem:[%s6601_s1 + $0x20] sm:$0xff]  ;;  %v5154_v19 = vld [vmem:[%s6602_s0 + $0x28] sm:$0xff]  ;;  %v5155_v23 = vld [vmem:[%s6602_s0 + $0x30] sm:$0xff] }
   0x6   :  { %454 = vmatpush.bf16.msra.mxu0 %v5116_v4  ;;  %v5078_v13 = vld [vmem:[%s6601_s1] sm:$0xff]  ;;  %v5083_v20 = vld [vmem:[%s6602_s0 + $0xc] sm:$0xff]  ;;  %v5084_v24 = vld [vmem:[%s6602_s0 + $0x14] sm:$0xff] }
   0x7   :  { %903 = vmatpush.bf16.msra.mxu1 %v5080_v5  ;;  %v5150_v14 = vld [vmem:[%s6601_s1 + $0x40] sm:$0xff]  ;;  %v5047_v21 = vld [vmem:[%s6602_s0 + $0x8] sm:$0xff]  ;;  %v5048_v25 = vld [vmem:[%s6602_s0 + $0x10] sm:$0xff] }
   0x8   :  { %1426 = vmatpush.bf16.msra.mxu2 %v5152_v6  ;;  %v5186_v15 = vld [vmem:[%s6601_s1 + $0x60] sm:$0xff]  ;;  %v5119_v22 = vld [vmem:[%s6602_s0 + $0x2c] sm:$0xff]  ;;  %v5120_v26 = vld [vmem:[%s6602_s0 + $0x34] sm:$0xff] }
   0x9   :  { %2013 = vmatpush.bf16.msra.mxu3 %v5188_v7  ;;  %v5082_v16 = vld [vmem:[%s6602_s0 + $0x4] sm:$0xff]  ;;  %v5156_v27 = vld [vmem:[%s6602_s0 + $0x38] sm:$0xff]  ;;  %v5158_v35 = vld [vmem:[%s6602_s0 + $0x4c] sm:$0xff] }
   0xa   :  { %455 = vmatpush.bf16.msra.mxu0 %v5115_v8  ;;  %v5046_v17 = vld [vmem:[%s6602_s0] sm:$0xff]  ;;  %v5049_v29 = vld [vmem:[%s6602_s0 + $0x18] sm:$0xff]  ;;  %v5086_v32 = vld [vmem:[%s6602_s0 + $0x28] sm:$0xff] }
   0xb   :  { %904 = vmatpush.bf16.msra.mxu1 %v5079_v9  ;;  %v5118_v18 = vld [vmem:[%s6602_s0 + $0x24] sm:$0xff]  ;;  %v5085_v28 = vld [vmem:[%s6602_s0 + $0x1c] sm:$0xff]  ;;  %v5087_v36 = vld [vmem:[%s6602_s0 + $0x30] sm:$0xff] }
   0xc   :  { %1427 = vmatpush.bf16.msra.mxu2 %v5151_v10  ;;  %v5121_v30 = vld [vmem:[%s6602_s0 + $0x3c] sm:$0xff]  ;;  %v5050_v33 = vld [vmem:[%s6602_s0 + $0x24] sm:$0xff]  ;;  %v5051_v37 = vld [vmem:[%s6602_s0 + $0x2c] sm:$0xff] }
   0xd   :  { %2014 = vmatpush.bf16.msra.mxu3 %v5187_v11  ;;  %v5157_v31 = vld [vmem:[%s6602_s0 + $0x40] sm:$0xff]  ;;  %v5122_v34 = vld [vmem:[%s6602_s0 + $0x48] sm:$0xff]  ;;  %v5123_v38 = vld [vmem:[%s6602_s0 + $0x50] sm:$0xff] }
   0xe   :  { %456 = vmatpush.bf16.msra.mxu0 %v5114_v12  ;;  %v5159_v39 = vld [vmem:[%s6602_s0 + $0x54] sm:$0xff]  ;;  %v5160_v43 = vld [vmem:[%s6602_s0 + $0x5c] sm:$0xff]  ;;  %v5161_v47 = vld [vmem:[%s6602_s0 + $0x64] sm:$0xff] }
   0xf   :  { %905 = vmatpush.bf16.msra.mxu1 %v5078_v13  ;;  %v5088_v40 = vld [vmem:[%s6602_s0 + $0x38] sm:$0xff]  ;;  %v5089_v44 = vld [vmem:[%s6602_s0 + $0x40] sm:$0xff]  ;;  %v5090_v48 = vld [vmem:[%s6602_s0 + $0x4c] sm:$0xff] }
  0x10   :  { %1428 = vmatpush.bf16.msra.mxu2 %v5150_v14  ;;  %v5052_v41 = vld [vmem:[%s6602_s0 + $0x34] sm:$0xff]  ;;  %v5053_v45 = vld [vmem:[%s6602_s0 + $0x3c] sm:$0xff]  ;;  %v5054_v49 = vld [vmem:[%s6602_s0 + $0x48] sm:$0xff] }
  0x11   :  { %2015 = vmatpush.bf16.msra.mxu3 %v5186_v15  ;;  %4069 = vmatmul.msk.bf16.vlgmr.msra.gmra.mxu0 %vm352_vm0, %v5082_v16  ;;  %v5124_v42 = vld [vmem:[%s6602_s0 + $0x58] sm:$0xff]  ;;  %v5125_v46 = vld [vmem:[%s6602_s0 + $0x60] sm:$0xff]  ;;  %v5126_v52 = vld [vmem:[%s6602_s0 + $0x6c] sm:$0xff] }
  0x12   :  { %4245 = vmatmul.msk.bf16.vlgmr.msra.gmra.mxu1 %vm352_vm0, %v5046_v17  ;;  %v5162_v53 = vld [vmem:[%s6602_s0 + $0x70] sm:$0xff]  ;;  %v5163_v4 = vld [vmem:[%s6602_s0 + $0x78] sm:$0xff]  ;;  %v21_v5 = vld [vmem:[%s6603_s4] sm:$0x7] }
  0x13   :  { %4493 = vmatmul.msk.bf16.vlgmr.msra.gmra.mxu2 %vm352_vm0, %v5118_v18  ;;  %v5091_v63 = vld [vmem:[%s6602_s0 + $0x54] sm:$0xff]  ;;  %v5506_v7 = vperm.slane %v21_v5, 0  ;;  %v5165_v5 = vld [vmem:[%s6602_s0 + $0x88] sm:$0xff] }
  0x14   :  { %4741 = vmatmul.msk.bf16.vlgmr.msra.gmra.mxu3 %vm352_vm0, %v5154_v19  ;;  %v5055_v0 = vld [vmem:[%s6602_s0 + $0x50] sm:$0xff] }
  0x15   :  { %v5127_v3 = vld [vmem:[%s6602_s0 + $0x74] sm:$0xff] }
  0x21   :  { %4070 = vmatmul.msk.bf16.gmra.mxu0 %vm352_vm0, %v5083_v20 }
  0x22   :  { %4246 = vmatmul.msk.bf16.gmra.mxu1 %vm352_vm0, %v5047_v21 }
  0x23   :  { %4494 = vmatmul.msk.bf16.gmra.mxu2 %vm352_vm0, %v5119_v22 }
  0x24   :  { %4742 = vmatmul.msk.bf16.gmra.mxu3 %vm352_vm0, %v5155_v23 }
  0x31   :  { %4071 = vmatmul.msk.bf16.gmra.mxu0 %vm352_vm0, %v5084_v24  ;;  %v5092_v24 = vld [vmem:[%s6602_s0 + $0x5c] sm:$0xff] }
  0x32   :  { %4247 = vmatmul.msk.bf16.gmra.mxu1 %vm352_vm0, %v5048_v25  ;;  %v5056_v25 = vld [vmem:[%s6602_s0 + $0x58] sm:$0xff] }
  0x33   :  { %4495 = vmatmul.msk.bf16.gmra.mxu2 %vm352_vm0, %v5120_v26  ;;  %v5128_v26 = vld [vmem:[%s6602_s0 + $0x7c] sm:$0xff] }
  0x34   :  { %4743 = vmatmul.msk.bf16.gmra.mxu3 %vm352_vm0, %v5156_v27 }
  0x41   :  { %4072 = vmatmul.msk.bf16.gmra.mxu0 %vm352_vm0, %v5085_v28 }
  0x42   :  { %4248 = vmatmul.msk.bf16.gmra.mxu1 %vm352_vm0, %v5049_v29 }
  0x43   :  { %4496 = vmatmul.msk.bf16.gmra.mxu2 %vm352_vm0, %v5121_v30 }
  0x44   :  { %4744 = vmatmul.msk.bf16.gmra.mxu3 %vm352_vm0, %v5157_v31  ;;  %v5164_v31 = vld [vmem:[%s6602_s0 + $0x80] sm:$0xff] }
  0x51   :  { %4073 = vmatmul.msk.bf16.gmra.mxu0 %vm352_vm0, %v5086_v32  ;;  %v5213_v32 = vld [vmem:[%s6604_s2 + $0xb8] sm:$0xff] }
  0x52   :  { %4249 = vmatmul.msk.bf16.gmra.mxu1 %vm352_vm0, %v5050_v33  ;;  %v5197_v33 = vld [vmem:[%s6604_s2 + $0x38] sm:$0xff]  ;;  %3370 = vmatpush.bf16.msrb.mxu2 %v5213_v32  ;;  %v5130_v32 = vld [vmem:[%s6602_s0 + $0x90] sm:$0xff] }
  0x53   :  { %4497 = vmatmul.msk.bf16.gmra.mxu2 %vm352_vm0, %v5122_v34  ;;  %v5221_v34 = vld [vmem:[%s6604_s2 + $0xf8] sm:$0xff]  ;;  %3304 = vmatpush.bf16.msrb.mxu0 %v5197_v33 }
  0x54   :  { %4745 = vmatmul.msk.bf16.gmra.mxu3 %vm352_vm0, %v5158_v35  ;;  %v5205_v35 = vld [vmem:[%s6604_s2 + $0x78] sm:$0xff] }
  0x55   :  { %3403 = vmatpush.bf16.msrb.mxu3 %v5221_v34  ;;  %3337 = vmatpush.bf16.msrb.mxu1 %v5205_v35  ;;  %v5166_v33 = vld [vmem:[%s6602_s0 + $0x94] sm:$0xff] }
  0x61   :  { %4074 = vmatmul.msk.bf16.gmra.mxu0 %vm352_vm0, %v5087_v36 }
  0x62   :  { %4250 = vmatmul.msk.bf16.gmra.mxu1 %vm352_vm0, %v5051_v37 }
  0x63   :  { %4498 = vmatmul.msk.bf16.gmra.mxu2 %vm352_vm0, %v5123_v38 }
  0x64   :  { %4746 = vmatmul.msk.bf16.gmra.mxu3 %vm352_vm0, %v5159_v39 }
  0x71   :  { %4075 = vmatmul.msk.bf16.gmra.mxu0 %vm352_vm0, %v5088_v40 }
  0x72   :  { %4251 = vmatmul.msk.bf16.gmra.mxu1 %vm352_vm0, %v5052_v41 }
  0x73   :  { %4499 = vmatmul.msk.bf16.gmra.mxu2 %vm352_vm0, %v5124_v42 }
  0x74   :  { %4747 = vmatmul.msk.bf16.gmra.mxu3 %vm352_vm0, %v5160_v43 }
  0x81   :  { %4076 = vmatmul.msk.bf16.gmra.mxu0 %vm352_vm0, %v5089_v44 }
  0x82   :  { %4252 = vmatmul.msk.bf16.gmra.mxu1 %vm352_vm0, %v5053_v45 }
  0x83   :  { %4500 = vmatmul.msk.bf16.gmra.mxu2 %vm352_vm0, %v5125_v46 }
  0x84   :  { %4748 = vmatmul.msk.bf16.gmra.mxu3 %vm352_vm0, %v5161_v47 }
  0x8e   :  { %v458_v50 = vpop.f32.mrf.mxu0 }
  0x8f   :  { %v907_v51 = vpop.f32.mrf.mxu1 }
  0x90   :  { %v908_v54 = vadd.f32 %v907_v51, %v458_v50 }
  0x91   :  { %4077 = vmatmul.msk.bf16.gmra.mxu0 %vm352_vm0, %v5090_v48 }
  0x92   :  { %4253 = vmatmul.msk.bf16.gmra.mxu1 %vm352_vm0, %v5054_v49 }
  0x93   :  { %4501 = vmatmul.msk.bf16.gmra.mxu2 %vm352_vm0, %v5126_v52 }
  0x94   :  { %4749 = vmatmul.msk.bf16.gmra.mxu3 %vm352_vm0, %v5162_v53 }
  0x96   :  { %v1430_v55 = vpop.f32.mrf.mxu2  ;;  %v460_v58 = vpop.f32.mrf.mxu0 }
  0x97   :  { %v2017_v56 = vpop.f32.mrf.mxu3  ;;  %v1590_v57 = vadd.f32 %v1430_v55, %v908_v54  ;;  %v909_v59 = vpop.f32.mrf.mxu1 }
  0x98   :  { %v910_v13 = vadd.f32 %v909_v59, %v460_v58 }
  0x99   :  { %v2177_v60 = vadd.f32 %v2017_v56, %v1590_v57 }
  0x9b   :  { %v2242_v15 = vadd.f32 %v5506_v7, %v2177_v60 }
  0x9d   :  { %v2306_v20 = vmax.f32 %v2242_v15, 0.0 }
  0x9e   :  { %v1432_v61 = vpop.f32.mrf.mxu2  ;;  %v463_v1 = vpop.f32.mrf.mxu0 }
  0x9f   :  { %v2019_v62 = vpop.f32.mrf.mxu3  ;;  %v912_v2 = vpop.f32.mrf.mxu1  ;;  %v1591_v16 = vadd.f32 %v1432_v61, %v910_v13  ;;  %v2370_v38 = vpack.c.bf16 %v2306_v20, %v2306_v20 }
  0xa0   :  { %v913_v6 = vadd.f32 %v912_v2, %v463_v1 }
  0xa1   :  { %4078 = vmatmul.msk.bf16.gmra.mxu0 %vm352_vm0, %v5091_v63  ;;  %v2178_v21 = vadd.f32 %v2019_v62, %v1591_v16  ;;  %v5093_v62 = vld [vmem:[%s6602_s0 + $0x64] sm:$0xff] }
  0xa2   :  { %4254 = vmatmul.msk.bf16.gmra.mxu1 %vm352_vm0, %v5055_v0  ;;  %v5057_v63 = vld [vmem:[%s6602_s0 + $0x60] sm:$0xff] }
  0xa3   :  { %4502 = vmatmul.msk.bf16.gmra.mxu2 %vm352_vm0, %v5127_v3  ;;  %v2243_v39 = vadd.f32 %v5506_v7, %v2178_v21 }
  0xa4   :  { %4750 = vmatmul.msk.bf16.gmra.mxu3 %vm352_vm0, %v5163_v4  ;;  %v5129_v4 = vld [vmem:[%s6602_s0 + $0x84] sm:$0xff] }
  0xa5   :  { %v2307_v47 = vmax.f32 %v2243_v39, 0.0 }
  0xa6   :  { %v1435_v8 = vpop.f32.mrf.mxu2  ;;  %v465_v11 = vpop.f32.mrf.mxu0 }
  0xa7   :  { %v2022_v9 = vpop.f32.mrf.mxu3  ;;  %v1592_v10 = vadd.f32 %v1435_v8, %v913_v6  ;;  %v914_v12 = vpop.f32.mrf.mxu1  ;;  %v2371_v54 = vpack.c.bf16 %v2307_v47, %v2307_v47 }
  0xa8   :  { %v915_v19 = vadd.f32 %v914_v12, %v465_v11 }
  0xa9   :  { %v2179_v14 = vadd.f32 %v2022_v9, %v1592_v10 }
  0xab   :  { %v2244_v17 = vadd.f32 %v5506_v7, %v2179_v14 }
  0xad   :  { %v2308_v18 = vmax.f32 %v2244_v17, 0.0 }
  0xae   :  { %v1437_v22 = vpop.f32.mrf.mxu2  ;;  %v468_v29 = vpop.f32.mrf.mxu0 }
  0xaf   :  { %v2024_v23 = vpop.f32.mrf.mxu3  ;;  %v5519_v27 = vpack.c.bf16 %v2308_v18, %v2308_v18  ;;  %v1593_v28 = vadd.f32 %v1437_v22, %v915_v19  ;;  %v917_v30 = vpop.f32.mrf.mxu1 }
  0xb0   :  { %v918_v42 = vadd.f32 %v917_v30, %v468_v29 }
  0xb1   :  { %v2435_v36 = vunpack.c.l.b16 %v5519_v27  ;;  %v2180_v37 = vadd.f32 %v2024_v23, %v1593_v28  ;;  %4079 = vmatmul.msk.bf16.gmra.mxu0 %vm352_vm0, %v5092_v24  ;;  %v5058_v28 = vld [vmem:[%s6602_s0 + $0x6c] sm:$0xff] }
  0xb2   :  { %4255 = vmatmul.msk.bf16.gmra.mxu1 %vm352_vm0, %v5056_v25 }
  0xb3   :  { %v2436_v40 = vpack.c.b16 %v2435_v36, %v2435_v36  ;;  %v2245_v41 = vadd.f32 %v5506_v7, %v2180_v37  ;;  %4503 = vmatmul.msk.bf16.gmra.mxu2 %vm352_vm0, %v5128_v26 }
  0xb4   :  { %4751 = vmatmul.msk.bf16.gmra.mxu3 %vm352_vm0, %v5164_v31 }
  0xb5   :  { %v2309_v43 = vmax.f32 %v2245_v41, 0.0  ;;  %v5544_v44 = vsel %vm2446_vm1, %v2370_v38, %v2436_v40 }
  0xb6   :  { %v1440_v45 = vpop.f32.mrf.mxu2  ;;  %v470_v50 = vpop.f32.mrf.mxu0 }
  0xb7   :  { %v2027_v46 = vpop.f32.mrf.mxu3  ;;  %v2373_v48 = vpack.c.bf16 %v2309_v43, %v2309_v43  ;;  %v1594_v49 = vadd.f32 %v1440_v45, %v918_v42  ;;  %v919_v51 = vpop.f32.mrf.mxu1  ;;  %v5095_v45 = vld [vmem:[%s6602_s0 + $0x78] sm:$0xff] }
  0xb8   :  { %v920_v58 = vadd.f32 %v919_v51, %v470_v50  ;;  %v5167_v50 = vld [vmem:[%s6602_s0 + $0x9c] sm:$0xff] }
  0xb9   :  { %v2181_v52 = vadd.f32 %v2027_v46, %v1594_v49  ;;  %v2460_v53 = vunpack.c.l.b16 %v2373_v48  ;;  %v5059_v46 = vld [vmem:[%s6602_s0 + $0x74] sm:$0xff] }
  0xba   :  { %v5131_v49 = vld [vmem:[%s6602_s0 + $0x98] sm:$0xff] }
  0xbb   :  { %v2246_v55 = vadd.f32 %v5506_v7, %v2181_v52  ;;  %v2461_v56 = vpack.c.b16 %v2460_v53, %v2460_v53 }
  0xbd   :  { %v2310_v57 = vmax.f32 %v2246_v55, 0.0  ;;  %v2473_v59 = vsel %vm2446_vm1, %v2371_v54, %v2461_v56 }
  0xbe   :  { %v1442_v60 = vpop.f32.mrf.mxu2  ;;  %2739 = vrot.lane.b32.xlu1 %v2473_v59, %s5262_s19  ;;  %v473_v2 = vpop.f32.mrf.mxu0 }
  0xbf   :  { %v2029_v61 = vpop.f32.mrf.mxu3  ;;  %v5555_v0 = vpack.c.bf16 %v2310_v57, %v2310_v57  ;;  %v1595_v1 = vadd.f32 %v1442_v60, %v920_v58  ;;  %v922_v3 = vpop.f32.mrf.mxu1 }
  0xc0   :  { %v923_v6 = vadd.f32 %v922_v3, %v473_v2 }
  0xc1   :  { %v2182_v8 = vadd.f32 %v2029_v61, %v1595_v1  ;;  %v2484_v9 = vunpack.c.l.b16 %v5555_v0  ;;  %4080 = vmatmul.msk.bf16.gmra.mxu0 %vm352_vm0, %v5093_v62 }
  0xc2   :  { %4256 = vmatmul.msk.bf16.gmra.mxu1 %vm352_vm0, %v5057_v63 }
  0xc3   :  { %v2247_v10 = vadd.f32 %v5506_v7, %v2182_v8  ;;  %4504 = vmatmul.msk.bf16.gmra.mxu2 %vm352_vm0, %v5129_v4  ;;  %v2485_v11 = vpack.c.b16 %v2484_v9, %v2484_v9  ;;  %v5132_v8 = vld [vmem:[%s6602_s0 + $0xa0] sm:$0xff] }
  0xc4   :  { %4752 = vmatmul.msk.bf16.gmra.mxu3 %vm352_vm0, %v5165_v5  ;;  %v5096_v5 = vld [vmem:[%s6602_s0 + $0x80] sm:$0xff] }
  0xc5   :  { %v2311_v12 = vmax.f32 %v2247_v10, 0.0  ;;  %v2497_v13 = vsel %vm2446_vm1, %v5519_v27, %v2485_v11  ;;  %v5094_v27 = vld [vmem:[%s6602_s0 + $0x70] sm:$0xff] }
  0xc6   :  { %v1445_v14 = vpop.f32.mrf.mxu2  ;;  %2753 = vrot.lane.b32.xlu2 %v2497_v13, %s5263_s28  ;;  %v475_v18 = vpop.f32.mrf.mxu0  ;;  %v5168_v13 = vld [vmem:[%s6602_s0 + $0xa4] sm:$0xff] }
  0xc7   :  { %v2032_v15 = vpop.f32.mrf.mxu3  ;;  %v5572_v16 = vpack.c.bf16 %v2311_v12, %v2311_v12  ;;  %v1596_v17 = vadd.f32 %v1445_v14, %v923_v6  ;;  %v924_v19 = vpop.f32.mrf.mxu1  ;;  %v5060_v6 = vld [vmem:[%s6602_s0 + $0x7c] sm:$0xff]  ;;  %v5212_v14 = vld [vmem:[%s6604_s2 + $0xb0] sm:$0xff] }
  0xc8   :  { %v925_v20 = vadd.f32 %v924_v19, %v475_v18  ;;  %v5204_v18 = vld [vmem:[%s6604_s2 + $0x70] sm:$0xff]  ;;  %3371 = vmatpush.bf16.msrb.mxu2 %v5212_v14 }
  0xc9   :  { %v5574_v21 = vadd.f32 %v2032_v15, %v1596_v17  ;;  %v2508_v22 = vunpack.c.l.b16 %v5572_v16  ;;  %v5196_v15 = vld [vmem:[%s6604_s2 + $0x30] sm:$0xff]  ;;  %3338 = vmatpush.bf16.msrb.mxu1 %v5204_v18 }
  0xca   :  { %v5220_v17 = vld [vmem:[%s6604_s2 + $0xf0] sm:$0xff]  ;;  %3305 = vmatpush.bf16.msrb.mxu0 %v5196_v15 }
  0xcb   :  { %v2509_v23 = vpack.c.b16 %v2508_v22, %v2508_v22  ;;  %3404 = vmatpush.bf16.msrb.mxu3 %v5220_v17  ;;  %v5062_v15 = vld [vmem:[%s6602_s0 + $0x90] sm:$0xff] }
  0xcd   :  { %v2521_v24 = vsel %vm2446_vm1, %v2373_v48, %v2509_v23 }
  0xce   :  { %v1447_v25 = vpop.f32.mrf.mxu2  ;;  %2767 = vrot.lane.b32.xlu1 %v2521_v24, %s5264_s29  ;;  %v478_v30 = vpop.f32.mrf.mxu0 }
  0xcf   :  { %v2034_v26 = vpop.f32.mrf.mxu3  ;;  %v1597_v29 = vadd.f32 %v1447_v25, %v925_v20  ;;  %v927_v31 = vpop.f32.mrf.mxu1 }
  0xd0   :  { %v928_v34 = vadd.f32 %v927_v31, %v478_v30 }
  0xd1   :  { %v5591_v35 = vadd.f32 %v2034_v26, %v1597_v29  ;;  %4081 = vmatmul.msk.bf16.gmra.mxu0 %vm352_vm0, %v5094_v27 }
  0xd2   :  { %4257 = vmatmul.msk.bf16.gmra.mxu1 %vm352_vm0, %v5058_v28 }
  0xd3   :  { %4505 = vmatmul.msk.bf16.gmra.mxu2 %vm352_vm0, %v5130_v32 }
  0xd4   :  { %4753 = vmatmul.msk.bf16.gmra.mxu3 %vm352_vm0, %v5166_v33 }
  0xd6   :  { %v1450_v36 = vpop.f32.mrf.mxu2  ;;  %v480_v39 = vpop.f32.mrf.mxu0 }
  0xd7   :  { %v2037_v37 = vpop.f32.mrf.mxu3  ;;  %v1598_v38 = vadd.f32 %v1450_v36, %v928_v34  ;;  %v929_v40 = vpop.f32.mrf.mxu1 }
  0xd8   :  { %v930_v57 = vadd.f32 %v929_v40, %v480_v39 }
  0xd9   :  { %v2185_v41 = vadd.f32 %v2037_v37, %v1598_v38 }
  0xdb   :  { %v2250_v59 = vadd.f32 %v5506_v7, %v2185_v41 }
  0xdd   :  { %v2314_v1 = vmax.f32 %v2250_v59, 0.0 }
  0xde   :  { %v1452_v42 = vpop.f32.mrf.mxu2  ;;  %v483_v47 = vpop.f32.mrf.mxu0 }
  0xdf   :  { %v2039_v43 = vpop.f32.mrf.mxu3  ;;  %v932_v48 = vpop.f32.mrf.mxu1  ;;  %v1599_v60 = vadd.f32 %v1452_v42, %v930_v57  ;;  %v2378_v22 = vpack.c.bf16 %v2314_v1, %v2314_v1 }
  0xe0   :  { %v933_v51 = vadd.f32 %v932_v48, %v483_v47  ;;  %v5097_v48 = vld [vmem:[%s6602_s0 + $0x88] sm:$0xff] }
  0xe1   :  { %4082 = vmatmul.msk.bf16.gmra.mxu0 %vm352_vm0, %v5095_v45  ;;  %v2186_v2 = vadd.f32 %v2039_v43, %v1599_v60 }
  0xe2   :  { %4258 = vmatmul.msk.bf16.gmra.mxu1 %vm352_vm0, %v5059_v46 }
  0xe3   :  { %4506 = vmatmul.msk.bf16.gmra.mxu2 %vm352_vm0, %v5131_v49  ;;  %v2251_v23 = vadd.f32 %v5506_v7, %v2186_v2  ;;  %v5061_v49 = vld [vmem:[%s6602_s0 + $0x84] sm:$0xff] }
  0xe4   :  { %4754 = vmatmul.msk.bf16.gmra.mxu3 %vm352_vm0, %v5167_v50 }
  0xe5   :  { %v2315_v31 = vmax.f32 %v2251_v23, 0.0 }
  0xe6   :  { %v1455_v52 = vpop.f32.mrf.mxu2  ;;  %v485_v55 = vpop.f32.mrf.mxu0 }
  0xe7   :  { %v2042_v53 = vpop.f32.mrf.mxu3  ;;  %v1600_v54 = vadd.f32 %v1455_v52, %v933_v51  ;;  %v934_v56 = vpop.f32.mrf.mxu1  ;;  %v2379_v39 = vpack.c.bf16 %v2315_v31, %v2315_v31 }
  0xe8   :  { %v935_v63 = vadd.f32 %v934_v56, %v485_v55  ;;  %v5169_v55 = vld [vmem:[%s6602_s0 + $0xac] sm:$0xff] }
  0xe9   :  { %v2187_v58 = vadd.f32 %v2042_v53, %v1600_v54  ;;  %v5133_v54 = vld [vmem:[%s6602_s0 + $0xa8] sm:$0xff] }
  0xeb   :  { %v2252_v61 = vadd.f32 %v5506_v7, %v2187_v58 }
  0xed   :  { %v2316_v62 = vmax.f32 %v2252_v61, 0.0 }
  0xee   :  { %v1457_v3 = vpop.f32.mrf.mxu2  ;;  %v488_v11 = vpop.f32.mrf.mxu0 }
  0xef   :  { %v2044_v4 = vpop.f32.mrf.mxu3  ;;  %v5624_v9 = vpack.c.bf16 %v2316_v62, %v2316_v62  ;;  %v1601_v10 = vadd.f32 %v1457_v3, %v935_v63  ;;  %v937_v12 = vpop.f32.mrf.mxu1 }
  0xf0   :  { %v938_v26 = vadd.f32 %v937_v12, %v488_v11 }
  0xf1   :  { %v2532_v19 = vunpack.c.l.b16 %v5624_v9  ;;  %v2188_v20 = vadd.f32 %v2044_v4, %v1601_v10  ;;  %4083 = vmatmul.msk.bf16.gmra.mxu0 %vm352_vm0, %v5096_v5 }
  0xf2   :  { %4259 = vmatmul.msk.bf16.gmra.mxu1 %vm352_vm0, %v5060_v6 }
  0xf3   :  { %v2533_v24 = vpack.c.b16 %v2532_v19, %v2532_v19  ;;  %v2253_v25 = vadd.f32 %v5506_v7, %v2188_v20  ;;  %4507 = vmatmul.msk.bf16.gmra.mxu2 %vm352_vm0, %v5132_v8  ;;  %v5134_v20 = vld [vmem:[%s6602_s0 + $0xb4] sm:$0xff] }
  0xf4   :  { %4755 = vmatmul.msk.bf16.gmra.mxu3 %vm352_vm0, %v5168_v13 }
  0xf5   :  { %v2317_v27 = vmax.f32 %v2253_v25, 0.0  ;;  %v5649_v28 = vsel %vm2446_vm1, %v2378_v22, %v2533_v24  ;;  %v5170_v22 = vld [vmem:[%s6602_s0 + $0xb8] sm:$0xff] }
  0xf6   :  { %v1460_v29 = vpop.f32.mrf.mxu2  ;;  %v490_v34 = vpop.f32.mrf.mxu0 }
  0xf7   :  { %v2047_v30 = vpop.f32.mrf.mxu3  ;;  %v2381_v32 = vpack.c.bf16 %v2317_v27, %v2317_v27  ;;  %v1602_v33 = vadd.f32 %v1460_v29, %v938_v26  ;;  %v939_v36 = vpop.f32.mrf.mxu1 }
  0xf8   :  { %v940_v43 = vadd.f32 %v939_v36, %v490_v34  ;;  %v5099_v36 = vld [vmem:[%s6602_s0 + $0x9c] sm:$0xff] }
  0xf9   :  { %v2189_v37 = vadd.f32 %v2047_v30, %v1602_v33  ;;  %v2556_v38 = vunpack.c.l.b16 %v2381_v32 }
  0xfb   :  { %v2254_v40 = vadd.f32 %v5506_v7, %v2189_v37  ;;  %v2557_v41 = vpack.c.b16 %v2556_v38, %v2556_v38  ;;  %v5063_v37 = vld [vmem:[%s6602_s0 + $0x98] sm:$0xff] }
  0xfd   :  { %v2318_v42 = vmax.f32 %v2254_v40, 0.0  ;;  %v2569_v45 = vsel %vm2446_vm1, %v2379_v39, %v2557_v41  ;;  %v5135_v41 = vld [vmem:[%s6602_s0 + $0xbc] sm:$0xff] }
  0xfe   :  { %v1462_v46 = vpop.f32.mrf.mxu2  ;;  %2781 = vrot.lane.b32.xlu2 %v2569_v45, %s5262_s19  ;;  %v493_v52 = vpop.f32.mrf.mxu0 }
  0xff   :  { %v2049_v47 = vpop.f32.mrf.mxu3  ;;  %v5660_v50 = vpack.c.bf16 %v2318_v42, %v2318_v42  ;;  %v1603_v51 = vadd.f32 %v1462_v46, %v940_v43  ;;  %v942_v53 = vpop.f32.mrf.mxu1  ;;  %v5171_v42 = vld [vmem:[%s6602_s0 + $0xc0] sm:$0xff] }
 0x100   :  { %v943_v56 = vadd.f32 %v942_v53, %v493_v52 }
 0x101   :  { %v2580_v57 = vunpack.c.l.b16 %v5660_v50  ;;  %v2190_v58 = vadd.f32 %v2049_v47, %v1603_v51  ;;  %4084 = vmatmul.msk.bf16.gmra.mxu0 %vm352_vm0, %v5097_v48 }
 0x102   :  { %4260 = vmatmul.msk.bf16.gmra.mxu1 %vm352_vm0, %v5061_v49 }
 0x103   :  { %v2581_v59 = vpack.c.b16 %v2580_v57, %v2580_v57  ;;  %v2255_v60 = vadd.f32 %v5506_v7, %v2190_v58  ;;  %4508 = vmatmul.msk.bf16.gmra.mxu2 %vm352_vm0, %v5133_v54 }
 0x104   :  { %4756 = vmatmul.msk.bf16.gmra.mxu3 %vm352_vm0, %v5169_v55  ;;  %v2248_v55 = vadd.f32 %v5506_v7, %v5574_v21  ;;  %v5100_v21 = vld [vmem:[%s6602_s0 + $0xa4] sm:$0xff] }
 0x105   :  { %v2319_v61 = vmax.f32 %v2255_v60, 0.0  ;;  %v2593_v62 = vsel %vm2446_vm1, %v5624_v9, %v2581_v59  ;;  %v5098_v9 = vld [vmem:[%s6602_s0 + $0x94] sm:$0xff] }
 0x106   :  { %v1465_v63 = vpop.f32.mrf.mxu2  ;;  %2795 = vrot.lane.b32.xlu1 %v2593_v62, %s5263_s28  ;;  %v495_v4 = vpop.f32.mrf.mxu0 }
 0x107   :  { %v2052_v1 = vpop.f32.mrf.mxu3  ;;  %v5677_v2 = vpack.c.bf16 %v2319_v61, %v2319_v61  ;;  %v1604_v3 = vadd.f32 %v1465_v63, %v943_v56  ;;  %v944_v5 = vpop.f32.mrf.mxu1  ;;  %v2312_v61 = vmax.f32 %v2248_v55, 0.0 }
 0x108   :  { %v945_v6 = vadd.f32 %v944_v5, %v495_v4 }
 0x109   :  { %v5679_v8 = vadd.f32 %v2052_v1, %v1604_v3  ;;  %v2604_v10 = vunpack.c.l.b16 %v5677_v2 }
 0x10b   :  { %v2605_v11 = vpack.c.b16 %v2604_v10, %v2604_v10 }
 0x10d   :  { %v2617_v12 = vsel %vm2446_vm1, %v2381_v32, %v2605_v11 }
 0x10e   :  { %v1467_v13 = vpop.f32.mrf.mxu2  ;;  %2809 = vrot.lane.b32.xlu2 %v2617_v12, %s5264_s29  ;;  %v498_v18 = vpop.f32.mrf.mxu0 }
 0x10f   :  { %v2054_v14 = vpop.f32.mrf.mxu3  ;;  %v1605_v17 = vadd.f32 %v1467_v13, %v945_v6  ;;  %v947_v19 = vpop.f32.mrf.mxu1  ;;  %v5064_v6 = vld [vmem:[%s6602_s0 + $0xa0] sm:$0xff] }
 0x110   :  { %v948_v23 = vadd.f32 %v947_v19, %v498_v18 }
 0x111   :  { %v5696_v24 = vadd.f32 %v2054_v14, %v1605_v17  ;;  %4085 = vmatmul.msk.bf16.gmra.mxu0 %vm352_vm0, %v5098_v9  ;;  %v5172_v14 = vld [vmem:[%s6602_s0 + $0xc8] sm:$0xff] }
 0x112   :  { %4261 = vmatmul.msk.bf16.gmra.mxu1 %vm352_vm0, %v5062_v15  ;;  %v2376_v15 = vpack.c.bf16 %v2312_v61, %v2312_v61 }
 0x113   :  { %4509 = vmatmul.msk.bf16.gmra.mxu2 %vm352_vm0, %v5134_v20 }
 0x114   :  { %4757 = vmatmul.msk.bf16.gmra.mxu3 %vm352_vm0, %v5170_v22  ;;  %v2249_v22 = vadd.f32 %v5506_v7, %v5591_v35  ;;  %v5195_v35 = vld [vmem:[%s6604_s2 + $0x28] sm:$0xff] }
 0x115   :  { %3306 = vmatpush.bf16.msrb.mxu0 %v5195_v35  ;;  %v5066_v35 = vld [vmem:[%s6602_s0 + $0xb4] sm:$0xff] }
 0x116   :  { %v1470_v25 = vpop.f32.mrf.mxu2  ;;  %v500_v29 = vpop.f32.mrf.mxu0 }
 0x117   :  { %v2057_v26 = vpop.f32.mrf.mxu3  ;;  %v1606_v27 = vadd.f32 %v1470_v25, %v948_v23  ;;  %v949_v30 = vpop.f32.mrf.mxu1 }
 0x118   :  { %v950_v32 = vadd.f32 %v949_v30, %v500_v29  ;;  %v5219_v30 = vld [vmem:[%s6604_s2 + $0xe8] sm:$0xff] }
 0x119   :  { %v2193_v31 = vadd.f32 %v2057_v26, %v1606_v27  ;;  %3405 = vmatpush.bf16.msrb.mxu3 %v5219_v30 }
 0x11b   :  { %v2258_v58 = vadd.f32 %v5506_v7, %v2193_v31  ;;  %v5203_v31 = vld [vmem:[%s6604_s2 + $0x68] sm:$0xff] }
 0x11c   :  { %3339 = vmatpush.bf16.msrb.mxu1 %v5203_v31 }
 0x11d   :  { %v2322_v3 = vmax.f32 %v2258_v58, 0.0  ;;  %v5065_v58 = vld [vmem:[%s6602_s0 + $0xa8] sm:$0xff] }
 0x11e   :  { %v1472_v33 = vpop.f32.mrf.mxu2  ;;  %v503_v39 = vpop.f32.mrf.mxu0 }
 0x11f   :  { %v2059_v34 = vpop.f32.mrf.mxu3  ;;  %v1607_v38 = vadd.f32 %v1472_v33, %v950_v32  ;;  %v952_v40 = vpop.f32.mrf.mxu1  ;;  %v5748_v23 = vpack.c.bf16 %v2322_v3, %v2322_v3 }
 0x120   :  { %v953_v46 = vadd.f32 %v952_v40, %v503_v39  ;;  %v2754_v17 = vpop.permute.xlu2 %2753 }
 0x121   :  { %v2194_v43 = vadd.f32 %v2059_v34, %v1607_v38  ;;  %4086 = vmatmul.msk.bf16.gmra.mxu0 %vm352_vm0, %v5099_v36  ;;  %v2313_v38 = vmax.f32 %v2249_v22, 0.0 }
 0x122   :  { %4262 = vmatmul.msk.bf16.gmra.mxu1 %vm352_vm0, %v5063_v37 }
 0x123   :  { %v2259_v45 = vadd.f32 %v5506_v7, %v2194_v43  ;;  %4510 = vmatmul.msk.bf16.gmra.mxu2 %vm352_vm0, %v5135_v41 }
 0x124   :  { %4758 = vmatmul.msk.bf16.gmra.mxu3 %vm352_vm0, %v5171_v42 }
 0x125   :  { %v2323_v47 = vmax.f32 %v2259_v45, 0.0 }
 0x126   :  { %v1475_v48 = vpop.f32.mrf.mxu2  ;;  %v505_v53 = vpop.f32.mrf.mxu0 }
 0x127   :  { %v2062_v49 = vpop.f32.mrf.mxu3  ;;  %v5719_v51 = vpack.c.bf16 %v2323_v47, %v2323_v47  ;;  %v1608_v52 = vadd.f32 %v1475_v48, %v953_v46  ;;  %v954_v54 = vpop.f32.mrf.mxu1  ;;  %v2377_v46 = vpack.c.bf16 %v2313_v38, %v2313_v38 }
 0x128   :  { %v955_v63 = vadd.f32 %v954_v54, %v505_v53 }
 0x129   :  { %v2195_v56 = vadd.f32 %v2062_v49, %v1608_v52  ;;  %v2463_v57 = vunpack.c.l.b16 %v5719_v51 }
 0x12b   :  { %v2260_v59 = vadd.f32 %v5506_v7, %v2195_v56  ;;  %v2464_v60 = vpack.c.b16 %v2463_v57, %v2463_v57  ;;  %v5101_v57 = vld [vmem:[%s6602_s0 + $0xac] sm:$0xff] }
 0x12d   :  { %v2324_v62 = vmax.f32 %v2260_v59, 0.0  ;;  %v2476_v1 = vsel %vm2446_vm1, %v5572_v16, %v2464_v60  ;;  %v5136_v16 = vld [vmem:[%s6602_s0 + $0xc4] sm:$0xff] }
 0x12e   :  { %v1477_v4 = vpop.f32.mrf.mxu2  ;;  %2741 = vrot.lane.b32.xlu2 %v2476_v1, %s5262_s19  ;;  %v508_v12 = vpop.f32.mrf.mxu0 }
 0x12f   :  { %v2064_v5 = vpop.f32.mrf.mxu3  ;;  %v5735_v10 = vpack.c.bf16 %v2324_v62, %v2324_v62  ;;  %v1609_v11 = vadd.f32 %v1477_v4, %v955_v63  ;;  %v957_v13 = vpop.f32.mrf.mxu1  ;;  %v5137_v62 = vld [vmem:[%s6602_s0 + $0xcc] sm:$0xff] }
 0x130   :  { %v2740_v9 = vpop.permute.xlu1 %2739  ;;  %v958_v29 = vadd.f32 %v957_v13, %v508_v12  ;;  %v5173_v63 = vld [vmem:[%s6602_s0 + $0xd0] sm:$0xff] }
 0x131   :  { %v2487_v18 = vunpack.c.l.b16 %v5735_v10  ;;  %v2196_v19 = vadd.f32 %v2064_v5, %v1609_v11  ;;  %v2905_v20 = vsel %vm2903_vm2, %v5544_v44, %v2740_v9  ;;  %4087 = vmatmul.msk.bf16.gmra.mxu0 %vm352_vm0, %v5100_v21  ;;  %v5211_v44 = vld [vmem:[%s6604_s2 + $0xa8] sm:$0xff] }
 0x132   :  { %4263 = vmatmul.msk.bf16.gmra.mxu1 %vm352_vm0, %v5064_v6  ;;  %v5753_v25 = vsel %vm352_vm0, %v2905_v20, %v2754_v17  ;;  %3372 = vmatpush.bf16.msrb.mxu2 %v5211_v44  ;;  %v5102_v44 = vld [vmem:[%s6602_s0 + $0xb8] sm:$0xff] }
 0x133   :  { %v2488_v26 = vpack.c.b16 %v2487_v18, %v2487_v18  ;;  %v2261_v27 = vadd.f32 %v5506_v7, %v2196_v19  ;;  %4511 = vmatmul.msk.bf16.gmra.mxu2 %vm352_vm0, %v5136_v16 }
 0x134   :  { %4759 = vmatmul.msk.bf16.gmra.mxu3 %vm352_vm0, %v5172_v14 }
 0x135   :  { %v2325_v32 = vmax.f32 %v2261_v27, 0.0  ;;  %v2500_v33 = vsel %vm2446_vm1, %v2376_v15, %v2488_v26  ;;  %v5773_v34 = vsel %vm2446_vm1, %v5748_v23, %v2488_v26 }
 0x136   :  { %v1480_v36 = vpop.f32.mrf.mxu2  ;;  %2755 = vrot.lane.b32.xlu2 %v2500_v33, %s5263_s28  ;;  %v510_v41 = vpop.f32.mrf.mxu0 }
 0x137   :  { %v2067_v37 = vpop.f32.mrf.mxu3  ;;  %v2389_v39 = vpack.c.bf16 %v2325_v32, %v2325_v32  ;;  %v1610_v40 = vadd.f32 %v1480_v36, %v958_v29  ;;  %v959_v42 = vpop.f32.mrf.mxu1  ;;  %v5138_v36 = vld [vmem:[%s6602_s0 + $0xd8] sm:$0xff] }
 0x138   :  { %v960_v52 = vadd.f32 %v959_v42, %v510_v41 }
 0x139   :  { %v2197_v43 = vadd.f32 %v2067_v37, %v1610_v40  ;;  %v2511_v45 = vunpack.c.l.b16 %v2389_v39  ;;  %v5174_v37 = vld [vmem:[%s6602_s0 + $0xdc] sm:$0xff] }
 0x13b   :  { %v2262_v47 = vadd.f32 %v5506_v7, %v2197_v43  ;;  %v2512_v48 = vpack.c.b16 %v2511_v45, %v2511_v45 }
 0x13d   :  { %v2326_v49 = vmax.f32 %v2262_v47, 0.0  ;;  %v2647_v53 = vsel %vm2446_vm1, %v5719_v51, %v2512_v48  ;;  %v2524_v54 = vsel %vm2446_vm1, %v2377_v46, %v2512_v48 }
 0x13e   :  { %v1482_v55 = vpop.f32.mrf.mxu2  ;;  %2822 = vrot.lane.b32.xlu0 %v2647_v53, %s5262_s19  ;;  %2769 = vrot.lane.b32.xlu1 %v2524_v54, %s5264_s29  ;;  %v513_v51 = vpop.f32.mrf.mxu0 }
 0x13f   :  { %v2069_v56 = vpop.f32.mrf.mxu3  ;;  %v5788_v59 = vpack.c.bf16 %v2326_v49, %v2326_v49  ;;  %v1611_v60 = vadd.f32 %v1482_v55, %v960_v52  ;;  %v962_v61 = vpop.f32.mrf.mxu1 }
 0x140   :  { %v963_v5 = vadd.f32 %v962_v61, %v513_v51  ;;  %v5103_v61 = vld [vmem:[%s6602_s0 + $0xc0] sm:$0xff] }
 0x141   :  { %v2198_v1 = vadd.f32 %v2069_v56, %v1611_v60  ;;  %v2441_v3 = vunpack.c.l.b16 %v5788_v59  ;;  %4088 = vmatmul.msk.bf16.gmra.mxu0 %vm352_vm0, %v5101_v57 }
 0x142   :  { %4264 = vmatmul.msk.bf16.gmra.mxu1 %vm352_vm0, %v5065_v58 }
 0x143   :  { %v2263_v4 = vadd.f32 %v5506_v7, %v2198_v1  ;;  %4512 = vmatmul.msk.bf16.gmra.mxu2 %vm352_vm0, %v5137_v62  ;;  %v2442_v21 = vpack.c.b16 %v2441_v3, %v2441_v3  ;;  %v5067_v62 = vld [vmem:[%s6602_s0 + $0xbc] sm:$0xff] }
 0x144   :  { %4760 = vmatmul.msk.bf16.gmra.mxu3 %vm352_vm0, %v5173_v63 }
 0x145   :  { %v2327_v6 = vmax.f32 %v2263_v4, 0.0  ;;  %v5804_v11 = vsel %vm2446_vm1, %v5735_v10, %v2442_v21  ;;  %v5139_v4 = vld [vmem:[%s6602_s0 + $0xe0] sm:$0xff] }
 0x146   :  { %v1485_v12 = vpop.f32.mrf.mxu2  ;;  %2837 = vrot.lane.b32.xlu0 %v5804_v11, %s5263_s28  ;;  %v515_v9 = vpop.f32.mrf.mxu0 }
 0x147   :  { %v2072_v13 = vpop.f32.mrf.mxu3  ;;  %v5808_v16 = vpack.c.bf16 %v2327_v6, %v2327_v6  ;;  %v1612_v14 = vadd.f32 %v1485_v12, %v963_v5  ;;  %v964_v15 = vpop.f32.mrf.mxu1  ;;  %v5175_v5 = vld [vmem:[%s6602_s0 + $0xe4] sm:$0xff] }
 0x148   :  { %v965_v26 = vadd.f32 %v964_v15, %v515_v9 }
 0x149   :  { %v2199_v17 = vadd.f32 %v2072_v13, %v1612_v14  ;;  %v2466_v18 = vunpack.c.l.b16 %v5808_v16 }
 0x14b   :  { %v2264_v19 = vadd.f32 %v5506_v7, %v2199_v17  ;;  %v2467_v20 = vpack.c.b16 %v2466_v18, %v2466_v18 }
 0x14d   :  { %v2328_v22 = vmax.f32 %v2264_v19, 0.0  ;;  %v2479_v10 = vsel %vm2446_vm1, %v2389_v39, %v2467_v20 }
 0x14e   :  { %v1487_v27 = vpop.f32.mrf.mxu2  ;;  %2743 = vrot.lane.b32.xlu2 %v2479_v10, %s5262_s19  ;;  %2851 = vrot.lane.b32.xlu1 %v2479_v10, %s5264_s29  ;;  %v518_v32 = vpop.f32.mrf.mxu0 }
 0x14f   :  { %v2074_v29 = vpop.f32.mrf.mxu3  ;;  %v5821_v30 = vpack.c.bf16 %v2328_v22, %v2328_v22  ;;  %v1613_v31 = vadd.f32 %v1487_v27, %v965_v26  ;;  %v967_v33 = vpop.f32.mrf.mxu1  ;;  %v2256_v26 = vadd.f32 %v5506_v7, %v5679_v8  ;;  %v5104_v8 = vld [vmem:[%s6602_s0 + $0xc8] sm:$0xff] }
 0x150   :  { %v968_v38 = vadd.f32 %v967_v33, %v518_v32 }
 0x151   :  { %v2490_v39 = vunpack.c.l.b16 %v5821_v30  ;;  %v2200_v40 = vadd.f32 %v2074_v29, %v1613_v31  ;;  %4089 = vmatmul.msk.bf16.gmra.mxu0 %vm352_vm0, %v5102_v44  ;;  %v2320_v32 = vmax.f32 %v2256_v26, 0.0  ;;  %v5105_v26 = vld [vmem:[%s6602_s0 + $0xd0] sm:$0xff] }
 0x152   :  { %4265 = vmatmul.msk.bf16.gmra.mxu1 %vm352_vm0, %v5066_v35 }
 0x153   :  { %v2491_v41 = vpack.c.b16 %v2490_v39, %v2490_v39  ;;  %v2265_v42 = vadd.f32 %v5506_v7, %v2200_v40  ;;  %4513 = vmatmul.msk.bf16.gmra.mxu2 %vm352_vm0, %v5138_v36 }
 0x154   :  { %4761 = vmatmul.msk.bf16.gmra.mxu3 %vm352_vm0, %v5174_v37 }
 0x155   :  { %v2329_v43 = vmax.f32 %v2265_v42, 0.0  ;;  %v2503_v45 = vsel %vm2446_vm1, %v5788_v59, %v2491_v41 }
 0x156   :  { %v1490_v46 = vpop.f32.mrf.mxu2  ;;  %2757 = vrot.lane.b32.xlu2 %v2503_v45, %s5263_s28  ;;  %v520_v52 = vpop.f32.mrf.mxu0 }
 0x157   :  { %v2077_v47 = vpop.f32.mrf.mxu3  ;;  %v5838_v48 = vpack.c.bf16 %v2329_v43, %v2329_v43  ;;  %v1614_v49 = vadd.f32 %v1490_v46, %v968_v38  ;;  %v969_v53 = vpop.f32.mrf.mxu1  ;;  %v5068_v38 = vld [vmem:[%s6602_s0 + $0xc4] sm:$0xff]  ;;  %v5176_v43 = vld [vmem:[%s6602_s0 + $0xec] sm:$0xff] }
 0x158   :  { %v970_v57 = vadd.f32 %v969_v53, %v520_v52 }
 0x159   :  { %v2201_v54 = vadd.f32 %v2077_v47, %v1614_v49  ;;  %v2514_v55 = vunpack.c.l.b16 %v5838_v48  ;;  %v2384_v47 = vpack.c.bf16 %v2320_v32, %v2320_v32 }
 0x15b   :  { %v2515_v56 = vpack.c.b16 %v2514_v55, %v2514_v55  ;;  %v2266_v10 = vadd.f32 %v5506_v7, %v2201_v54  ;;  %v5210_v55 = vld [vmem:[%s6604_s2 + $0xa0] sm:$0xff] }
 0x15c   :  { %3373 = vmatpush.bf16.msrb.mxu2 %v5210_v55 }
 0x15d   :  { %v2527_v58 = vsel %vm2446_vm1, %v5808_v16, %v2515_v56  ;;  %v2330_v33 = vmax.f32 %v2266_v10, 0.0  ;;  %v5194_v56 = vld [vmem:[%s6604_s2 + $0x20] sm:$0xff] }
 0x15e   :  { %v1492_v60 = vpop.f32.mrf.mxu2  ;;  %2771 = vrot.lane.b32.xlu1 %v2527_v58, %s5264_s29  ;;  %v523_v1 = vpop.f32.mrf.mxu0  ;;  %v5202_v58 = vld [vmem:[%s6604_s2 + $0x60] sm:$0xff]  ;;  %3307 = vmatpush.bf16.msrb.mxu0 %v5194_v56 }
 0x15f   :  { %v2079_v51 = vpop.f32.mrf.mxu3  ;;  %v1615_v63 = vadd.f32 %v1492_v60, %v970_v57  ;;  %v972_v3 = vpop.f32.mrf.mxu1  ;;  %v5886_v49 = vpack.c.bf16 %v2330_v33, %v2330_v33  ;;  %v5218_v57 = vld [vmem:[%s6604_s2 + $0xe0] sm:$0xff]  ;;  %3340 = vmatpush.bf16.msrb.mxu1 %v5202_v58 }
 0x160   :  { %v973_v12 = vadd.f32 %v972_v3, %v523_v1  ;;  %3406 = vmatpush.bf16.msrb.mxu3 %v5218_v57 }
 0x161   :  { %v2202_v21 = vadd.f32 %v2079_v51, %v1615_v63  ;;  %4090 = vmatmul.msk.bf16.gmra.mxu0 %vm352_vm0, %v5103_v61 }
 0x162   :  { %4266 = vmatmul.msk.bf16.gmra.mxu1 %vm352_vm0, %v5067_v62 }
 0x163   :  { %v2267_v6 = vadd.f32 %v5506_v7, %v2202_v21  ;;  %4514 = vmatmul.msk.bf16.gmra.mxu2 %vm352_vm0, %v5139_v4 }
 0x164   :  { %4762 = vmatmul.msk.bf16.gmra.mxu3 %vm352_vm0, %v5175_v5 }
 0x165   :  { %v2331_v13 = vmax.f32 %v2267_v6, 0.0 }
 0x166   :  { %v1495_v14 = vpop.f32.mrf.mxu2  ;;  %v525_v18 = vpop.f32.mrf.mxu0 }
 0x167   :  { %v2082_v9 = vpop.f32.mrf.mxu3  ;;  %v5861_v15 = vpack.c.bf16 %v2331_v13, %v2331_v13  ;;  %v1616_v17 = vadd.f32 %v1495_v14, %v973_v12  ;;  %v974_v19 = vpop.f32.mrf.mxu1  ;;  %v2257_v12 = vadd.f32 %v5506_v7, %v5696_v24  ;;  %v5069_v24 = vld [vmem:[%s6602_s0 + $0xcc] sm:$0xff] }
 0x168   :  { %v975_v35 = vadd.f32 %v974_v19, %v525_v18 }
 0x169   :  { %v2203_v20 = vadd.f32 %v2082_v9, %v1616_v17  ;;  %v2559_v22 = vunpack.c.l.b16 %v5861_v15  ;;  %v2321_v19 = vmax.f32 %v2257_v12, 0.0 }
 0x16b   :  { %v2268_v27 = vadd.f32 %v5506_v7, %v2203_v20  ;;  %v2560_v29 = vpack.c.b16 %v2559_v22, %v2559_v22  ;;  %v2385_v33 = vpack.c.bf16 %v2321_v19, %v2321_v19 }
 0x16d   :  { %v2332_v44 = vmax.f32 %v2268_v27, 0.0  ;;  %v2572_v31 = vsel %vm2446_vm1, %v5677_v2, %v2560_v29  ;;  %v5140_v2 = vld [vmem:[%s6602_s0 + $0xe8] sm:$0xff] }
 0x16e   :  { %v1497_v36 = vpop.f32.mrf.mxu2  ;;  %2783 = vrot.lane.b32.xlu2 %v2572_v31, %s5262_s19  ;;  %v528_v41 = vpop.f32.mrf.mxu0 }
 0x16f   :  { %v2084_v37 = vpop.f32.mrf.mxu3  ;;  %v5877_v39 = vpack.c.bf16 %v2332_v44, %v2332_v44  ;;  %v1617_v40 = vadd.f32 %v1497_v36, %v975_v35  ;;  %v977_v42 = vpop.f32.mrf.mxu1  ;;  %v5177_v35 = vld [vmem:[%s6602_s0 + $0xf4] sm:$0xff] }
 0x170   :  { %v978_v54 = vadd.f32 %v977_v42, %v528_v41 }
 0x171   :  { %v2583_v45 = vunpack.c.l.b16 %v5877_v39  ;;  %v2204_v46 = vadd.f32 %v2084_v37, %v1617_v40  ;;  %4091 = vmatmul.msk.bf16.gmra.mxu0 %vm352_vm0, %v5104_v8 }
 0x172   :  { %4267 = vmatmul.msk.bf16.gmra.mxu1 %vm352_vm0, %v5068_v38 }
 0x173   :  { %v2584_v52 = vpack.c.b16 %v2583_v45, %v2583_v45  ;;  %v2269_v53 = vadd.f32 %v5506_v7, %v2204_v46  ;;  %4515 = vmatmul.msk.bf16.gmra.mxu2 %vm352_vm0, %v5140_v2 }
 0x174   :  { %4763 = vmatmul.msk.bf16.gmra.mxu3 %vm352_vm0, %v5176_v43 }
 0x175   :  { %v2333_v60 = vmax.f32 %v2269_v53, 0.0  ;;  %v2596_v51 = vsel %vm2446_vm1, %v2384_v47, %v2584_v52  ;;  %v5908_v61 = vsel %vm2446_vm1, %v5886_v49, %v2584_v52 }
 0x176   :  { %v1500_v62 = vpop.f32.mrf.mxu2  ;;  %2797 = vrot.lane.b32.xlu1 %v2596_v51, %s5263_s28  ;;  %v530_v4 = vpop.f32.mrf.mxu0  ;;  %v5106_v51 = vld [vmem:[%s6602_s0 + $0xdc] sm:$0xff] }
 0x177   :  { %v2087_v63 = vpop.f32.mrf.mxu3  ;;  %v2397_v1 = vpack.c.bf16 %v2333_v60, %v2333_v60  ;;  %v1618_v3 = vadd.f32 %v1500_v62, %v978_v54  ;;  %v979_v5 = vpop.f32.mrf.mxu1  ;;  %v5070_v62 = vld [vmem:[%s6602_s0 + $0xd8] sm:$0xff] }
 0x178   :  { %v980_v17 = vadd.f32 %v979_v5, %v530_v4 }
 0x179   :  { %v2205_v21 = vadd.f32 %v2087_v63, %v1618_v3  ;;  %v2607_v6 = vunpack.c.l.b16 %v2397_v1 }
 0x17b   :  { %v2270_v13 = vadd.f32 %v5506_v7, %v2205_v21  ;;  %v2608_v14 = vpack.c.b16 %v2607_v6, %v2607_v6  ;;  %v5178_v21 = vld [vmem:[%s6602_s0 + $0x100] sm:$0xff] }
 0x17d   :  { %v2334_v9 = vmax.f32 %v2270_v13, 0.0  ;;  %v2701_v18 = vsel %vm2446_vm1, %v5861_v15, %v2608_v14  ;;  %v5141_v15 = vld [vmem:[%s6602_s0 + $0xf0] sm:$0xff]  ;;  %v2620_v41 = vsel %vm2446_vm1, %v2385_v33, %v2608_v14 }
 0x17e   :  { %v1502_v20 = vpop.f32.mrf.mxu2  ;;  %2864 = vrot.lane.b32.xlu2 %v2701_v18, %s5262_s19  ;;  %v533_v29 = vpop.f32.mrf.mxu0 }
 0x17f   :  { %v2089_v22 = vpop.f32.mrf.mxu3  ;;  %v5923_v10 = vpack.c.bf16 %v2334_v9, %v2334_v9  ;;  %v1619_v27 = vadd.f32 %v1502_v20, %v980_v17  ;;  %v982_v44 = vpop.f32.mrf.mxu1 }
 0x180   :  { %v983_v37 = vadd.f32 %v982_v44, %v533_v29 }
 0x181   :  { %v2206_v31 = vadd.f32 %v2089_v22, %v1619_v27  ;;  %v2538_v32 = vunpack.c.l.b16 %v5923_v10  ;;  %4092 = vmatmul.msk.bf16.gmra.mxu0 %vm352_vm0, %v5105_v26 }
 0x182   :  { %4268 = vmatmul.msk.bf16.gmra.mxu1 %vm352_vm0, %v5069_v24 }
 0x183   :  { %v2271_v36 = vadd.f32 %v5506_v7, %v2206_v31  ;;  %4516 = vmatmul.msk.bf16.gmra.mxu2 %vm352_vm0, %v5141_v15  ;;  %v2539_v8 = vpack.c.b16 %v2538_v32, %v2538_v32 }
 0x184   :  { %4764 = vmatmul.msk.bf16.gmra.mxu3 %vm352_vm0, %v5177_v35 }
 0x185   :  { %v2335_v38 = vmax.f32 %v2271_v36, 0.0  ;;  %v5939_v40 = vsel %vm2446_vm1, %v5877_v39, %v2539_v8  ;;  %v5107_v36 = vld [vmem:[%s6602_s0 + $0xe4] sm:$0xff] }
 0x186   :  { %v1505_v42 = vpop.f32.mrf.mxu2  ;;  %2879 = vrot.lane.b32.xlu0 %v5939_v40, %s5263_s28  ;;  %2811 = vrot.lane.b32.xlu2 %v2620_v41, %s5264_s29  ;;  %v535_v46 = vpop.f32.mrf.mxu0 }
 0x187   :  { %v2092_v2 = vpop.f32.mrf.mxu3  ;;  %v5945_v43 = vpack.c.bf16 %v2335_v38, %v2335_v38  ;;  %v1620_v45 = vadd.f32 %v1505_v42, %v983_v37  ;;  %v984_v47 = vpop.f32.mrf.mxu1  ;;  %v5071_v37 = vld [vmem:[%s6602_s0 + $0xe0] sm:$0xff] }
 0x188   :  { %v985_v56 = vadd.f32 %v984_v47, %v535_v46  ;;  %v5143_v42 = vld [vmem:[%s6602_s0 + $0x104] sm:$0xff] }
 0x189   :  { %v2207_v52 = vadd.f32 %v2092_v2, %v1620_v45  ;;  %v2562_v53 = vunpack.c.l.b16 %v5945_v43  ;;  %v5179_v2 = vld [vmem:[%s6602_s0 + $0x108] sm:$0xff] }
 0x18b   :  { %v2272_v39 = vadd.f32 %v5506_v7, %v2207_v52  ;;  %v2563_v54 = vpack.c.b16 %v2562_v53, %v2562_v53 }
 0x18d   :  { %v2336_v55 = vmax.f32 %v2272_v39, 0.0  ;;  %v2575_v57 = vsel %vm2446_vm1, %v2397_v1, %v2563_v54  ;;  %v5142_v1 = vld [vmem:[%s6602_s0 + $0xfc] sm:$0xff] }
 0x18e   :  { %v1507_v58 = vpop.f32.mrf.mxu2  ;;  %2893 = vrot.lane.b32.xlu0 %v2575_v57, %s5264_s29  ;;  %2785 = vrot.lane.b32.xlu2 %v2575_v57, %s5262_s19  ;;  %v538_v4 = vpop.f32.mrf.mxu0 }
 0x18f   :  { %v2094_v60 = vpop.f32.mrf.mxu3  ;;  %v5958_v63 = vpack.c.bf16 %v2336_v55, %v2336_v55  ;;  %v1621_v3 = vadd.f32 %v1507_v58, %v985_v56  ;;  %v987_v5 = vpop.f32.mrf.mxu1 }
 0x190   :  { %v988_v6 = vadd.f32 %v987_v5, %v538_v4 }
 0x191   :  { %v2586_v12 = vunpack.c.l.b16 %v5958_v63  ;;  %v2208_v13 = vadd.f32 %v2094_v60, %v1621_v3  ;;  %4093 = vmatmul.msk.bf16.gmra.mxu0 %vm352_vm0, %v5106_v51 }
 0x192   :  { %4269 = vmatmul.msk.bf16.gmra.mxu1 %vm352_vm0, %v5070_v62 }
 0x193   :  { %v2587_v14 = vpack.c.b16 %v2586_v12, %v2586_v12  ;;  %v2273_v9 = vadd.f32 %v5506_v7, %v2208_v13  ;;  %4517 = vmatmul.msk.bf16.gmra.mxu2 %vm352_vm0, %v5142_v1  ;;  %v5108_v13 = vld [vmem:[%s6602_s0 + $0xec] sm:$0xff] }
 0x194   :  { %4765 = vmatmul.msk.bf16.gmra.mxu3 %vm352_vm0, %v5178_v21 }
 0x195   :  { %v2337_v17 = vmax.f32 %v2273_v9, 0.0  ;;  %v2599_v18 = vsel %vm2446_vm1, %v5923_v10, %v2587_v14  ;;  %v5072_v14 = vld [vmem:[%s6602_s0 + $0xe8] sm:$0xff] }
 0x196   :  { %v1510_v19 = vpop.f32.mrf.mxu2  ;;  %2799 = vrot.lane.b32.xlu1 %v2599_v18, %s5263_s28  ;;  %v540_v24 = vpop.f32.mrf.mxu0 }
 0x197   :  { %v2097_v20 = vpop.f32.mrf.mxu3  ;;  %v5975_v22 = vpack.c.bf16 %v2337_v17, %v2337_v17  ;;  %v1622_v26 = vadd.f32 %v1510_v19, %v988_v6  ;;  %v989_v27 = vpop.f32.mrf.mxu1 }
 0x198   :  { %v990_v35 = vadd.f32 %v989_v27, %v540_v24 }
 0x199   :  { %v2209_v29 = vadd.f32 %v2097_v20, %v1622_v26  ;;  %v2610_v44 = vunpack.c.l.b16 %v5975_v22  ;;  %v5180_v20 = vld [vmem:[%s6602_s0 + $0x110] sm:$0xff] }
 0x19b   :  { %v2611_v15 = vpack.c.b16 %v2610_v44, %v2610_v44  ;;  %v2274_v51 = vadd.f32 %v5506_v7, %v2209_v29 }
 0x19d   :  { %v2623_v31 = vsel %vm2446_vm1, %v5945_v43, %v2611_v15  ;;  %v2338_v21 = vmax.f32 %v2274_v51, 0.0  ;;  %v5109_v51 = vld [vmem:[%s6602_s0 + $0xf4] sm:$0xff] }
 0x19e   :  { %v1512_v32 = vpop.f32.mrf.mxu2  ;;  %2813 = vrot.lane.b32.xlu2 %v2623_v31, %s5264_s29  ;;  %v543_v38 = vpop.f32.mrf.mxu0  ;;  %v5193_v31 = vld [vmem:[%s6604_s2 + $0x18] sm:$0xff] }
 0x19f   :  { %v2099_v33 = vpop.f32.mrf.mxu3  ;;  %v1623_v8 = vadd.f32 %v1512_v32, %v990_v35  ;;  %v992_v41 = vpop.f32.mrf.mxu1  ;;  %v6018_v27 = vpack.c.bf16 %v2338_v21, %v2338_v21  ;;  %v5209_v35 = vld [vmem:[%s6604_s2 + $0x98] sm:$0xff]  ;;  %3308 = vmatpush.bf16.msrb.mxu0 %v5193_v31 }
 0x1a0   :  { %v993_v47 = vadd.f32 %v992_v41, %v543_v38  ;;  %v5217_v32 = vld [vmem:[%s6604_s2 + $0xd8] sm:$0xff]  ;;  %3374 = vmatpush.bf16.msrb.mxu2 %v5209_v35 }
 0x1a1   :  { %v2210_v45 = vadd.f32 %v2099_v33, %v1623_v8  ;;  %4094 = vmatmul.msk.bf16.gmra.mxu0 %vm352_vm0, %v5107_v36  ;;  %v5201_v33 = vld [vmem:[%s6604_s2 + $0x58] sm:$0xff]  ;;  %3407 = vmatpush.bf16.msrb.mxu3 %v5217_v32 }
 0x1a2   :  { %4270 = vmatmul.msk.bf16.gmra.mxu1 %vm352_vm0, %v5071_v37 }
 0x1a3   :  { %v2275_v46 = vadd.f32 %v5506_v7, %v2210_v45  ;;  %4518 = vmatmul.msk.bf16.gmra.mxu2 %vm352_vm0, %v5143_v42  ;;  %3341 = vmatpush.bf16.msrb.mxu1 %v5201_v33 }
 0x1a4   :  { %4766 = vmatmul.msk.bf16.gmra.mxu3 %vm352_vm0, %v5179_v2 }
 0x1a5   :  { %v2339_v52 = vmax.f32 %v2275_v46, 0.0 }
 0x1a6   :  { %v1515_v53 = vpop.f32.mrf.mxu2  ;;  %v545_v56 = vpop.f32.mrf.mxu0 }
 0x1a7   :  { %v2102_v39 = vpop.f32.mrf.mxu3  ;;  %v2403_v54 = vpack.c.bf16 %v2339_v52, %v2339_v52  ;;  %v1624_v55 = vadd.f32 %v1515_v53, %v993_v47  ;;  %v994_v57 = vpop.f32.mrf.mxu1 }
 0x1a8   :  { %v995_v5 = vadd.f32 %v994_v57, %v545_v56 }
 0x1a9   :  { %v2211_v58 = vadd.f32 %v2102_v39, %v1624_v55  ;;  %v2641_v60 = vunpack.c.l.b16 %v2403_v54 }
 0x1ab   :  { %v2276_v62 = vadd.f32 %v5506_v7, %v2211_v58  ;;  %v2642_v3 = vpack.c.b16 %v2641_v60, %v2641_v60 }
 0x1ad   :  { %v2340_v4 = vmax.f32 %v2276_v62, 0.0  ;;  %v2649_v1 = vsel %vm2446_vm1, %v5808_v16, %v2642_v3  ;;  %v5144_v16 = vld [vmem:[%s6602_s0 + $0x10c] sm:$0xff] }
 0x1ae   :  { %v1517_v6 = vpop.f32.mrf.mxu2  ;;  %2824 = vrot.lane.b32.xlu0 %v2649_v1, %s5262_s19  ;;  %v548_v18 = vpop.f32.mrf.mxu0  ;;  %v5073_v62 = vld [vmem:[%s6602_s0 + $0xf0] sm:$0xff]  ;;  %v5181_v1 = vld [vmem:[%s6602_s0 + $0x118] sm:$0xff] }
 0x1af   :  { %v2104_v12 = vpop.f32.mrf.mxu3  ;;  %v6009_v9 = vpack.c.bf16 %v2340_v4, %v2340_v4  ;;  %v1625_v17 = vadd.f32 %v1517_v6, %v995_v5  ;;  %v997_v19 = vpop.f32.mrf.mxu1 }
 0x1b0   :  { %v998_v15 = vadd.f32 %v997_v19, %v548_v18 }
 0x1b1   :  { %v2444_v26 = vunpack.c.l.b16 %v6009_v9  ;;  %v2212_v24 = vadd.f32 %v2104_v12, %v1625_v17  ;;  %4095 = vmatmul.msk.bf16.gmra.mxu0 %vm352_vm0, %v5108_v13 }
 0x1b2   :  { %4271 = vmatmul.msk.bf16.gmra.mxu1 %vm352_vm0, %v5072_v14 }
 0x1b3   :  { %v2445_v29 = vpack.c.b16 %v2444_v26, %v2444_v26  ;;  %v2277_v44 = vadd.f32 %v5506_v7, %v2212_v24  ;;  %4519 = vmatmul.msk.bf16.gmra.mxu2 %vm352_vm0, %v5144_v16 }
 0x1b4   :  { %4767 = vmatmul.msk.bf16.gmra.mxu3 %vm352_vm0, %v5180_v20 }
 0x1b5   :  { %v2341_v36 = vmax.f32 %v2277_v44, 0.0  ;;  %v2660_v37 = vsel %vm2446_vm1, %v5821_v30, %v2445_v29  ;;  %v6041_v8 = vsel %vm2446_vm1, %v6018_v27, %v2445_v29 }
 0x1b6   :  { %v1520_v38 = vpop.f32.mrf.mxu2  ;;  %2839 = vrot.lane.b32.xlu1 %v2660_v37, %s5263_s28  ;;  %v550_v45 = vpop.f32.mrf.mxu0 }
 0x1b7   :  { %v2107_v41 = vpop.f32.mrf.mxu3  ;;  %v2405_v42 = vpack.c.bf16 %v2341_v36, %v2341_v36  ;;  %v1626_v2 = vadd.f32 %v1520_v38, %v998_v15  ;;  %v999_v46 = vpop.f32.mrf.mxu1  ;;  %v5110_v38 = vld [vmem:[%s6602_s0 + $0x100] sm:$0xff] }
 0x1b8   :  { %v1000_v55 = vadd.f32 %v999_v46, %v550_v45 }
 0x1b9   :  { %v2213_v47 = vadd.f32 %v2107_v41, %v1626_v2  ;;  %v2469_v52 = vunpack.c.l.b16 %v2405_v42  ;;  %v5074_v41 = vld [vmem:[%s6602_s0 + $0xfc] sm:$0xff] }
 0x1bb   :  { %v2278_v30 = vadd.f32 %v5506_v7, %v2213_v47  ;;  %v2470_v53 = vpack.c.b16 %v2469_v52, %v2469_v52  ;;  %v5182_v52 = vld [vmem:[%s6602_s0 + $0x124] sm:$0xff] }
 0x1bd   :  { %v2342_v39 = vmax.f32 %v2278_v30, 0.0  ;;  %v2674_v56 = vsel %vm2446_vm1, %v5838_v48, %v2470_v53  ;;  %v2482_v57 = vsel %vm2446_vm1, %v2403_v54, %v2470_v53  ;;  %v5145_v54 = vld [vmem:[%s6602_s0 + $0x114] sm:$0xff]  ;;  %v6099_v53 = vpop.permute.xlu2 %2781 }
 0x1be   :  { %v1522_v58 = vpop.f32.mrf.mxu2  ;;  %2853 = vrot.lane.b32.xlu0 %v2674_v56, %s5264_s29  ;;  %2745 = vrot.lane.b32.xlu2 %v2482_v57, %s5262_s19  ;;  %v553_v48 = vpop.f32.mrf.mxu0 }
 0x1bf   :  { %v2109_v60 = vpop.f32.mrf.mxu3  ;;  %v6056_v3 = vpack.c.bf16 %v2342_v39, %v2342_v39  ;;  %v1627_v4 = vadd.f32 %v1522_v58, %v1000_v55  ;;  %v1002_v5 = vpop.f32.mrf.mxu1 }
 0x1c0   :  { %v1003_v13 = vadd.f32 %v1002_v5, %v553_v48 }
 0x1c1   :  { %v2214_v21 = vadd.f32 %v2109_v60, %v1627_v4  ;;  %v2493_v6 = vunpack.c.l.b16 %v6056_v3  ;;  %4096 = vmatmul.msk.bf16.gmra.mxu0 %vm352_vm0, %v5109_v51 }
 0x1c2   :  { %4272 = vmatmul.msk.bf16.gmra.mxu1 %vm352_vm0, %v5073_v62 }
 0x1c3   :  { %v2279_v12 = vadd.f32 %v5506_v7, %v2214_v21  ;;  %4520 = vmatmul.msk.bf16.gmra.mxu2 %vm352_vm0, %v5145_v54  ;;  %v2494_v14 = vpack.c.b16 %v2493_v6, %v2493_v6 }
 0x1c4   :  { %4768 = vmatmul.msk.bf16.gmra.mxu3 %vm352_vm0, %v5181_v1 }
 0x1c5   :  { %v2343_v17 = vmax.f32 %v2279_v12, 0.0  ;;  %v6072_v18 = vsel %vm2446_vm1, %v6009_v9, %v2494_v14  ;;  %v6112_v1 = vpop.permute.xlu2 %2809 }
 0x1c6   :  { %v1525_v19 = vpop.f32.mrf.mxu2  ;;  %2759 = vrot.lane.b32.xlu2 %v6072_v18, %s5263_s28  ;;  %v555_v24 = vpop.f32.mrf.mxu0 }
 0x1c7   :  { %v2112_v16 = vpop.f32.mrf.mxu3  ;;  %v6076_v20 = vpack.c.bf16 %v2343_v17, %v2343_v17  ;;  %v1628_v26 = vadd.f32 %v1525_v19, %v1003_v13  ;;  %v1004_v29 = vpop.f32.mrf.mxu1 }
 0x1c8   :  { %v1005_v33 = vadd.f32 %v1004_v29, %v555_v24 }
 0x1c9   :  { %v2215_v44 = vadd.f32 %v2112_v16, %v1628_v26  ;;  %v2517_v15 = vunpack.c.l.b16 %v6076_v20  ;;  %v5111_v16 = vld [vmem:[%s6602_s0 + $0x108] sm:$0xff] }
 0x1ca   :  { %v5075_v26 = vld [vmem:[%s6602_s0 + $0x104] sm:$0xff] }
 0x1cb   :  { %v2280_v35 = vadd.f32 %v5506_v7, %v2215_v44  ;;  %v2518_v31 = vpack.c.b16 %v2517_v15, %v2517_v15  ;;  %v5147_v15 = vld [vmem:[%s6602_s0 + $0x128] sm:$0xff] }
 0x1cd   :  { %v2344_v32 = vmax.f32 %v2280_v35, 0.0  ;;  %v6081_v9 = vsel %vm2446_vm1, %v2405_v42, %v2518_v31  ;;  %v5146_v42 = vld [vmem:[%s6602_s0 + $0x120] sm:$0xff]  ;;  %v5183_v35 = vld [vmem:[%s6602_s0 + $0x12c] sm:$0xff]  ;;  %v6130_v31 = vpop.permute.xlu2 %2741 }
 0x1ce   :  { %v1527_v36 = vpop.f32.mrf.mxu2  ;;  %2826 = vrot.lane.b32.xlu0 %v6081_v9, %s5262_s19  ;;  %v558_v46 = vpop.f32.mrf.mxu0 }
 0x1cf   :  { %v2114_v37 = vpop.f32.mrf.mxu3  ;;  %v6091_v2 = vpack.c.bf16 %v2344_v32, %v2344_v32  ;;  %v1629_v45 = vadd.f32 %v1527_v36, %v1005_v33  ;;  %v1007_v47 = vpop.f32.mrf.mxu1 }
 0x1d0   :  { %v1008_v30 = vadd.f32 %v1007_v47, %v558_v46 }
 0x1d1   :  { %v2654_v39 = vunpack.c.l.b16 %v6091_v2  ;;  %v2216_v55 = vadd.f32 %v2114_v37, %v1629_v45  ;;  %4097 = vmatmul.msk.bf16.gmra.mxu0 %vm352_vm0, %v5110_v38 }
 0x1d2   :  { %4273 = vmatmul.msk.bf16.gmra.mxu1 %vm352_vm0, %v5074_v41 }
 0x1d3   :  { %v2655_v56 = vpack.c.b16 %v2654_v39, %v2654_v39  ;;  %v2281_v57 = vadd.f32 %v5506_v7, %v2216_v55  ;;  %4521 = vmatmul.msk.bf16.gmra.mxu2 %vm352_vm0, %v5146_v42  ;;  %v5200_v39 = vld [vmem:[%s6604_s2 + $0x50] sm:$0xff] }
 0x1d4   :  { %4769 = vmatmul.msk.bf16.gmra.mxu3 %vm352_vm0, %v5182_v52  ;;  %v5208_v52 = vld [vmem:[%s6604_s2 + $0x90] sm:$0xff]  ;;  %3342 = vmatpush.bf16.msrb.mxu1 %v5200_v39 }
 0x1d5   :  { %v2345_v58 = vmax.f32 %v2281_v57, 0.0  ;;  %v2663_v60 = vsel %vm2446_vm1, %v6056_v3, %v2655_v56  ;;  %v5216_v55 = vld [vmem:[%s6604_s2 + $0xd0] sm:$0xff]  ;;  %3375 = vmatpush.bf16.msrb.mxu2 %v5208_v52 }
 0x1d6   :  { %v1530_v51 = vpop.f32.mrf.mxu2  ;;  %2841 = vrot.lane.b32.xlu1 %v2663_v60, %s5263_s28  ;;  %v560_v5 = vpop.f32.mrf.mxu0  ;;  %3408 = vmatpush.bf16.msrb.mxu3 %v5216_v55 }
 0x1d7   :  { %v2117_v62 = vpop.f32.mrf.mxu3  ;;  %v6110_v4 = vpack.c.bf16 %v2345_v58, %v2345_v58  ;;  %v1630_v48 = vadd.f32 %v1530_v51, %v1008_v30  ;;  %v1009_v54 = vpop.f32.mrf.mxu1  ;;  %v5192_v30 = vld [vmem:[%s6604_s2 + $0x10] sm:$0xff] }
 0x1d8   :  { %v1010_v13 = vadd.f32 %v1009_v54, %v560_v5  ;;  %3309 = vmatpush.bf16.msrb.mxu0 %v5192_v30  ;;  %v6152_v58 = vpop.permute.xlu2 %2755  ;;  %v5199_v5 = vld [vmem:[%s6604_s2 + $0x48] sm:$0xff] }
 0x1d9   :  { %v2217_v21 = vadd.f32 %v2117_v62, %v1630_v48  ;;  %v2668_v6 = vunpack.c.l.b16 %v6110_v4  ;;  %v5191_v48 = vld [vmem:[%s6604_s2 + $0x8] sm:$0xff]  ;;  %3343 = vmatpush.bf16.msrb.mxu1 %v5199_v5 }
 0x1da   :  { %v5207_v54 = vld [vmem:[%s6604_s2 + $0x88] sm:$0xff] }
 0x1db   :  { %v2669_v12 = vpack.c.b16 %v2668_v6, %v2668_v6  ;;  %v2282_v60 = vadd.f32 %v5506_v7, %v2217_v21  ;;  %v5215_v6 = vld [vmem:[%s6604_s2 + $0xc8] sm:$0xff]  ;;  %3376 = vmatpush.bf16.msrb.mxu2 %v5207_v54 }
 0x1dc   :  { %3310 = vmatpush.bf16.msrb.mxu0 %v5191_v48  ;;  %3409 = vmatpush.bf16.msrb.mxu3 %v5215_v6 }
 0x1dd   :  { %v2677_v14 = vsel %vm2446_vm1, %v6076_v20, %v2669_v12 }
 0x1de   :  { %v1532_v17 = vpop.f32.mrf.mxu2  ;;  %2855 = vrot.lane.b32.xlu0 %v2677_v14, %s5264_s29  ;;  %v563_v29 = vpop.f32.mrf.mxu0 }
 0x1df   :  { %v2119_v19 = vpop.f32.mrf.mxu3  ;;  %v1631_v24 = vadd.f32 %v1532_v17, %v1010_v13  ;;  %v1012_v44 = vpop.f32.mrf.mxu1 }
 0x1e0   :  { %v1013_v36 = vadd.f32 %v1012_v44, %v563_v29 }
 0x1e1   :  { %v2218_v32 = vadd.f32 %v2119_v19, %v1631_v24  ;;  %4098 = vmatmul.msk.bf16.gmra.mxu0 %vm352_vm0, %v5111_v16  ;;  %v5112_v19 = vld [vmem:[%s6602_s0 + $0x110] sm:$0xff] }
 0x1e2   :  { %4274 = vmatmul.msk.bf16.gmra.mxu1 %vm352_vm0, %v5075_v26  ;;  %v5076_v16 = vld [vmem:[%s6602_s0 + $0x10c] sm:$0xff] }
 0x1e3   :  { %v2283_v33 = vadd.f32 %v5506_v7, %v2218_v32  ;;  %4522 = vmatmul.msk.bf16.gmra.mxu2 %vm352_vm0, %v5147_v15  ;;  %v5148_v26 = vld [vmem:[%s6602_s0 + $0x130] sm:$0xff]  ;;  %v5190_v32 = vld [vmem:[%s6604_s2] sm:$0xff] }
 0x1e4   :  { %4770 = vmatmul.msk.bf16.gmra.mxu3 %vm352_vm0, %v5183_v35  ;;  %v5184_v35 = vld [vmem:[%s6602_s0 + $0x134] sm:$0xff]  ;;  %3311 = vmatpush.bf16.msrb.mxu0 %v5190_v32  ;;  %v5185_v32 = vld [vmem:[%s6602_s0 + $0x13c] sm:$0xff] }
 0x1e5   :  { %v2347_v37 = vmax.f32 %v2283_v33, 0.0  ;;  %v5206_v33 = vld [vmem:[%s6604_s2 + $0x80] sm:$0xff] }
 0x1e6   :  { %v1535_v38 = vpop.f32.mrf.mxu2  ;;  %v565_v47 = vpop.f32.mrf.mxu0  ;;  %3377 = vmatpush.bf16.msrb.mxu2 %v5206_v33 }
 0x1e7   :  { %v2122_v41 = vpop.f32.mrf.mxu3  ;;  %v6137_v45 = vpack.c.bf16 %v2347_v37, %v2347_v37  ;;  %v1632_v46 = vadd.f32 %v1535_v38, %v1013_v36  ;;  %v1014_v42 = vpop.f32.mrf.mxu1  ;;  %v5198_v36 = vld [vmem:[%s6604_s2 + $0x40] sm:$0xff] }
 0x1e8   :  { %v1015_v12 = vadd.f32 %v1014_v42, %v565_v47  ;;  %v5214_v37 = vld [vmem:[%s6604_s2 + $0xc0] sm:$0xff]  ;;  %v6197_v38 = vpop.permute.xlu0 %2822  ;;  %v6202_v47 = vpop.permute.xlu1 %2767  ;;  %3344 = vmatpush.bf16.msrb.mxu1 %v5198_v36 }
 0x1e9   :  { %v2219_v56 = vadd.f32 %v2122_v41, %v1632_v46  ;;  %v2695_v57 = vunpack.c.l.b16 %v6137_v45  ;;  %v6204_v42 = vpop.permute.xlu2 %2743  ;;  %3410 = vmatpush.bf16.msrb.mxu3 %v5214_v37 }
 0x1eb   :  { %v2284_v51 = vadd.f32 %v5506_v7, %v2219_v56  ;;  %v2696_v62 = vpack.c.b16 %v2695_v57, %v2695_v57 }
 0x1ed   :  { %v2348_v21 = vmax.f32 %v2284_v51, 0.0  ;;  %v2703_v13 = vsel %vm2446_vm1, %v5945_v43, %v2696_v62  ;;  %v2346_v43 = vmax.f32 %v2282_v60, 0.0 }
 0x1ee   :  { %v1537_v14 = vpop.f32.mrf.mxu2  ;;  %2866 = vrot.lane.b32.xlu1 %v2703_v13, %s5262_s19  ;;  %v568_v44 = vpop.f32.mrf.mxu0 }
 0x1ef   :  { %v2124_v17 = vpop.f32.mrf.mxu3  ;;  %v6180_v24 = vpack.c.bf16 %v2348_v21, %v2348_v21  ;;  %v1633_v29 = vadd.f32 %v1537_v14, %v1015_v12  ;;  %v1017_v15 = vpop.f32.mrf.mxu1  ;;  %v6206_v52 = vpack.c.bf16 %v2346_v43, %v2346_v43 }
 0x1f0   :  { %v2796_v6 = vpop.permute.xlu1 %2795  ;;  %v6220_v21 = vpop.permute.xlu0 %2837  ;;  %v1018_v43 = vadd.f32 %v1017_v15, %v568_v44 }
 0x1f1   :  { %v2541_v41 = vunpack.c.l.b16 %v6180_v24  ;;  %v2220_v46 = vadd.f32 %v2124_v17, %v1633_v29  ;;  %4099 = vmatmul.msk.bf16.gmra.mxu0 %vm352_vm0, %v5112_v19 }
 0x1f2   :  { %4275 = vmatmul.msk.bf16.gmra.mxu1 %vm352_vm0, %v5076_v16 }
 0x1f3   :  { %v2542_v30 = vpack.c.b16 %v2541_v41, %v2541_v41  ;;  %v2285_v39 = vadd.f32 %v5506_v7, %v2220_v46  ;;  %4523 = vmatmul.msk.bf16.gmra.mxu2 %vm352_vm0, %v5148_v26  ;;  %v5077_v26 = vld [vmem:[%s6602_s0 + $0x114] sm:$0xff] }
 0x1f4   :  { %4771 = vmatmul.msk.bf16.gmra.mxu3 %vm352_vm0, %v5184_v35 }
 0x1f5   :  { %v2349_v55 = vmax.f32 %v2285_v39, 0.0  ;;  %v2714_v56 = vsel %vm2446_vm1, %v5958_v63, %v2542_v30  ;;  %v6215_v57 = vsel %vm2446_vm1, %v6206_v52, %v2542_v30  ;;  %v6222_v63 = vpop.permute.xlu2 %2757 }
 0x1f6   :  { %v1540_v60 = vpop.f32.mrf.mxu2  ;;  %2881 = vrot.lane.b32.xlu0 %v2714_v56, %s5263_s28  ;;  %2773 = vrot.lane.b32.xlu1 %v6081_v9, %s5264_s29  ;;  %v570_v48 = vpop.f32.mrf.mxu0  ;;  %v5113_v9 = vld [vmem:[%s6602_s0 + $0x118] sm:$0xff] }
 0x1f7   :  { %v2127_v51 = vpop.f32.mrf.mxu3  ;;  %v2413_v62 = vpack.c.bf16 %v2349_v55, %v2349_v55  ;;  %v1019_v5 = vpop.f32.mrf.mxu1  ;;  %v1634_v37 = vadd.f32 %v1540_v60, %v1018_v43 }
 0x1f8   :  { %v1020_v13 = vadd.f32 %v1019_v5, %v570_v48  ;;  %v6244_v36 = vpop.permute.xlu1 %2769  ;;  %v2880_v44 = vpop.permute.xlu0 %2879 }
 0x1f9   :  { %v2565_v54 = vunpack.c.l.b16 %v2413_v62  ;;  %v2221_v56 = vadd.f32 %v2127_v51, %v1634_v37 }
 0x1fb   :  { %v2566_v12 = vpack.c.b16 %v2565_v54, %v2565_v54 }
 0x1fd   :  { %v2728_v14 = vsel %vm2446_vm1, %v5975_v22, %v2566_v12  ;;  %v2578_v17 = vsel %vm2446_vm1, %v6137_v45, %v2566_v12  ;;  %v5149_v45 = vld [vmem:[%s6602_s0 + $0x138] sm:$0xff]  ;;  %v6249_v46 = vpop.permute.xlu2 %2783 }
 0x1fe   :  { %v1542_v19 = vpop.f32.mrf.mxu2  ;;  %2895 = vrot.lane.b32.xlu0 %v2728_v14, %s5264_s29  ;;  %2787 = vrot.lane.b32.xlu2 %v2578_v17, %s5262_s19  ;;  %v573_v22 = vpop.f32.mrf.mxu0  ;;  %v2286_v17 = vadd.f32 %v5506_v7, %v2221_v56 }
 0x1ff   :  { %v2129_v16 = vpop.f32.mrf.mxu3  ;;  %v1635_v29 = vadd.f32 %v1542_v19, %v1020_v13  ;;  %v1022_v35 = vpop.f32.mrf.mxu1 }
 0x200   :  { %v1023_v41 = vadd.f32 %v1022_v35, %v573_v22  ;;  %v2852_v14 = vpop.permute.xlu1 %2851  ;;  %v2894_v43 = vpop.permute.xlu0 %2893  ;;  %v2350_v37 = vmax.f32 %v2286_v17, 0.0 }
 0x201   :  { %v2222_v33 = vadd.f32 %v2129_v16, %v1635_v29  ;;  %4100 = vmatmul.msk.bf16.gmra.mxu0 %vm352_vm0, %v5113_v9  ;;  %v2941_v9 = vsel %vm2903_vm2, %v5649_v28, %v6099_v53 }
 0x202   :  { %4276 = vmatmul.msk.bf16.gmra.mxu1 %vm352_vm0, %v5077_v26  ;;  %v2951_v51 = vsel %vm352_vm0, %v2941_v9, %v2796_v6 }
 0x203   :  { %v2287_v15 = vadd.f32 %v5506_v7, %v2222_v33  ;;  %4524 = vmatmul.msk.bf16.gmra.mxu2 %vm352_vm0, %v5149_v45  ;;  %v2926_v33 = vsel %vm2924_vm3, %v5753_v25, %v6202_v47 }
 0x204   :  { %4772 = vmatmul.msk.bf16.gmra.mxu3 %vm352_vm0, %v5185_v32 }
 0x205   :  { %v2351_v30 = vmax.f32 %v2287_v15, 0.0  ;;  %v2865_v26 = vpop.permute.xlu2 %2864 }
 0x206   :  { %v1545_v39 = vpop.f32.mrf.mxu2  ;;  %v575_v54 = vpop.f32.mrf.mxu0 }
 0x207   :  { %v2132_v55 = vpop.f32.mrf.mxu3  ;;  %v6251_v48 = vpack.c.bf16 %v2351_v30, %v2351_v30  ;;  %v1636_v5 = vadd.f32 %v1545_v39, %v1023_v41  ;;  %v1024_v12 = vpop.f32.mrf.mxu1  ;;  %v3012_v41 = vsel %vm2903_vm2, %v5908_v61, %v2865_v26  ;;  %v2961_v39 = vsel %vm2924_vm3, %v2951_v51, %v6112_v1 }
 0x208   :  { %v1025_v22 = vadd.f32 %v1024_v12, %v575_v54  ;;  %v3023_v47 = vsel %vm352_vm0, %v3012_v41, %v2880_v44  ;;  %v6283_v61 = vpack.c.bf16 %v2350_v37, %v2350_v37 }
 0x209   :  { %v2223_v60 = vadd.f32 %v2132_v55, %v1636_v5  ;;  %v2613_v13 = vunpack.c.l.b16 %v6251_v48  ;;  %v3033_v54 = vsel %vm2924_vm3, %v3023_v47, %v2894_v43 }
 0x20b   :  { %v2288_v19 = vadd.f32 %v5506_v7, %v2223_v60  ;;  %v2614_v16 = vpack.c.b16 %v2613_v13, %v2613_v13  ;;  %v2438_v60 = vunpack.c.l.b16 %v5748_v23 }
 0x20d   :  { %v2352_v29 = vmax.f32 %v2288_v19, 0.0  ;;  %v2626_v35 = vsel %vm2446_vm1, %v2413_v62, %v2614_v16  ;;  %v2976_v62 = vsel %vm2903_vm2, %v5773_v34, %v6197_v38  ;;  %v6281_v34 = vpop.permute.xlu1 %2771  ;;  %v2439_v43 = vpack.c.b16 %v2438_v60, %v2438_v60 }
 0x20e   :  { %v1547_v45 = vpop.f32.mrf.mxu2  ;;  %2815 = vrot.lane.b32.xlu2 %v2626_v35, %s5264_s29  ;;  %2868 = vrot.lane.b32.xlu1 %v2626_v35, %s5262_s19  ;;  %v578_v6 = vpop.f32.mrf.mxu0  ;;  %v2987_v25 = vsel %vm352_vm0, %v2976_v62, %v6220_v21  ;;  %v2535_v21 = vunpack.c.l.b16 %v5886_v49 }
 0x20f   :  { %v2134_v32 = vpop.f32.mrf.mxu3  ;;  %v6266_v28 = vpack.c.bf16 %v2352_v29, %v2352_v29  ;;  %v1637_v53 = vadd.f32 %v1547_v45, %v1025_v22  ;;  %v1027_v15 = vpop.f32.mrf.mxu1  ;;  %v2997_v5 = vsel %vm2924_vm3, %v2987_v25, %v2852_v14 }
 0x210   :  { %v1028_v30 = vadd.f32 %v1027_v15, %v578_v6  ;;  %v2536_v51 = vpack.c.b16 %v2535_v21, %v2535_v21  ;;  %v2812_v45 = vpop.permute.xlu2 %2811 }
 0x211   :  { %v2708_v55 = vunpack.c.l.b16 %v6266_v28  ;;  %v2224_v56 = vadd.f32 %v2134_v32, %v1637_v53  ;;  %3312 = vmatmul.bf16.vlgmr.msrb.gmra.mxu0 %v2926_v33  ;;  %v2452_v32 = vsel %vm2446_vm1, %v5555_v0, %v2439_v43 }
 0x212   :  { %3345 = vmatmul.bf16.vlgmr.msrb.gmra.mxu1 %v2961_v39  ;;  %v2548_v23 = vsel %vm2446_vm1, %v5660_v50, %v2536_v51  ;;  %v2907_v50 = vsel %vm2903_vm2, %v2452_v32, %v6130_v31  ;;  %v2628_v39 = vunpack.c.l.b16 %v6018_v27 }
 0x213   :  { %v2709_v38 = vpack.c.b16 %v2708_v55, %v2708_v55  ;;  %v2289_v1 = vadd.f32 %v5506_v7, %v2224_v56  ;;  %3378 = vmatmul.bf16.vlgmr.msrb.gmra.mxu2 %v2997_v5  ;;  %v2943_v35 = vsel %vm2903_vm2, %v2548_v23, %v6249_v46  ;;  %v2917_v15 = vsel %vm352_vm0, %v2907_v50, %v6152_v58 }
 0x214   :  { %3411 = vmatmul.bf16.vlgmr.msrb.gmra.mxu3 %v3033_v54  ;;  %v2929_v0 = vsel %vm2924_vm3, %v2917_v15, %v6244_v36  ;;  %v2629_v54 = vpack.c.b16 %v2628_v39, %v2628_v39 }
 0x215   :  { %v2353_v44 = vmax.f32 %v2289_v1, 0.0  ;;  %v2717_v12 = vsel %vm2446_vm1, %v6283_v61, %v2709_v38  ;;  %v2798_v29 = vpop.permute.xlu1 %2797 }
 0x216   :  { %v1550_v13 = vpop.f32.mrf.mxu2  ;;  %2883 = vrot.lane.b32.xlu0 %v2717_v12, %s5263_s28  ;;  %2747 = vrot.lane.b32.xlu2 %v6076_v20, %s5262_s19  ;;  %v580_v16 = vpop.f32.mrf.mxu0  ;;  %v2953_v33 = vsel %vm352_vm0, %v2943_v35, %v2798_v29 }
 0x217   :  { %v2137_v14 = vpop.f32.mrf.mxu3  ;;  %v2417_v17 = vpack.c.bf16 %v2353_v44, %v2353_v44  ;;  %v1638_v19 = vadd.f32 %v1550_v13, %v1028_v30  ;;  %v1029_v9 = vpop.f32.mrf.mxu1  ;;  %v2964_v62 = vsel %vm2924_vm3, %v2953_v33, %v2812_v45 }
 0x218   :  { %v2786_v56 = vpop.permute.xlu2 %2785  ;;  %v1030_v5 = vadd.f32 %v1029_v9, %v580_v16 }
 0x219   :  { %v2225_v26 = vadd.f32 %v2137_v14, %v1638_v19  ;;  %v2722_v49 = vunpack.c.l.b16 %v2417_v17  ;;  %v2945_v27 = vsel %vm2903_vm2, %v5939_v40, %v2786_v56  ;;  %v2636_v19 = vsel %vm2446_vm1, %v5788_v59, %v2629_v54 }
 0x21b   :  { %v2723_v22 = vpack.c.b16 %v2722_v49, %v2722_v49  ;;  %v2290_v38 = vadd.f32 %v5506_v7, %v2225_v26 }
 0x21d   :  { %v2731_v20 = vsel %vm2446_vm1, %v6251_v48, %v2723_v22  ;;  %v2800_v30 = vpop.permute.xlu1 %2799  ;;  %v2354_v14 = vmax.f32 %v2290_v38, 0.0 }
 0x21e   :  { %v1552_v37 = vpop.f32.mrf.mxu2  ;;  %2897 = vrot.lane.b32.xlu0 %v2731_v20, %s5264_s29  ;;  %2761 = vrot.lane.b32.xlu2 %v6091_v2, %s5263_s28  ;;  %v583_v46 = vpop.f32.mrf.mxu0  ;;  %v2955_v13 = vsel %vm352_vm0, %v2945_v27, %v2800_v30 }
 0x21f   :  { %v2139_v53 = vpop.f32.mrf.mxu3  ;;  %v1032_v6 = vpop.f32.mrf.mxu1  ;;  %v1639_v1 = vadd.f32 %v1552_v37, %v1030_v5  ;;  %v2418_v20 = vpack.c.bf16 %v2354_v14, %v2354_v14 }
 0x220   :  { %v1033_v41 = vadd.f32 %v1032_v6, %v583_v46  ;;  %v2825_v58 = vpop.permute.xlu0 %2824  ;;  %v2814_v23 = vpop.permute.xlu2 %2813 }
 0x221   :  { %3317 = vmatmul.bf16.gmra.mxu0 %v2929_v0  ;;  %v2226_v51 = vadd.f32 %v2139_v53, %v1639_v1  ;;  %v2978_v40 = vsel %vm2903_vm2, %v2636_v19, %v2825_v58  ;;  %v2967_v32 = vsel %vm2924_vm3, %v2955_v13, %v2814_v23 }
 0x222   :  { %3350 = vmatmul.bf16.gmra.mxu1 %v2964_v62 }
 0x223   :  { %v2291_v33 = vadd.f32 %v5506_v7, %v2226_v51 }
 0x225   :  { %v2355_v0 = vmax.f32 %v2291_v33, 0.0 }
 0x226   :  { %v1555_v2 = vpop.f32.mrf.mxu2  ;;  %2789 = vrot.lane.b32.xlu2 %v6251_v48, %s5262_s19  ;;  %v585_v47 = vpop.f32.mrf.mxu0  ;;  %v2909_v48 = vsel %vm2903_vm2, %v5804_v11, %v6204_v42 }
 0x227   :  { %v2142_v25 = vpop.f32.mrf.mxu3  ;;  %v1640_v31 = vadd.f32 %v1555_v2, %v1033_v41  ;;  %v1034_v55 = vpop.f32.mrf.mxu1  ;;  %v2919_v11 = vsel %vm352_vm0, %v2909_v48, %v6222_v63 }
 0x228   :  { %v1035_v12 = vadd.f32 %v1034_v55, %v585_v47  ;;  %v2840_v60 = vpop.permute.xlu1 %2839 }
 0x229   :  { %v2227_v36 = vadd.f32 %v2142_v25, %v1640_v31  ;;  %v2989_v42 = vsel %vm352_vm0, %v2978_v40, %v2840_v60  ;;  %v2419_v25 = vpack.c.bf16 %v2355_v0, %v2355_v0 }
 0x22b   :  { %v2292_v21 = vadd.f32 %v5506_v7, %v2227_v36 }
 0x22d   :  { %v2356_v44 = vmax.f32 %v2292_v21, 0.0 }
 0x22e   :  { %v1557_v16 = vpop.f32.mrf.mxu2  ;;  %2817 = vrot.lane.b32.xlu2 %v2417_v17, %s5264_s29  ;;  %v588_v43 = vpop.f32.mrf.mxu0  ;;  %v2932_v17 = vsel %vm2924_vm3, %v2919_v11, %v6281_v34 }
 0x22f   :  { %v2144_v9 = vpop.f32.mrf.mxu3  ;;  %v2420_v26 = vpack.c.bf16 %v2356_v44, %v2356_v44  ;;  %v1641_v49 = vadd.f32 %v1557_v16, %v1035_v12  ;;  %v1037_v29 = vpop.f32.mrf.mxu1 }
 0x230   :  { %v2854_v22 = vpop.permute.xlu0 %2853  ;;  %v1038_v53 = vadd.f32 %v1037_v29, %v588_v43 }
 0x231   :  { %v2631_v35 = vunpack.c.l.b16 %v2420_v26  ;;  %v2228_v59 = vadd.f32 %v2144_v9, %v1641_v49  ;;  %v3000_v45 = vsel %vm2924_vm3, %v2989_v42, %v2854_v22  ;;  %3322 = vmatmul.bf16.gmra.mxu0 %v2932_v17 }
 0x232   :  { %3383 = vmatmul.bf16.gmra.mxu2 %v3000_v45  ;;  %3355 = vmatmul.bf16.gmra.mxu1 %v2967_v32 }
 0x233   :  { %v2632_v37 = vpack.c.b16 %v2631_v35, %v2631_v35  ;;  %v2293_v63 = vadd.f32 %v5506_v7, %v2228_v59 }
 0x235   :  { %v2357_v50 = vmax.f32 %v2293_v63, 0.0  ;;  %v6337_v46 = vsel %vm2446_vm1, %v2418_v20, %v2632_v37 }
 0x236   :  { %v1560_v6 = vpop.f32.mrf.mxu2  ;;  %v590_v41 = vpop.f32.mrf.mxu0 }
 0x237   :  { %v2147_v15 = vpop.f32.mrf.mxu3  ;;  %v2421_v34 = vpack.c.bf16 %v2357_v50, %v2357_v50  ;;  %v1642_v62 = vadd.f32 %v1560_v6, %v1038_v53  ;;  %v1039_v30 = vpop.f32.mrf.mxu1 }
 0x238   :  { %v1040_v58 = vadd.f32 %v1039_v30, %v590_v41 }
 0x239   :  { %v2229_v39 = vadd.f32 %v2147_v15, %v1642_v62  ;;  %v2644_v2 = vunpack.c.l.b16 %v2421_v34 }
 0x23b   :  { %v2294_v31 = vadd.f32 %v5506_v7, %v2229_v39  ;;  %v2645_v47 = vpack.c.b16 %v2644_v2, %v2644_v2 }
 0x23d   :  { %v2358_v55 = vmax.f32 %v2294_v31, 0.0  ;;  %v2652_v56 = vsel %vm2446_vm1, %v2419_v25, %v2645_v47  ;;  %v2682_v31 = vunpack.c.l.b16 %v6206_v52 }
 0x23e   :  { %v1562_v5 = vpop.f32.mrf.mxu2  ;;  %2828 = vrot.lane.b32.xlu0 %v2652_v56, %s5262_s19  ;;  %v6344_v1 = vpop.f32.mrf.mxu0 }
 0x23f   :  { %v2149_v36 = vpop.f32.mrf.mxu3  ;;  %v6342_v54 = vpack.c.bf16 %v2358_v55, %v2358_v55  ;;  %v1643_v38 = vadd.f32 %v1562_v5, %v1040_v58  ;;  %v6346_v21 = vpop.f32.mrf.mxu1 }
 0x240   :  { %v2827_v40 = vpop.permute.xlu0 %2826 }
 0x241   :  { %v2657_v27 = vunpack.c.l.b16 %v6342_v54  ;;  %v2230_v44 = vadd.f32 %v2149_v36, %v1643_v38  ;;  %v2980_v23 = vsel %vm2903_vm2, %v6072_v18, %v2827_v40 }
 0x243   :  { %v2658_v12 = vpack.c.b16 %v2657_v27, %v2657_v27  ;;  %v2295_v60 = vadd.f32 %v5506_v7, %v2230_v44 }
 0x245   :  { %v2359_v48 = vmax.f32 %v2295_v60, 0.0  ;;  %v2666_v13 = vsel %vm2446_vm1, %v2420_v26, %v2658_v12 }
 0x246   :  { %v6351_v14 = vpop.f32.mrf.mxu2  ;;  %2843 = vrot.lane.b32.xlu1 %v2666_v13, %s5263_s28  ;;  %v595_v9 = vpop.f32.mrf.mxu0 }
 0x247   :  { %v6353_v19 = vpop.f32.mrf.mxu3  ;;  %v6356_v16 = vpack.c.bf16 %v2359_v48, %v2359_v48  ;;  %v1044_v51 = vpop.f32.mrf.mxu1  ;;  %v2683_v48 = vpack.c.b16 %v2682_v31, %v2682_v31 }
 0x248   :  { %v1045_v49 = vadd.f32 %v1044_v51, %v595_v9  ;;  %v2842_v11 = vpop.permute.xlu1 %2841 }
 0x249   :  { %v2671_v43 = vunpack.c.l.b16 %v6356_v16  ;;  %v2991_v17 = vsel %vm352_vm0, %v2980_v23, %v2842_v11 }
 0x24b   :  { %v2672_v29 = vpack.c.b16 %v2671_v43, %v2671_v43 }
 0x24d   :  { %v2680_v42 = vsel %vm2446_vm1, %v2421_v34, %v2672_v29  ;;  %v2746_v34 = vpop.permute.xlu2 %2745 }
 0x24e   :  { %v1567_v22 = vpop.f32.mrf.mxu2  ;;  %2857 = vrot.lane.b32.xlu0 %v2680_v42, %s5264_s29  ;;  %v598_v59 = vpop.f32.mrf.mxu0  ;;  %v2911_v36 = vsel %vm2903_vm2, %v6041_v8, %v2746_v34  ;;  %v2690_v8 = vsel %vm2446_vm1, %v5923_v10, %v2683_v48 }
 0x24f   :  { %v2154_v26 = vpop.f32.mrf.mxu3  ;;  %v1645_v35 = vadd.f32 %v1567_v22, %v1045_v49  ;;  %v1047_v45 = vpop.f32.mrf.mxu1 }
 0x250   :  { %v1048_v20 = vadd.f32 %v1047_v45, %v598_v59  ;;  %v2856_v32 = vpop.permute.xlu0 %2855 }
 0x251   :  { %v6364_v33 = vadd.f32 %v2154_v26, %v1645_v35  ;;  %v3003_v37 = vsel %vm2924_vm3, %v2991_v17, %v2856_v32 }
 0x252   :  { %3388 = vmatmul.bf16.gmra.mxu2 %v3003_v37 }
 0x255   :  { %v2760_v25 = vpop.permute.xlu2 %2759 }
 0x256   :  { %v1570_v63 = vpop.f32.mrf.mxu2  ;;  %v600_v6 = vpop.f32.mrf.mxu0  ;;  %v2921_v27 = vsel %vm352_vm0, %v2911_v36, %v2760_v25  ;;  %v1043_v25 = vadd.f32 %v6346_v21, %v6344_v1  ;;  %v2589_v36 = vunpack.c.l.b16 %v6283_v61 }
 0x257   :  { %v2157_v53 = vpop.f32.mrf.mxu3  ;;  %v1646_v50 = vadd.f32 %v1570_v63, %v1048_v20  ;;  %v1049_v15 = vpop.f32.mrf.mxu1 }
 0x258   :  { %v1050_v44 = vadd.f32 %v1049_v15, %v600_v6 }
 0x259   :  { %v2233_v0 = vadd.f32 %v2157_v53, %v1646_v50 }
 0x25b   :  { %v2298_v13 = vadd.f32 %v5506_v7, %v2233_v0 }
 0x25d   :  { %v2362_v43 = vmax.f32 %v2298_v13, 0.0 }
 0x25e   :  { %v1572_v18 = vpop.f32.mrf.mxu2  ;;  %v603_v41 = vpop.f32.mrf.mxu0 }
 0x25f   :  { %v2159_v62 = vpop.f32.mrf.mxu3  ;;  %v1052_v30 = vpop.f32.mrf.mxu1  ;;  %v1647_v52 = vadd.f32 %v1572_v18, %v1050_v44  ;;  %v2426_v63 = vpack.c.bf16 %v2362_v43, %v2362_v43 }
 0x260   :  { %v2867_v39 = vpop.permute.xlu1 %2866  ;;  %v1053_v2 = vadd.f32 %v1052_v30, %v603_v41 }
 0x261   :  { %v2234_v42 = vadd.f32 %v2159_v62, %v1647_v52  ;;  %v3014_v22 = vsel %vm2903_vm2, %v2690_v8, %v2867_v39 }
 0x263   :  { %v2299_v10 = vadd.f32 %v5506_v7, %v2234_v42 }
 0x265   :  { %v2363_v62 = vmax.f32 %v2299_v10, 0.0 }
 0x266   :  { %v1575_v47 = vpop.f32.mrf.mxu2  ;;  %v605_v56 = vpop.f32.mrf.mxu0 }
 0x267   :  { %v2162_v55 = vpop.f32.mrf.mxu3  ;;  %v1648_v58 = vadd.f32 %v1575_v47, %v1053_v2  ;;  %v1054_v5 = vpop.f32.mrf.mxu1 }
 0x268   :  { %v2882_v38 = vpop.permute.xlu0 %2881  ;;  %v2774_v60 = vpop.permute.xlu1 %2773  ;;  %v1055_v49 = vadd.f32 %v1054_v5, %v605_v56  ;;  %v1644_v5 = vadd.f32 %v6351_v14, %v1043_v25  ;;  %v2297_v25 = vadd.f32 %v5506_v7, %v6364_v33 }
 0x269   :  { %v2235_v12 = vadd.f32 %v2162_v55, %v1648_v58  ;;  %v2935_v9 = vsel %vm2924_vm3, %v2921_v27, %v2774_v60  ;;  %v3025_v45 = vsel %vm352_vm0, %v3014_v22, %v2882_v38  ;;  %v2427_v55 = vpack.c.bf16 %v2363_v62, %v2363_v62 }
 0x26a   :  { %3327 = vmatmul.bf16.gmra.mxu0 %v2935_v9  ;;  %v2231_v9 = vadd.f32 %v6353_v19, %v1644_v5 }
 0x26b   :  { %v2300_v51 = vadd.f32 %v5506_v7, %v2235_v12 }
 0x26c   :  { %v2296_v43 = vadd.f32 %v5506_v7, %v2231_v9 }
 0x26d   :  { %v2364_v40 = vmax.f32 %v2300_v51, 0.0  ;;  %v2590_v51 = vpack.c.b16 %v2589_v36, %v2589_v36  ;;  %v2361_v36 = vmax.f32 %v2297_v25, 0.0 }
 0x26e   :  { %v1577_v29 = vpop.f32.mrf.mxu2  ;;  %v608_v35 = vpop.f32.mrf.mxu0 }
 0x26f   :  { %v2164_v11 = vpop.f32.mrf.mxu3  ;;  %v2428_v26 = vpack.c.bf16 %v2364_v40, %v2364_v40  ;;  %v1649_v23 = vadd.f32 %v1577_v29, %v1055_v49  ;;  %v1057_v59 = vpop.f32.mrf.mxu1  ;;  %v2602_v29 = vsel %vm2446_vm1, %v6180_v24, %v2590_v51  ;;  %v6405_v24 = vld [vmem:[%s6603_s4] sm:$0x7] }
 0x270   :  { %v2896_v17 = vpop.permute.xlu0 %2895  ;;  %v1058_v6 = vadd.f32 %v1057_v59, %v608_v35  ;;  %v2360_v59 = vmax.f32 %v2296_v43, 0.0 }
 0x271   :  { %v2685_v20 = vunpack.c.l.b16 %v2428_v26  ;;  %v2236_v32 = vadd.f32 %v2164_v11, %v1649_v23  ;;  %v3036_v37 = vsel %vm2924_vm3, %v3025_v45, %v2896_v17 }
 0x272   :  { %3416 = vmatmul.bf16.gmra.mxu3 %v3036_v37 }
 0x273   :  { %v2686_v53 = vpack.c.b16 %v2685_v20, %v2685_v20  ;;  %v2301_v50 = vadd.f32 %v5506_v7, %v2236_v32  ;;  %v2424_v32 = vpack.c.bf16 %v2360_v59, %v2360_v59 }
 0x275   :  { %v2365_v15 = vmax.f32 %v2301_v50, 0.0  ;;  %v6382_v0 = vsel %vm2446_vm1, %v2426_v63, %v2686_v53 }
 0x276   :  { %v1580_v34 = vpop.f32.mrf.mxu2  ;;  %v610_v39 = vpop.f32.mrf.mxu0 }
 0x277   :  { %v2167_v18 = vpop.f32.mrf.mxu3  ;;  %v2429_v41 = vpack.c.bf16 %v2365_v15, %v2365_v15  ;;  %v1650_v30 = vadd.f32 %v1580_v34, %v1058_v6  ;;  %v1059_v2 = vpop.f32.mrf.mxu1 }
 0x278   :  { %v1060_v27 = vadd.f32 %v1059_v2, %v610_v39 }
 0x279   :  { %v2698_v31 = vunpack.c.l.b16 %v2429_v41  ;;  %v2237_v47 = vadd.f32 %v2167_v18, %v1650_v30 }
 0x27b   :  { %v2699_v58 = vpack.c.b16 %v2698_v31, %v2698_v31  ;;  %v2302_v56 = vadd.f32 %v5506_v7, %v2237_v47 }
 0x27d   :  { %v2366_v38 = vmax.f32 %v2302_v56, 0.0  ;;  %v2706_v44 = vsel %vm2446_vm1, %v2427_v55, %v2699_v58 }
 0x27e   :  { %v1582_v12 = vpop.f32.mrf.mxu2  ;;  %2870 = vrot.lane.b32.xlu1 %v2706_v44, %s5262_s19  ;;  %v613_v21 = vpop.f32.mrf.mxu0 }
 0x27f   :  { %v2169_v60 = vpop.f32.mrf.mxu3  ;;  %v6391_v48 = vpack.c.bf16 %v2366_v38, %v2366_v38  ;;  %v1651_v1 = vadd.f32 %v1582_v12, %v1060_v27  ;;  %v1062_v13 = vpop.f32.mrf.mxu1 }
 0x280   :  { %v2869_v37 = vpop.permute.xlu1 %2868  ;;  %v1063_v10 = vadd.f32 %v1062_v13, %v613_v21 }
 0x281   :  { %v2711_v52 = vunpack.c.l.b16 %v6391_v48  ;;  %v2238_v14 = vadd.f32 %v2169_v60, %v1651_v1  ;;  %v3016_v6 = vsel %vm2903_vm2, %v2602_v29, %v2869_v37  ;;  %v2425_v60 = vpack.c.bf16 %v2361_v36, %v2361_v36 }
 0x283   :  { %v2712_v40 = vpack.c.b16 %v2711_v52, %v2711_v52  ;;  %v2303_v49 = vadd.f32 %v5506_v7, %v2238_v14 }
 0x285   :  { %v2367_v8 = vmax.f32 %v2303_v49, 0.0  ;;  %v2720_v11 = vsel %vm2446_vm1, %v2428_v26, %v2712_v40  ;;  %v6408_v26 = vperm.slane %v6405_v24, 1 }
 0x286   :  { %v1585_v42 = vpop.f32.mrf.mxu2  ;;  %2885 = vrot.lane.b32.xlu0 %v2720_v11, %s5263_s28  ;;  %2801 = vrot.lane.b32.xlu1 %v2602_v29, %s5263_s28  ;;  %v615_v23 = vpop.f32.mrf.mxu0 }
 0x287   :  { %v2172_v22 = vpop.f32.mrf.mxu3  ;;  %v2431_v19 = vpack.c.bf16 %v2367_v8, %v2367_v8  ;;  %v1064_v35 = vpop.f32.mrf.mxu1  ;;  %v1652_v2 = vadd.f32 %v1585_v42, %v1063_v10 }
 0x288   :  { %v2884_v45 = vpop.permute.xlu0 %2883  ;;  %v1065_v47 = vadd.f32 %v1064_v35, %v615_v23 }
 0x289   :  { %v2725_v17 = vunpack.c.l.b16 %v2431_v19  ;;  %v3027_v18 = vsel %vm352_vm0, %v3016_v6, %v2884_v45  ;;  %v2239_v31 = vadd.f32 %v2172_v22, %v1652_v2 }
 0x28b   :  { %v2726_v20 = vpack.c.b16 %v2725_v17, %v2725_v17  ;;  %v2304_v44 = vadd.f32 %v5506_v7, %v2239_v31 }
 0x28d   :  { %v2734_v63 = vsel %vm2446_vm1, %v2429_v41, %v2726_v20  ;;  %v2368_v1 = vmax.f32 %v2304_v44, 0.0 }
 0x28e   :  { %v1587_v53 = vpop.f32.mrf.mxu2  ;;  %2899 = vrot.lane.b32.xlu0 %v2734_v63, %s5264_s29  ;;  %2845 = vrot.lane.b32.xlu1 %v2424_v32, %s5263_s28  ;;  %v3313_v15 = vpop.f32.mrf.mxu0 }
 0x28f   :  { %v2174_v50 = vpop.f32.mrf.mxu3  ;;  %v3346_v34 = vpop.f32.mrf.mxu1  ;;  %v3314_v30 = vadd.f32 %v3313_v15, %v6408_v26  ;;  %v1653_v12 = vadd.f32 %v1587_v53, %v1065_v47  ;;  %v2432_v40 = vpack.c.bf16 %v2368_v1, %v2368_v1 }
 0x290   :  { %v2898_v62 = vpop.permute.xlu0 %2897 }
 0x291   :  { %v3039_v39 = vsel %vm2924_vm3, %v3027_v18, %v2898_v62  ;;  %v3347_v41 = vadd.f32 %v3346_v34, %v3314_v30  ;;  %v2240_v21 = vadd.f32 %v2174_v50, %v1653_v12  ;;  %v2788_v62 = vpop.permute.xlu2 %2787  ;;  %v5229_v30 = vld [vmem:[%s6605_s3 + $0x38] sm:$0xff] }
 0x292   :  { %3421 = vmatmul.bf16.gmra.mxu3 %v3039_v39  ;;  %3782 = vmatpush.bf16.msra.mxu0 %v5229_v30 }
 0x293   :  { %v2305_v49 = vadd.f32 %v5506_v7, %v2240_v21 }
 0x295   :  { %v2369_v11 = vmax.f32 %v2305_v49, 0.0  ;;  %v5223_v49 = vld [vmem:[%s6605_s3 + $0x8] sm:$0xff] }
 0x296   :  { %2830 = vrot.lane.b32.xlu0 %v6356_v16, %s5262_s19  ;;  %2872 = vrot.lane.b32.xlu1 %v2431_v19, %s5262_s19  ;;  %v3379_v55 = vpop.f32.mrf.mxu2  ;;  %v3315_v56 = vpop.f32.mrf.mxu0 }
 0x297   :  { %v3380_v58 = vadd.f32 %v3379_v55, %v3347_v41  ;;  %v3348_v5 = vpop.f32.mrf.mxu1  ;;  %v3412_v38 = vpop.f32.mrf.mxu3  ;;  %v3316_v33 = vadd.f32 %v3315_v56, %v6408_v26  ;;  %v2433_v19 = vpack.c.bf16 %v2369_v11, %v2369_v11  ;;  %v5227_v41 = vld [vmem:[%s6605_s3 + $0x28] sm:$0xff]  ;;  %v5226_v55 = vld [vmem:[%s6605_s3 + $0x20] sm:$0xff] }
 0x299   :  { %v6422_v27 = vadd.f32 %v3412_v38, %v3380_v58  ;;  %v3349_v13 = vadd.f32 %v3348_v5, %v3316_v33  ;;  %v2816_v39 = vpop.permute.xlu2 %2815  ;;  %v2947_v58 = vsel %vm2903_vm2, %v6215_v57, %v2788_v62  ;;  %v5225_v33 = vld [vmem:[%s6605_s3 + $0x18] sm:$0xff]  ;;  %v5224_v57 = vld [vmem:[%s6605_s3 + $0x10] sm:$0xff] }
 0x29e   :  { %2859 = vrot.lane.b32.xlu0 %v2425_v60, %s5264_s29  ;;  %2775 = vrot.lane.b32.xlu1 %v6110_v4, %s5264_s29  ;;  %v3381_v16 = vpop.f32.mrf.mxu2  ;;  %v3318_v9 = vpop.f32.mrf.mxu0 }
 0x29f   :  { %v3351_v52 = vpop.f32.mrf.mxu1  ;;  %v3382_v14 = vadd.f32 %v3381_v16, %v3349_v13  ;;  %v3319_v51 = vadd.f32 %v3318_v9, %v6408_v26  ;;  %v3414_v8 = vpop.f32.mrf.mxu3 }
 0x2a1   :  { %v3352_v43 = vadd.f32 %v3351_v52, %v3319_v51  ;;  %v3415_v29 = vadd.f32 %v3414_v8, %v3382_v14  ;;  %v2748_v36 = vpop.permute.xlu2 %2747 }
 0x2a3   :  { %v3437_v22 = vmax.f32 %v3415_v29, 0.0 }
 0x2a5   :  { %v3446_v23 = vpack.c.bf16 %v3437_v22, %v3437_v22 }
 0x2a6   :  { %2887 = vrot.lane.b32.xlu0 %v2432_v40, %s5263_s28  ;;  %2803 = vrot.lane.b32.xlu1 %v6266_v28, %s5263_s28  ;;  %v3320_v42 = vpop.f32.mrf.mxu0 }
 0x2a7   :  { %v3353_v4 = vpop.f32.mrf.mxu1  ;;  %v3455_v59 = vunpack.c.l.b16 %v3446_v23  ;;  %v3321_v31 = vadd.f32 %v3320_v42, %v6408_v26 }
 0x2a9   :  { %v3456_v20 = vpack.c.b16 %v3455_v59, %v3455_v59  ;;  %v3354_v44 = vadd.f32 %v3353_v4, %v3321_v31  ;;  %v3436_v31 = vmax.f32 %v6422_v27, 0.0  ;;  %v5235_v27 = vld [vmem:[%s6605_s3 + $0x68] sm:$0xff] }
 0x2ae   :  { %2901 = vrot.lane.b32.xlu0 %v2433_v19, %s5264_s29  ;;  %v3323_v35 = vpop.f32.mrf.mxu0  ;;  %v2913_v19 = vsel %vm2903_vm2, %v6056_v3, %v2748_v36 }
 0x2af   :  { %v3324_v7 = vadd.f32 %v3323_v35, %v6408_v26  ;;  %v3356_v45 = vpop.f32.mrf.mxu1 }
 0x2b0   :  { %v2829_v63 = vpop.permute.xlu0 %2828 }
 0x2b1   :  { %v3357_v17 = vadd.f32 %v3356_v45, %v3324_v7  ;;  %v2982_v10 = vsel %vm2903_vm2, %v6337_v46, %v2829_v63  ;;  %v5228_v46 = vld [vmem:[%s6605_s3 + $0x30] sm:$0xff] }
 0x2b2   :  { %3783 = vmatpush.bf16.msra.mxu0 %v5228_v46 }
 0x2b5   :  { %v3384_v32 = vpop.f32.mrf.mxu2 }
 0x2b6   :  { %v3385_v37 = vadd.f32 %v3384_v32, %v3352_v43  ;;  %3457 = vrot.lane.b32.xlu0 %v3456_v20, %s5263_s28  ;;  %3784 = vmatpush.bf16.msra.mxu0 %v5227_v41  ;;  %v2762_v43 = vpop.permute.xlu2 %2761  ;;  %v3325_v20 = vpop.f32.mrf.mxu0 }
 0x2b7   :  { %v2923_v23 = vsel %vm352_vm0, %v2913_v19, %v2762_v43  ;;  %v5256_v19 = vld [vmem:[%s6605_s3 + $0x110] sm:$0xff] }
 0x2b8   :  { %v2844_v28 = vpop.permute.xlu1 %2843 }
 0x2b9   :  { %v2993_v53 = vsel %vm352_vm0, %v2982_v10, %v2844_v28 }
 0x2ba   :  { %3785 = vmatpush.bf16.msra.mxu0 %v5226_v55 }
 0x2bd   :  { %v3386_v15 = vpop.f32.mrf.mxu2 }
 0x2be   :  { %v3387_v60 = vadd.f32 %v3386_v15, %v3354_v44  ;;  %3786 = vmatpush.bf16.msra.mxu0 %v5225_v33  ;;  %v2790_v4 = vpop.permute.xlu2 %2789  ;;  %v5234_v44 = vld [vmem:[%s6605_s3 + $0x60] sm:$0xff]  ;;  %v5232_v33 = vld [vmem:[%s6605_s3 + $0x50] sm:$0xff] }
 0x2bf   :  { %v2949_v63 = vsel %vm2903_vm2, %v6283_v61, %v2790_v4 }
 0x2c0   :  { %v2858_v50 = vpop.permute.xlu0 %2857 }
 0x2c1   :  { %v3006_v6 = vsel %vm2924_vm3, %v2993_v53, %v2858_v50  ;;  %v3358_v53 = vpop.f32.mrf.mxu1 }
 0x2c2   :  { %3393 = vmatmul.bf16.gmra.mxu2 %v3006_v6  ;;  %3787 = vmatpush.bf16.msra.mxu0 %v5224_v57  ;;  %v5244_v57 = vld [vmem:[%s6605_s3 + $0xb0] sm:$0xff] }
 0x2c6   :  { %3788 = vmatpush.bf16.msra.mxu0 %v5223_v49  ;;  %v2818_v3 = vpop.permute.xlu2 %2817 }
 0x2d5   :  { %v3389_v34 = vpop.f32.mrf.mxu2 }
 0x2d6   :  { %v6441_v18 = vadd.f32 %v3389_v34, %v3357_v17 }
 0x2dd   :  { %v3391_v50 = vpop.f32.mrf.mxu2 }
 0x2f0   :  { %v2871_v2 = vpop.permute.xlu1 %2870 }
 0x2f1   :  { %v3018_v13 = vsel %vm2903_vm2, %v6382_v0, %v2871_v2  ;;  %v5222_v0 = vld [vmem:[%s6605_s3] sm:$0xff] }
 0x2f2   :  { %3789 = vmatpush.bf16.msra.mxu0 %v5222_v0 }
 0x2f5   :  { %v3417_v25 = vpop.f32.mrf.mxu3 }
 0x2f6   :  { %v6453_v47 = vadd.f32 %v3417_v25, %v3385_v37  ;;  %v3326_v37 = vadd.f32 %v3325_v20, %v6408_v26 }
 0x2f8   :  { %v2886_v56 = vpop.permute.xlu0 %2885  ;;  %v2802_v5 = vpop.permute.xlu1 %2801  ;;  %v3359_v15 = vadd.f32 %v3358_v53, %v3326_v37  ;;  %v5254_v37 = vld [vmem:[%s6605_s3 + $0x100] sm:$0xff] }
 0x2f9   :  { %v2957_v38 = vsel %vm352_vm0, %v2947_v58, %v2802_v5  ;;  %v3029_v16 = vsel %vm352_vm0, %v3018_v13, %v2886_v56  ;;  %v3445_v56 = vpack.c.bf16 %v3436_v31, %v3436_v31  ;;  %v5243_v13 = vld [vmem:[%s6605_s3 + $0xa8] sm:$0xff] }
 0x2fa   :  { %v2970_v12 = vsel %vm2924_vm3, %v2957_v38, %v2816_v39  ;;  %v3392_v62 = vadd.f32 %v3391_v50, %v3359_v15  ;;  %v5236_v38 = vld [vmem:[%s6605_s3 + $0x70] sm:$0xff] }
 0x2fb   :  { %3360 = vmatmul.bf16.gmra.mxu1 %v2970_v12  ;;  %v5233_v12 = vld [vmem:[%s6605_s3 + $0x58] sm:$0xff] }
 0x2fd   :  { %v3419_v1 = vpop.f32.mrf.mxu3 }
 0x2fe   :  { %v3420_v21 = vadd.f32 %v3419_v1, %v3387_v60  ;;  %v5231_v60 = vld [vmem:[%s6605_s3 + $0x48] sm:$0xff]  ;;  %v5230_v1 = vld [vmem:[%s6605_s3 + $0x40] sm:$0xff] }
 0x300   :  { %v3439_v9 = vmax.f32 %v3420_v21, 0.0  ;;  %v2900_v52 = vpop.permute.xlu0 %2899  ;;  %v2846_v14 = vpop.permute.xlu1 %2845  ;;  %v5245_v21 = vld [vmem:[%s6605_s3 + $0xb8] sm:$0xff] }
 0x301   :  { %v3042_v51 = vsel %vm2924_vm3, %v3029_v16, %v2900_v52  ;;  %3808 = vmatpush.bf16.msra.mxu2 %v5245_v21  ;;  %v5242_v16 = vld [vmem:[%s6605_s3 + $0xa0] sm:$0xff]  ;;  %v5240_v52 = vld [vmem:[%s6605_s3 + $0x90] sm:$0xff] }
 0x302   :  { %v3448_v40 = vpack.c.bf16 %v3439_v9, %v3439_v9  ;;  %3426 = vmatmul.bf16.gmra.mxu3 %v3042_v51  ;;  %v5241_v9 = vld [vmem:[%s6605_s3 + $0x98] sm:$0xff]  ;;  %v5239_v51 = vld [vmem:[%s6605_s3 + $0x88] sm:$0xff] }
 0x304   :  { %v3460_v8 = vunpack.c.l.b16 %v3448_v40  ;;  %v3438_v40 = vmax.f32 %v6453_v47, 0.0  ;;  %v5257_v47 = vld [vmem:[%s6605_s3 + $0x118] sm:$0xff] }
 0x305   :  { %3809 = vmatpush.bf16.msra.mxu2 %v5244_v57  ;;  %3838 = vmatpush.bf16.msrb.mxu0 %v5257_v47 }
 0x306   :  { %v3461_v29 = vpack.c.b16 %v3460_v8, %v3460_v8  ;;  %v5238_v8 = vld [vmem:[%s6605_s3 + $0x80] sm:$0xff] }
 0x308   :  { %v2831_v11 = vpop.permute.xlu0 %2830  ;;  %v2873_v42 = vpop.permute.xlu1 %2872  ;;  %3462 = vrot.lane.b32.xlu0 %v3461_v29, %s5263_s28  ;;  %v3447_v29 = vpack.c.bf16 %v3438_v40, %v3438_v40 }
 0x309   :  { %v2985_v22 = vsel %vm2903_vm2, %v6342_v54, %v2831_v11  ;;  %3810 = vmatpush.bf16.msra.mxu2 %v5243_v13  ;;  %3839 = vmatpush.bf16.msrb.mxu0 %v5256_v19 }
 0x30a   :  { %v2995_v7 = vsel %vm352_vm0, %v2985_v22, %v2846_v14  ;;  %v3328_v14 = vpop.f32.mrf.mxu0 }
 0x30b   :  { %v3329_v49 = vadd.f32 %v3328_v14, %v6408_v26 }
 0x30d   :  { %3811 = vmatpush.bf16.msra.mxu2 %v5242_v16 }
 0x310   :  { %v2860_v35 = vpop.permute.xlu0 %2859  ;;  %v2776_v59 = vpop.permute.xlu1 %2775 }
 0x311   :  { %v2938_v45 = vsel %vm2924_vm3, %v2923_v23, %v2776_v59  ;;  %v3009_v17 = vsel %vm2924_vm3, %v2995_v7, %v2860_v35  ;;  %3812 = vmatpush.bf16.msra.mxu2 %v5241_v9  ;;  %v5253_v23 = vld [vmem:[%s6605_s3 + $0xf8] sm:$0xff]  ;;  %v5255_v59 = vld [vmem:[%s6605_s3 + $0x108] sm:$0xff] }
 0x312   :  { %3332 = vmatmul.bf16.gmra.mxu0 %v2938_v45  ;;  %3398 = vmatmul.bf16.gmra.mxu2 %v3009_v17  ;;  %v3330_v35 = vpop.f32.mrf.mxu0 }
 0x313   :  { %3821 = vmatpush.bf16.msra.mxu3 %v5253_v23  ;;  %v3331_v17 = vadd.f32 %v3330_v35, %v6408_v26  ;;  %3840 = vmatpush.bf16.msrb.mxu0 %v5255_v59 }
 0x315   :  { %v3422_v32 = vpop.f32.mrf.mxu3  ;;  %3813 = vmatpush.bf16.msra.mxu2 %v5240_v52  ;;  %v3562_v52 = vperm.slane %v6405_v24, 2 }
 0x316   :  { %v6489_v54 = vadd.f32 %v3422_v32, %v6441_v18  ;;  %v3021_v18 = vsel %vm2903_vm2, %v6391_v48, %v2873_v42  ;;  %v5237_v48 = vld [vmem:[%s6605_s3 + $0x78] sm:$0xff] }
 0x317   :  { %3795 = vmatpush.bf16.msra.mxu1 %v5237_v48  ;;  %3841 = vmatpush.bf16.msrb.mxu0 %v5254_v37 }
 0x318   :  { %v2888_v28 = vpop.permute.xlu0 %2887  ;;  %v2804_v10 = vpop.permute.xlu1 %2803 }
 0x319   :  { %v2959_v6 = vsel %vm352_vm0, %v2949_v63, %v2804_v10  ;;  %v3031_v39 = vsel %vm352_vm0, %v3021_v18, %v2888_v28  ;;  %3814 = vmatpush.bf16.msra.mxu2 %v5239_v51  ;;  %v5252_v10 = vld [vmem:[%s6605_s3 + $0xf0] sm:$0xff] }
 0x31a   :  { %v2973_v34 = vsel %vm2924_vm3, %v2959_v6, %v2818_v3  ;;  %3822 = vmatpush.bf16.msra.mxu3 %v5252_v10  ;;  %v5251_v6 = vld [vmem:[%s6605_s3 + $0xe8] sm:$0xff] }
 0x31b   :  { %3365 = vmatmul.bf16.gmra.mxu1 %v2973_v34 }
 0x31c   :  { %3796 = vmatpush.bf16.msra.mxu1 %v5236_v38  ;;  %v5246_v38 = vld [vmem:[%s6605_s3 + $0xc0] sm:$0xff] }
 0x31d   :  { %v3424_v30 = vpop.f32.mrf.mxu3  ;;  %3815 = vmatpush.bf16.msra.mxu2 %v5238_v8 }
 0x31e   :  { %v3425_v46 = vadd.f32 %v3424_v30, %v3392_v62  ;;  %3823 = vmatpush.bf16.msra.mxu3 %v5251_v6  ;;  %v5250_v62 = vld [vmem:[%s6605_s3 + $0xe0] sm:$0xff] }
 0x320   :  { %v3441_v2 = vmax.f32 %v3425_v46, 0.0  ;;  %v2902_v61 = vpop.permute.xlu0 %2901  ;;  %3797 = vmatpush.bf16.msra.mxu1 %v5235_v27  ;;  %v3440_v46 = vmax.f32 %v6489_v54, 0.0  ;;  %v5248_v54 = vld [vmem:[%s6605_s3 + $0xd0] sm:$0xff] }
 0x321   :  { %v3045_v41 = vsel %vm2924_vm3, %v3031_v39, %v2902_v61  ;;  %v5249_v61 = vld [vmem:[%s6605_s3 + $0xd8] sm:$0xff] }
 0x322   :  { %v3450_v25 = vpack.c.bf16 %v3441_v2, %v3441_v2  ;;  %3431 = vmatmul.bf16.gmra.mxu3 %v3045_v41 }
 0x323   :  { %3824 = vmatpush.bf16.msra.mxu3 %v5250_v62 }
 0x324   :  { %v3465_v55 = vunpack.c.l.b16 %v3450_v25  ;;  %3798 = vmatpush.bf16.msra.mxu1 %v5234_v44  ;;  %v3449_v25 = vpack.c.bf16 %v3440_v46, %v3440_v46 }
 0x326   :  { %v3466_v58 = vpack.c.b16 %v3465_v55, %v3465_v55 }
 0x327   :  { %3825 = vmatpush.bf16.msra.mxu3 %v5249_v61 }
 0x328   :  { %3467 = vrot.lane.b32.xlu1 %v3466_v58, %s5263_s28  ;;  %v3458_v5 = vpop.permute.xlu0 %3457  ;;  %3799 = vmatpush.bf16.msra.mxu1 %v5233_v12 }
 0x329   :  { %v3476_v36 = vsel %vm352_vm0, %v3445_v56, %v3458_v5  ;;  %v5247_v5 = vld [vmem:[%s6605_s3 + $0xc8] sm:$0xff] }
 0x32a   :  { %3790 = vmatmul.bf16.vlgmr.msra.gmra.mxu0 %v3476_v36 }
 0x32b   :  { %3826 = vmatpush.bf16.msra.mxu3 %v5248_v54 }
 0x32c   :  { %3800 = vmatpush.bf16.msra.mxu1 %v5232_v33 }
 0x32f   :  { %3827 = vmatpush.bf16.msra.mxu3 %v5247_v5 }
 0x330   :  { %3801 = vmatpush.bf16.msra.mxu1 %v5231_v60 }
 0x333   :  { %3828 = vmatpush.bf16.msra.mxu3 %v5246_v38 }
 0x334   :  { %3802 = vmatpush.bf16.msra.mxu1 %v5230_v1 }
 0x345   :  { %v3394_v11 = vpop.f32.mrf.mxu2 }
 0x34d   :  { %v3396_v3 = vpop.f32.mrf.mxu2 }
 0x378   :  { %v3361_v43 = vpop.f32.mrf.mxu1 }
 0x379   :  { %v3362_v0 = vadd.f32 %v3361_v43, %v3329_v49 }
 0x37a   :  { %v3463_v42 = vpop.permute.xlu0 %3462 }
 0x37b   :  { %v3480_v4 = vsel %vm352_vm0, %v3447_v29, %v3463_v42  ;;  %v3395_v22 = vadd.f32 %v3394_v11, %v3362_v0 }
 0x37c   :  { %3803 = vmatmul.bf16.vlgmr.msra.gmra.mxu1 %v3480_v4 }
 0x380   :  { %v3363_v7 = vpop.f32.mrf.mxu1 }
 0x381   :  { %v3364_v32 = vadd.f32 %v3363_v7, %v3331_v17 }
 0x383   :  { %v3397_v63 = vadd.f32 %v3396_v3, %v3364_v32 }
 0x385   :  { %v3427_v45 = vpop.f32.mrf.mxu3 }
 0x386   :  { %v3428_v20 = vadd.f32 %v3427_v45, %v3395_v22 }
 0x388   :  { %v3442_v57 = vmax.f32 %v3428_v20, 0.0 }
 0x38a   :  { %v3451_v13 = vpack.c.bf16 %v3442_v57, %v3442_v57 }
 0x38d   :  { %v3429_v28 = vpop.f32.mrf.mxu3 }
 0x38e   :  { %v3430_v53 = vadd.f32 %v3429_v28, %v3397_v63 }
 0x38f   :  { %v3333_v50 = vpop.f32.mrf.mxu0 }
 0x390   :  { %v3443_v15 = vmax.f32 %v3430_v53, 0.0  ;;  %v3334_v56 = vadd.f32 %v3333_v50, %v6408_v26 }
 0x392   :  { %v3452_v34 = vpack.c.bf16 %v3443_v15, %v3443_v15 }
 0x394   :  { %v3470_v30 = vunpack.c.l.b16 %v3452_v34 }
 0x395   :  { %v3399_v18 = vpop.f32.mrf.mxu2 }
 0x396   :  { %v3471_v39 = vpack.c.b16 %v3470_v30, %v3470_v30 }
 0x397   :  { %v3335_v2 = vpop.f32.mrf.mxu0 }
 0x398   :  { %v3366_v41 = vpop.f32.mrf.mxu1  ;;  %3472 = vrot.lane.b32.xlu2 %v3471_v39, %s5263_s28 }
 0x399   :  { %v3367_v36 = vadd.f32 %v3366_v41, %v3334_v56 }
 0x39a   :  { %v3468_v31 = vpop.permute.xlu1 %3467 }
 0x39b   :  { %v3484_v55 = vsel %vm352_vm0, %v3449_v25, %v3468_v31  ;;  %v3400_v27 = vadd.f32 %v3399_v18, %v3367_v36 }
 0x39c   :  { %3816 = vmatmul.bf16.vlgmr.msra.gmra.mxu2 %v3484_v55 }
 0x39d   :  { %v3401_v58 = vpop.f32.mrf.mxu2 }
 0x3a0   :  { %v3368_v48 = vpop.f32.mrf.mxu1 }
 0x3a5   :  { %v3432_v44 = vpop.f32.mrf.mxu3 }
 0x3a6   :  { %v3433_v12 = vadd.f32 %v3432_v44, %v3400_v27 }
 0x3a7   :  { %v3791_v33 = vpop.f32.mrf.mxu0 }
 0x3a8   :  { %v3444_v60 = vmax.f32 %v3433_v12, 0.0  ;;  %v3792_v14 = vadd.f32 %v3791_v33, %v3562_v52 }
 0x3aa   :  { %v3453_v1 = vpack.c.bf16 %v3444_v60, %v3444_v60 }
 0x3ac   :  { %5045 = vmatmul.msk.bf16.vlgmr.msrb.gmra.mxu0 %vm352_vm0, %v3453_v1 }
 0x3ad   :  { %v3434_v26 = vpop.f32.mrf.mxu3 }
 0x3af   :  { %v3793_v21 = vpop.f32.mrf.mxu0 }
 0x3f2   :  { %v3473_v16 = vpop.permute.xlu2 %3472 }
 0x3f3   :  { %v3488_v9 = vsel %vm352_vm0, %v3451_v13, %v3473_v16 }
 0x3f4   :  { %3829 = vmatmul.bf16.vlgmr.msra.gmra.mxu3 %v3488_v9 }
 0x3f9   :  { %v3804_v51 = vpop.f32.mrf.mxu1 }
 0x3fa   :  { %v3805_v40 = vadd.f32 %v3804_v51, %v3792_v14 }
 0x401   :  { %v3806_v49 = vpop.f32.mrf.mxu1 }
 0x41f   :  { %v3817_v43 = vpop.f32.mrf.mxu2 }
 0x420   :  { %v3818_v8 = vadd.f32 %v3817_v43, %v3805_v40 }
 0x427   :  { %v3819_v29 = vpop.f32.mrf.mxu2 }
 0x429   :  { %v3843_v0 = vpop.f32.mrf.mxu0 }
 0x431   :  { %v3845_v11 = vpop.f32.mrf.mxu0 }
 0x477   :  { %v3830_v42 = vpop.f32.mrf.mxu3 }
 0x478   :  { %v3831_v4 = vadd.f32 %v3830_v42, %v3818_v8 }
 0x47a   :  { %v3844_v22 = vadd.f32 %v3843_v0, %v3831_v4 }
 0x47c   :  { %v3847_v47 = vmax.f32 %v3844_v22, 0.0 }
 0x47e   :  { %3848 = vst.msk [vmem:[%s6606_s5] sm:$0xff] %vm352_vm0, %v3847_v47 }
 0x47f   :  { %v3832_v24 = vpop.f32.mrf.mxu3 }

</bundles_post_ra>
